<compile_context>
chip_gen: v5e
topology: v5e:2x2
jax: 0.10.0
libtpu: 0.0.40
codegen_flags: <defaults>
</compile_context>

<pallas_src>
import functools

import jax
import jax.numpy as jnp
from jax.experimental import pallas as pl
from jax.experimental.pallas import tpu as pltpu

D_IN, D1, D2, D3, D_OUT = 100, 256, 512, 1024, 28 * 28   # 784
D_IN_PAD = 128           # 100 -> 128   (lane-dense K for the first GEMM)
D_OUT_PAD = 896          # 784 -> 896 = 7*128 (unmasked output stores)


def _leaky_relu(x, slope=0.2):
    return jnp.where(x >= 0, x, slope * x)


def _round_up(n, m):
    return ((n + m - 1) // m) * m


def generator_kernel(x_ref,
                     w1_ref, b1_ref,
                     w2_ref, b2_ref,
                     w3_ref, b3_ref,
                     w4_ref, b4_ref,
                     o_ref):
    """Fused 4-layer MLP: bf16 MXU operands, f32 accumulation + activations."""
    x = x_ref[...].astype(jnp.bfloat16)

    h = jnp.dot(x, w1_ref[...], preferred_element_type=jnp.float32) + b1_ref[...]
    h = _leaky_relu(h)

    h = jnp.dot(h.astype(jnp.bfloat16), w2_ref[...],
                preferred_element_type=jnp.float32) + b2_ref[...]
    h = _leaky_relu(h)

    h = jnp.dot(h.astype(jnp.bfloat16), w3_ref[...],
                preferred_element_type=jnp.float32) + b3_ref[...]
    h = _leaky_relu(h)

    h = jnp.dot(h.astype(jnp.bfloat16), w4_ref[...],
                preferred_element_type=jnp.float32) + b4_ref[...]
    o_ref[...] = jnp.tanh(h).astype(o_ref.dtype)


@functools.partial(jax.jit, static_argnames=("batch_tile",))
def generator_forward(x, params, *, batch_tile=256):
    B = x.shape[0]
    (w1, b1), (w2, b2), (w3, b3), (w4, b4) = params

    # --- host-side layout prep: lane padding + bf16 weight storage ----------
    x_p = jnp.pad(x.astype(jnp.float32), ((0, 0), (0, D_IN_PAD - D_IN)))
    w1_p = jnp.pad(w1, ((0, D_IN_PAD - D_IN), (0, 0))).astype(jnp.bfloat16)
    w2_p = w2.astype(jnp.bfloat16)
    w3_p = w3.astype(jnp.bfloat16)
    w4_p = jnp.pad(w4, ((0, 0), (0, D_OUT_PAD - D_OUT))).astype(jnp.bfloat16)
    b1_p = b1.astype(jnp.float32)
    b2_p = b2.astype(jnp.float32)
    b3_p = b3.astype(jnp.float32)
    b4_p = jnp.pad(b4.astype(jnp.float32), ((0, 0), (0, D_OUT_PAD - D_OUT)))

    # --- batch tiling: clamp tile to the (8-aligned) batch, pad B to tile ---
    tile = min(batch_tile, _round_up(B, 8))
    B_pad = _round_up(B, tile)
    if B_pad != B:
        # Padded rows compute garbage values but are sliced off below and
        # never observed; this is harmless.
        x_p = jnp.pad(x_p, ((0, B_pad - B), (0, 0)))

    grid = (B_pad // tile,)

    def const_spec(shape):
        # Constant index_map -> block fetched once, stays resident in VMEM.
        return pl.BlockSpec(shape, lambda i: (0, 0))

    out = pl.pallas_call(
        generator_kernel,
        out_shape=jax.ShapeDtypeStruct((B_pad, D_OUT_PAD), jnp.float32),
        grid_spec=pltpu.PrefetchScalarGridSpec(
            num_scalar_prefetch=0,
            grid=grid,
            in_specs=[
                pl.BlockSpec((tile, D_IN_PAD), lambda i: (i, 0)),
                const_spec((D_IN_PAD, D1)), const_spec((1, D1)),
                const_spec((D1, D2)), const_spec((1, D2)),
                const_spec((D2, D3)), const_spec((1, D3)),
                const_spec((D3, D_OUT_PAD)), const_spec((1, D_OUT_PAD)),
            ],
            out_specs=pl.BlockSpec((tile, D_OUT_PAD), lambda i: (i, 0)),
        ),
        compiler_params=pltpu.CompilerParams(
            dimension_semantics=("parallel",),
            vmem_limit_bytes=48 * 1024 * 1024,
        ),
    )(x_p, w1_p, b1_p, w2_p, b2_p, w3_p, b3_p, w4_p, b4_p)

    return out[:B, :D_OUT]


def init_params(key):
    """Deterministic synthetic params (PyTorch-Linear-like uniform fan-in init)."""
    dims = [(D_IN, D1), (D1, D2), (D2, D3), (D3, D_OUT)]
    params = []
    for i, (fan_in, fan_out) in enumerate(dims):
        kw, kb = jax.random.split(jax.random.fold_in(key, i))
        bound = 1.0 / jnp.sqrt(fan_in)
        w = jax.random.uniform(kw, (fan_in, fan_out), jnp.float32, -bound, bound)
        b = jax.random.uniform(kb, (1, fan_out), jnp.float32, -bound, bound)
        params.append((w, b))
    return params


def generator_reference_f32(x, params):
    """Pure-f32 PyTorch-equivalent forward."""
    (w1, b1), (w2, b2), (w3, b3), (w4, b4) = params
    h = _leaky_relu(x @ w1 + b1)
    h = _leaky_relu(h @ w2 + b2)
    h = _leaky_relu(h @ w3 + b3)
    return jnp.tanh(h @ w4 + b4)


def generator_reference_bf16(x, params):
    """Same bf16-operand / f32-accumulation mixed precision as the kernel."""
    def dot16(a, w):
        return jnp.dot(a.astype(jnp.bfloat16), w.astype(jnp.bfloat16),
                       preferred_element_type=jnp.float32)
    (w1, b1), (w2, b2), (w3, b3), (w4, b4) = params
    h = _leaky_relu(dot16(x, w1) + b1)
    h = _leaky_relu(dot16(h, w2) + b2)
    h = _leaky_relu(dot16(h, w3) + b3)
    return jnp.tanh(dot16(h, w4) + b4)


if __name__ == "__main__":
    key = jax.random.PRNGKey(0)
    k_x, k_p = jax.random.split(key)

    # Small demo batch (exercises the 8-aligned tile clamp and padding path).
    B = 16
    x = jax.random.normal(k_x, (B, D_IN), jnp.float32)
    params = init_params(k_p)

    out = generator_forward(x, params)
    out = jax.block_until_ready(out)
    assert out.shape == (B, D_OUT)

    # Tight check vs. a pure-JAX reference with identical mixed precision.
    ref16 = generator_reference_bf16(x, params)
    assert jnp.allclose(out, ref16, atol=1e-2, rtol=1e-2), "mismatch vs bf16 reference"

    # Loose semantic check vs. the full-f32 PyTorch-equivalent forward
    # (tolerance relaxed because the kernel uses bf16 MXU operands).
    ref32 = generator_reference_f32(x, params)
    assert jnp.allclose(out, ref32, atol=5e-2, rtol=5e-2), "mismatch vs f32 reference"

    print("KERNEL_OK")
</pallas_src>

<mosaic_0001>
module attributes {stable_mosaic.version = 11 : i64} {
  func.func @generator_kernel(%arg0: i32, %arg1: memref<16x128xf32, #tpu.memory_space<vmem>>, %arg2: memref<128x256xbf16, #tpu.memory_space<vmem>>, %arg3: memref<1x256xf32, #tpu.memory_space<vmem>>, %arg4: memref<256x512xbf16, #tpu.memory_space<vmem>>, %arg5: memref<1x512xf32, #tpu.memory_space<vmem>>, %arg6: memref<512x1024xbf16, #tpu.memory_space<vmem>>, %arg7: memref<1x1024xf32, #tpu.memory_space<vmem>>, %arg8: memref<1024x896xbf16, #tpu.memory_space<vmem>>, %arg9: memref<1x896xf32, #tpu.memory_space<vmem>>, %arg10: memref<16x896xf32, #tpu.memory_space<vmem>>) attributes {dimension_semantics = [#tpu.dimension_semantics<parallel>], iteration_bounds = array<i64: 1>, scalar_prefetch = 0 : i64, scratch_operands = 0 : i64, tpu.core_type = #tpu.core_type<tc>, window_params = [{transform_indices = @transform_0, window_bounds = array<i64: 16, 128>}, {pipeline_mode = #tpu.pipeline_mode<synchronous>, transform_indices = @transform_1, window_bounds = array<i64: 128, 256>}, {pipeline_mode = #tpu.pipeline_mode<synchronous>, transform_indices = @transform_2, window_bounds = array<i64: 1, 256>}, {pipeline_mode = #tpu.pipeline_mode<synchronous>, transform_indices = @transform_3, window_bounds = array<i64: 256, 512>}, {pipeline_mode = #tpu.pipeline_mode<synchronous>, transform_indices = @transform_4, window_bounds = array<i64: 1, 512>}, {pipeline_mode = #tpu.pipeline_mode<synchronous>, transform_indices = @transform_5, window_bounds = array<i64: 512, 1024>}, {pipeline_mode = #tpu.pipeline_mode<synchronous>, transform_indices = @transform_6, window_bounds = array<i64: 1, 1024>}, {pipeline_mode = #tpu.pipeline_mode<synchronous>, transform_indices = @transform_7, window_bounds = array<i64: 1024, 896>}, {pipeline_mode = #tpu.pipeline_mode<synchronous>, transform_indices = @transform_8, window_bounds = array<i64: 1, 896>}, {transform_indices = @transform_9, window_bounds = array<i64: 16, 896>}]} {
    %c0 = arith.constant 0 : index
    %c0_0 = arith.constant 0 : index
    %0 = vector.load %arg1[%c0, %c0_0] : memref<16x128xf32, #tpu.memory_space<vmem>>, vector<16x128xf32>
    %1 = arith.truncf %0 : vector<16x128xf32> to vector<16x128xbf16>
    %c0_1 = arith.constant 0 : index
    %c0_2 = arith.constant 0 : index
    %2 = vector.load %arg2[%c0_1, %c0_2] : memref<128x256xbf16, #tpu.memory_space<vmem>>, vector<128x256xbf16>
    %cst = arith.constant dense<0.000000e+00> : vector<16x256xf32>
    %3 = tpu.matmul %1, %2, %cst {dimension_numbers = #tpu.dot_dimension_numbers<[1], [0], [0], [1], [0, 0, 1, 1], [], []>} : vector<16x128xbf16>, vector<128x256xbf16>, vector<16x256xf32> -> vector<16x256xf32>
    %c0_3 = arith.constant 0 : index
    %c0_4 = arith.constant 0 : index
    %4 = vector.load %arg3[%c0_3, %c0_4] : memref<1x256xf32, #tpu.memory_space<vmem>>, vector<1x256xf32>
    %5 = vector.broadcast %4 : vector<1x256xf32> to vector<16x256xf32>
    %6 = arith.addf %3, %5 : vector<16x256xf32>
    %cst_5 = arith.constant 0.000000e+00 : f32
    %7 = vector.broadcast %cst_5 : f32 to vector<16x256xf32>
    %8 = arith.cmpf oge, %6, %7 : vector<16x256xf32>
    %cst_6 = arith.constant 2.000000e-01 : f32
    %9 = vector.broadcast %cst_6 : f32 to vector<16x256xf32>
    %10 = arith.mulf %9, %6 : vector<16x256xf32>
    %11 = arith.select %8, %6, %10 : vector<16x256xi1>, vector<16x256xf32>
    %12 = arith.truncf %11 : vector<16x256xf32> to vector<16x256xbf16>
    %c0_7 = arith.constant 0 : index
    %c0_8 = arith.constant 0 : index
    %13 = vector.load %arg4[%c0_7, %c0_8] : memref<256x512xbf16, #tpu.memory_space<vmem>>, vector<256x512xbf16>
    %cst_9 = arith.constant dense<0.000000e+00> : vector<16x512xf32>
    %14 = tpu.matmul %12, %13, %cst_9 {dimension_numbers = #tpu.dot_dimension_numbers<[1], [0], [0], [1], [0, 0, 1, 1], [], []>} : vector<16x256xbf16>, vector<256x512xbf16>, vector<16x512xf32> -> vector<16x512xf32>
    %c0_10 = arith.constant 0 : index
    %c0_11 = arith.constant 0 : index
    %15 = vector.load %arg5[%c0_10, %c0_11] : memref<1x512xf32, #tpu.memory_space<vmem>>, vector<1x512xf32>
    %16 = vector.broadcast %15 : vector<1x512xf32> to vector<16x512xf32>
    %17 = arith.addf %14, %16 : vector<16x512xf32>
    %cst_12 = arith.constant 0.000000e+00 : f32
    %18 = vector.broadcast %cst_12 : f32 to vector<16x512xf32>
    %19 = arith.cmpf oge, %17, %18 : vector<16x512xf32>
    %cst_13 = arith.constant 2.000000e-01 : f32
    %20 = vector.broadcast %cst_13 : f32 to vector<16x512xf32>
    %21 = arith.mulf %20, %17 : vector<16x512xf32>
    %22 = arith.select %19, %17, %21 : vector<16x512xi1>, vector<16x512xf32>
    %23 = arith.truncf %22 : vector<16x512xf32> to vector<16x512xbf16>
    %c0_14 = arith.constant 0 : index
    %c0_15 = arith.constant 0 : index
    %24 = vector.load %arg6[%c0_14, %c0_15] : memref<512x1024xbf16, #tpu.memory_space<vmem>>, vector<512x1024xbf16>
    %cst_16 = arith.constant dense<0.000000e+00> : vector<16x1024xf32>
    %25 = tpu.matmul %23, %24, %cst_16 {dimension_numbers = #tpu.dot_dimension_numbers<[1], [0], [0], [1], [0, 0, 1, 1], [], []>} : vector<16x512xbf16>, vector<512x1024xbf16>, vector<16x1024xf32> -> vector<16x1024xf32>
    %c0_17 = arith.constant 0 : index
    %c0_18 = arith.constant 0 : index
    %26 = vector.load %arg7[%c0_17, %c0_18] : memref<1x1024xf32, #tpu.memory_space<vmem>>, vector<1x1024xf32>
    %27 = vector.broadcast %26 : vector<1x1024xf32> to vector<16x1024xf32>
    %28 = arith.addf %25, %27 : vector<16x1024xf32>
    %cst_19 = arith.constant 0.000000e+00 : f32
    %29 = vector.broadcast %cst_19 : f32 to vector<16x1024xf32>
    %30 = arith.cmpf oge, %28, %29 : vector<16x1024xf32>
    %cst_20 = arith.constant 2.000000e-01 : f32
    %31 = vector.broadcast %cst_20 : f32 to vector<16x1024xf32>
    %32 = arith.mulf %31, %28 : vector<16x1024xf32>
    %33 = arith.select %30, %28, %32 : vector<16x1024xi1>, vector<16x1024xf32>
    %34 = arith.truncf %33 : vector<16x1024xf32> to vector<16x1024xbf16>
    %c0_21 = arith.constant 0 : index
    %c0_22 = arith.constant 0 : index
    %35 = vector.load %arg8[%c0_21, %c0_22] : memref<1024x896xbf16, #tpu.memory_space<vmem>>, vector<1024x896xbf16>
    %cst_23 = arith.constant dense<0.000000e+00> : vector<16x896xf32>
    %36 = tpu.matmul %34, %35, %cst_23 {dimension_numbers = #tpu.dot_dimension_numbers<[1], [0], [0], [1], [0, 0, 1, 1], [], []>} : vector<16x1024xbf16>, vector<1024x896xbf16>, vector<16x896xf32> -> vector<16x896xf32>
    %c0_24 = arith.constant 0 : index
    %c0_25 = arith.constant 0 : index
    %37 = vector.load %arg9[%c0_24, %c0_25] : memref<1x896xf32, #tpu.memory_space<vmem>>, vector<1x896xf32>
    %38 = vector.broadcast %37 : vector<1x896xf32> to vector<16x896xf32>
    %39 = arith.addf %36, %38 : vector<16x896xf32>
    %40 = math.tanh %39 : vector<16x896xf32>
    %c0_26 = arith.constant 0 : index
    %c0_27 = arith.constant 0 : index
    %41 = vector.load %arg10[%c0_26, %c0_27] : memref<16x896xf32, #tpu.memory_space<vmem>>, vector<16x896xf32>
    tpu.vector_store %arg10[%c0_26, %c0_27], %40 {strides = array<i32>} : memref<16x896xf32, #tpu.memory_space<vmem>>, vector<16x896xf32>,
    return
  }
  func.func @transform_0(%arg0: i32) -> (i32, i32) {
    %c0_i32 = arith.constant 0 : i32
    %c0_i32_0 = arith.constant 0 : i32
    return %arg0, %c0_i32 : i32, i32
  }
  func.func @transform_1(%arg0: i32) -> (i32, i32) {
    %c0_i32 = arith.constant 0 : i32
    %c0_i32_0 = arith.constant 0 : i32
    %c0_i32_1 = arith.constant 0 : i32
    return %c0_i32, %c0_i32_0 : i32, i32
  }
  func.func @transform_2(%arg0: i32) -> (i32, i32) {
    %c0_i32 = arith.constant 0 : i32
    %c0_i32_0 = arith.constant 0 : i32
    %c0_i32_1 = arith.constant 0 : i32
    return %c0_i32, %c0_i32_0 : i32, i32
  }
  func.func @transform_3(%arg0: i32) -> (i32, i32) {
    %c0_i32 = arith.constant 0 : i32
    %c0_i32_0 = arith.constant 0 : i32
    %c0_i32_1 = arith.constant 0 : i32
    return %c0_i32, %c0_i32_0 : i32, i32
  }
  func.func @transform_4(%arg0: i32) -> (i32, i32) {
    %c0_i32 = arith.constant 0 : i32
    %c0_i32_0 = arith.constant 0 : i32
    %c0_i32_1 = arith.constant 0 : i32
    return %c0_i32, %c0_i32_0 : i32, i32
  }
  func.func @transform_5(%arg0: i32) -> (i32, i32) {
    %c0_i32 = arith.constant 0 : i32
    %c0_i32_0 = arith.constant 0 : i32
    %c0_i32_1 = arith.constant 0 : i32
    return %c0_i32, %c0_i32_0 : i32, i32
  }
  func.func @transform_6(%arg0: i32) -> (i32, i32) {
    %c0_i32 = arith.constant 0 : i32
    %c0_i32_0 = arith.constant 0 : i32
    %c0_i32_1 = arith.constant 0 : i32
    return %c0_i32, %c0_i32_0 : i32, i32
  }
  func.func @transform_7(%arg0: i32) -> (i32, i32) {
    %c0_i32 = arith.constant 0 : i32
    %c0_i32_0 = arith.constant 0 : i32
    %c0_i32_1 = arith.constant 0 : i32
    return %c0_i32, %c0_i32_0 : i32, i32
  }
  func.func @transform_8(%arg0: i32) -> (i32, i32) {
    %c0_i32 = arith.constant 0 : i32
    %c0_i32_0 = arith.constant 0 : i32
    %c0_i32_1 = arith.constant 0 : i32
    return %c0_i32, %c0_i32_0 : i32, i32
  }
  func.func @transform_9(%arg0: i32) -> (i32, i32) {
    %c0_i32 = arith.constant 0 : i32
    %c0_i32_0 = arith.constant 0 : i32
    return %arg0, %c0_i32 : i32, i32
  }
}

</mosaic_0001>

<bundles_post_ra>
// kernel: generator_forward.1
= control target key start
LH: loop header
LB: loop body
LE: loop exit
PB: predicated region body
PF: predicated region fallthrough
CT: control target
= control target key end

     0   :  { %s15484_s0 = inlined_call_operand.vmem [shape: f32[16,128], index: 0, kind: input, shape index: {}]   ;;  %s15485_s1 = inlined_call_operand.vmem [shape: bf16[128,256], index: 1, kind: input, shape index: {}]   ;;  %s15486_s2 = inlined_call_operand.vmem [shape: f32[1,256], index: 2, kind: input, shape index: {}]   ;;  %s15487_s3 = inlined_call_operand.vmem [shape: bf16[256,512], index: 3, kind: input, shape index: {}]   ;;  %s15488_s4 = inlined_call_operand.vmem [shape: f32[1,512], index: 4, kind: input, shape index: {}]   ;;  %s15489_s5 = inlined_call_operand.vmem [shape: bf16[512,1024], index: 5, kind: input, shape index: {}]   ;;  %s15490_s6 = inlined_call_operand.vmem [shape: f32[1,1024], index: 6, kind: input, shape index: {}]   ;;  %s15491_s7 = inlined_call_operand.vmem [shape: bf16[1024,896], index: 7, kind: input, shape index: {}]   ;;  %s15492_s8 = inlined_call_operand.vmem [shape: f32[1,896], index: 8, kind: input, shape index: {}]   ;;  %s15493_s9 = inlined_call_operand.hbm [shape: f32[16,896], index: 9, kind: output, shape index: {}]  }
   0x1   :  { %v6492_v0 = vld [vmem:[%s15485_s1 + $0x70] sm:$0xf]  ;;  %v9585_v1 = vld [vmem:[%s15485_s1 + $0x74] sm:$0xf0]  ;;  %v9584_v2 = vld [vmem:[%s15485_s1 + $0x74] sm:$0xf] }
   0x2   :  { %v6493_v3 = vor.u32 %v9585_v1, %v6492_v0  ;;  %v6494_v4 = vld [vmem:[%s15485_s1 + $0x78] sm:$0xf0]  ;;  %v6484_v5 = vld [vmem:[%s15485_s1 + $0x60] sm:$0xf]  ;;  %v9583_v6 = vld [vmem:[%s15485_s1 + $0x64] sm:$0xf0] }
   0x3   :  { %v6497_v7 = vor.u32 %v9584_v2, %v6494_v4  ;;  %v9582_v8 = vld [vmem:[%s15485_s1 + $0x64] sm:$0xf]  ;;  %v6486_v9 = vld [vmem:[%s15485_s1 + $0x68] sm:$0xf0]  ;;  %v6485_v10 = vor.u32 %v9583_v6, %v6484_v5  ;;  %v6476_v12 = vld [vmem:[%s15485_s1 + $0x50] sm:$0xf] }
   0x4   :  { %138 = vmatpush.bf16.msra.mxu0 %v6493_v3  ;;  %v6489_v11 = vor.u32 %v9582_v8, %v6486_v9  ;;  %v9581_v13 = vld [vmem:[%s15485_s1 + $0x54] sm:$0xf0]  ;;  %v9580_v14 = vld [vmem:[%s15485_s1 + $0x54] sm:$0xf]  ;;  %v6478_v15 = vld [vmem:[%s15485_s1 + $0x58] sm:$0xf0] }
   0x5   :  { %152 = vmatpush.bf16.msra.mxu1 %v6497_v7  ;;  %v6477_v16 = vor.u32 %v9581_v13, %v6476_v12  ;;  %v6481_v17 = vor.u32 %v9580_v14, %v6478_v15  ;;  %v6468_v18 = vld [vmem:[%s15485_s1 + $0x40] sm:$0xf]  ;;  %v9579_v19 = vld [vmem:[%s15485_s1 + $0x44] sm:$0xf0]  ;;  %v9578_v20 = vld [vmem:[%s15485_s1 + $0x44] sm:$0xf] }
   0x6   :  { %v6470_v21 = vld [vmem:[%s15485_s1 + $0x48] sm:$0xf0]  ;;  %v6469_v22 = vor.u32 %v9579_v19, %v6468_v18  ;;  %v6460_v23 = vld [vmem:[%s15485_s1 + $0x30] sm:$0xf]  ;;  %v6612_v24 = vld [vmem:[%s15487_s3 + $0xe0] sm:$0xf] }
   0x7   :  { %v9616_v25 = vld [vmem:[%s15487_s3 + $0xec] sm:$0xf0]  ;;  %v6473_v26 = vor.u32 %v9578_v20, %v6470_v21  ;;  %v9577_v27 = vld [vmem:[%s15485_s1 + $0x34] sm:$0xf0]  ;;  %v6740_v29 = vld [vmem:[%s15487_s3 + $0x1e0] sm:$0xf] }
   0x8   :  { %139 = vmatpush.bf16.msra.mxu0 %v6485_v10  ;;  %v6613_v28 = vor.u32 %v9616_v25, %v6612_v24  ;;  %v9648_v30 = vld [vmem:[%s15487_s3 + $0x1ec] sm:$0xf0]  ;;  %v9576_v31 = vld [vmem:[%s15485_s1 + $0x34] sm:$0xf]  ;;  %v6462_v32 = vld [vmem:[%s15485_s1 + $0x38] sm:$0xf0]  ;;  %v6461_v37 = vor.u32 %v9577_v27, %v6460_v23 }
   0x9   :  { %153 = vmatpush.bf16.msra.mxu1 %v6489_v11  ;;  %v6741_v33 = vor.u32 %v9648_v30, %v6740_v29  ;;  %v6596_v34 = vld [vmem:[%s15487_s3 + $0xc0] sm:$0xf]  ;;  %v9612_v35 = vld [vmem:[%s15487_s3 + $0xcc] sm:$0xf0]  ;;  %v9575_v39 = vld [vmem:[%s15485_s1 + $0x24] sm:$0xf0]  ;;  %v6465_v42 = vor.u32 %v9576_v31, %v6462_v32 }
   0xa   :  { %574 = vmatpush.bf16.msra.mxu2 %v6613_v28  ;;  %v6724_v36 = vld [vmem:[%s15487_s3 + $0x1c0] sm:$0xf]  ;;  %v6597_v40 = vor.u32 %v9612_v35, %v6596_v34  ;;  %v9644_v41 = vld [vmem:[%s15487_s3 + $0x1cc] sm:$0xf0]  ;;  %v9574_v43 = vld [vmem:[%s15485_s1 + $0x24] sm:$0xf] }
   0xb   :  { %v6452_v38 = vld [vmem:[%s15485_s1 + $0x20] sm:$0xf]  ;;  %588 = vmatpush.bf16.msra.mxu3 %v6741_v33  ;;  %v6454_v44 = vld [vmem:[%s15485_s1 + $0x28] sm:$0xf0]  ;;  %v6725_v45 = vor.u32 %v9644_v41, %v6724_v36  ;;  %v9608_v47 = vld [vmem:[%s15487_s3 + $0xac] sm:$0xf0] }
   0xc   :  { %140 = vmatpush.bf16.msra.mxu0 %v6477_v16  ;;  %v6580_v46 = vld [vmem:[%s15487_s3 + $0xa0] sm:$0xf]  ;;  %v9640_v49 = vld [vmem:[%s15487_s3 + $0x1ac] sm:$0xf0]  ;;  %v6453_v51 = vor.u32 %v9575_v39, %v6452_v38  ;;  %v6457_v56 = vor.u32 %v9574_v43, %v6454_v44  ;;  %v9573_v57 = vld [vmem:[%s15485_s1 + $0x14] sm:$0xf0] }
   0xd   :  { %154 = vmatpush.bf16.msra.mxu1 %v6481_v17  ;;  %v6708_v48 = vld [vmem:[%s15487_s3 + $0x1a0] sm:$0xf]  ;;  %v6581_v50 = vor.u32 %v9608_v47, %v6580_v46  ;;  %v6444_v52 = vld [vmem:[%s15485_s1 + $0x10] sm:$0xf]  ;;  %v9572_v60 = vld [vmem:[%s15485_s1 + $0x14] sm:$0xf] }
   0xe   :  { %575 = vmatpush.bf16.msra.mxu2 %v6597_v40  ;;  %v6709_v53 = vor.u32 %v9640_v49, %v6708_v48  ;;  %v6564_v54 = vld [vmem:[%s15487_s3 + $0x80] sm:$0xf]  ;;  %v9604_v55 = vld [vmem:[%s15487_s3 + $0x8c] sm:$0xf0]  ;;  %v6446_v61 = vld [vmem:[%s15485_s1 + $0x18] sm:$0xf0]  ;;  %v6445_v0 = vor.u32 %v9573_v57, %v6444_v52 }
   0xf   :  { %589 = vmatpush.bf16.msra.mxu3 %v6725_v45  ;;  %v6692_v58 = vld [vmem:[%s15487_s3 + $0x180] sm:$0xf]  ;;  %v9636_v59 = vld [vmem:[%s15487_s3 + $0x18c] sm:$0xf0]  ;;  %v6565_v63 = vor.u32 %v9604_v55, %v6564_v54  ;;  %v9571_v1 = vld [vmem:[%s15485_s1 + $0x4] sm:$0xf0]  ;;  %v6449_v5 = vor.u32 %v9572_v60, %v6446_v61 }
  0x10   :  { %141 = vmatpush.bf16.msra.mxu0 %v6469_v22  ;;  %v6436_v62 = vld [vmem:[%s15485_s1] sm:$0xf]  ;;  %v6693_v2 = vor.u32 %v9636_v59, %v6692_v58  ;;  %v9600_v4 = vld [vmem:[%s15487_s3 + $0x6c] sm:$0xf0]  ;;  %v9570_v6 = vld [vmem:[%s15485_s1 + $0x4] sm:$0xf] }
  0x11   :  { %155 = vmatpush.bf16.msra.mxu1 %v6473_v26  ;;  %v6548_v3 = vld [vmem:[%s15487_s3 + $0x60] sm:$0xf]  ;;  %v9632_v8 = vld [vmem:[%s15487_s3 + $0x16c] sm:$0xf0]  ;;  %v6438_v9 = vld [vmem:[%s15485_s1 + $0x8] sm:$0xf0]  ;;  %v6437_v16 = vor.u32 %v9571_v1, %v6436_v62 }
  0x12   :  { %576 = vmatpush.bf16.msra.mxu2 %v6581_v50  ;;  %v6676_v7 = vld [vmem:[%s15487_s3 + $0x160] sm:$0xf]  ;;  %v9614_v10 = vld [vmem:[%s15487_s3 + $0xe4] sm:$0xf]  ;;  %v6614_v11 = vld [vmem:[%s15487_s3 + $0xf0] sm:$0xf0]  ;;  %v6549_v15 = vor.u32 %v9600_v4, %v6548_v3  ;;  %v6441_v21 = vor.u32 %v9570_v6, %v6438_v9 }
  0x13   :  { %590 = vmatpush.bf16.msra.mxu3 %v6709_v53  ;;  %v33_v12 = vld [vmem:[%s15484_s0] sm:$0xff]  ;;  %v6742_v14 = vld [vmem:[%s15487_s3 + $0x1f0] sm:$0xf0]  ;;  %v34_v17 = vld [vmem:[%s15484_s0 + $0x8] sm:$0xff]  ;;  %v6677_v18 = vor.u32 %v9632_v8, %v6676_v7  ;;  %v6617_v22 = vor.u32 %v9614_v10, %v6614_v11 }
  0x14   :  { %142 = vmatpush.bf16.msra.mxu0 %v6461_v37  ;;  %v9646_v13 = vld [vmem:[%s15487_s3 + $0x1e4] sm:$0xf]  ;;  %v6532_v19 = vld [vmem:[%s15487_s3 + $0x40] sm:$0xf]  ;;  %v9596_v20 = vld [vmem:[%s15487_s3 + $0x4c] sm:$0xf0]  ;;  %v35_v28 = vpack.c.bf16 %v34_v17, %v33_v12 }
  0x15   :  { %156 = vmatpush.bf16.msra.mxu1 %v6465_v42  ;;  %v6660_v23 = vld [vmem:[%s15487_s3 + $0x140] sm:$0xf]  ;;  %v9628_v24 = vld [vmem:[%s15487_s3 + $0x14c] sm:$0xf0]  ;;  %v6745_v25 = vor.u32 %v9646_v13, %v6742_v14  ;;  %v9610_v26 = vld [vmem:[%s15487_s3 + $0xc4] sm:$0xf]  ;;  %v6533_v31 = vor.u32 %v9596_v20, %v6532_v19 }
  0x16   :  { %577 = vmatpush.bf16.msra.mxu2 %v6565_v63  ;;  %v6598_v27 = vld [vmem:[%s15487_s3 + $0xd0] sm:$0xf0]  ;;  %v9642_v29 = vld [vmem:[%s15487_s3 + $0x1c4] sm:$0xf] }
  0x17   :  { %591 = vmatpush.bf16.msra.mxu3 %v6693_v2  ;;  %v6726_v30 = vld [vmem:[%s15487_s3 + $0x1d0] sm:$0xf0] }
  0x18   :  { %143 = vmatpush.bf16.msra.mxu0 %v6453_v51 }
  0x19   :  { %157 = vmatpush.bf16.msra.mxu1 %v6457_v56 }
  0x1a   :  { %578 = vmatpush.bf16.msra.mxu2 %v6549_v15 }
  0x1c   :  { %144 = vmatpush.bf16.msra.mxu0 %v6445_v0 }
  0x1d   :  { %158 = vmatpush.bf16.msra.mxu1 %v6449_v5 }
  0x1e   :  { %14 = vsyncpa [#allocation3], 0  ;;  %592 = vmatpush.bf16.msra.mxu3 %v6677_v18  ;;  %v6661_v32 = vor.u32 %v9628_v24, %v6660_v23  ;;  %v6516_v33 = vld [vmem:[%s15487_s3 + $0x20] sm:$0xf]  ;;  %v9592_v34 = vld [vmem:[%s15487_s3 + $0x2c] sm:$0xf0]  ;;  %v6601_v35 = vor.u32 %v9610_v26, %v6598_v27  ;;  %v6729_v38 = vor.u32 %v9642_v29, %v6726_v30  ;;  %579 = vmatpush.bf16.msra.mxu2 %v6533_v31 }
  0x1f   :  { %v6644_v36 = vld [vmem:[%s15487_s3 + $0x120] sm:$0xf]  ;;  %v9624_v37 = vld [vmem:[%s15487_s3 + $0x12c] sm:$0xf0]  ;;  %v9606_v39 = vld [vmem:[%s15487_s3 + $0xa4] sm:$0xf]  ;;  %v6517_v43 = vor.u32 %v9592_v34, %v6516_v33 }
  0x20   :  { %145 = vmatpush.bf16.msra.mxu0 %v6437_v16  ;;  %v6582_v40 = vld [vmem:[%s15487_s3 + $0xb0] sm:$0xf0]  ;;  %v9638_v41 = vld [vmem:[%s15487_s3 + $0x1a4] sm:$0xf]  ;;  %v6645_v44 = vor.u32 %v9624_v37, %v6644_v36  ;;  %v6500_v7 = vld [vmem:[%s15487_s3] sm:$0xf] }
  0x21   :  { %159 = vmatpush.bf16.msra.mxu1 %v6441_v21  ;;  %v6710_v42 = vld [vmem:[%s15487_s3 + $0x1b0] sm:$0xf0]  ;;  %v6585_v45 = vor.u32 %v9606_v39, %v6582_v40  ;;  %v9602_v47 = vld [vmem:[%s15487_s3 + $0x84] sm:$0xf]  ;;  %v9588_v8 = vld [vmem:[%s15487_s3 + $0xc] sm:$0xf0] }
  0x22   :  { %593 = vmatpush.bf16.msra.mxu3 %v6661_v32  ;;  %v6713_v46 = vor.u32 %v9638_v41, %v6710_v42  ;;  %v6566_v48 = vld [vmem:[%s15487_s3 + $0x90] sm:$0xf0]  ;;  %v9634_v49 = vld [vmem:[%s15487_s3 + $0x184] sm:$0xf]  ;;  %580 = vmatpush.bf16.msra.mxu2 %v6517_v43  ;;  %v6628_v9 = vld [vmem:[%s15487_s3 + $0x100] sm:$0xf]  ;;  %v6501_v10 = vor.u32 %v9588_v8, %v6500_v7 }
  0x23   :  { %146 = vmatmul.bf16.vlgmr.msra.gmra.mxu0 %v35_v28  ;;  %v6694_v50 = vld [vmem:[%s15487_s3 + $0x190] sm:$0xf0]  ;;  %v6569_v51 = vor.u32 %v9602_v47, %v6566_v48  ;;  %v9598_v53 = vld [vmem:[%s15487_s3 + $0x64] sm:$0xf]  ;;  %v9620_v11 = vld [vmem:[%s15487_s3 + $0x10c] sm:$0xf0] }
  0x24   :  { %602 = vmatpush.bf16.msrb.mxu0 %v6617_v22  ;;  %160 = vmatmul.bf16.vlgmr.msra.gmra.mxu1 %v35_v28  ;;  %v6697_v52 = vor.u32 %v9634_v49, %v6694_v50  ;;  %v6550_v54 = vld [vmem:[%s15487_s3 + $0x70] sm:$0xf0]  ;;  %v9630_v55 = vld [vmem:[%s15487_s3 + $0x164] sm:$0xf]  ;;  %v6629_v14 = vor.u32 %v9620_v11, %v6628_v9  ;;  %v6620_v19 = vld [vmem:[%s15487_s3 + $0xe8] sm:$0xf] }
  0x25   :  { %616 = vmatpush.bf16.msrb.mxu1 %v6745_v25  ;;  %v6678_v56 = vld [vmem:[%s15487_s3 + $0x170] sm:$0xf0]  ;;  %v6553_v57 = vor.u32 %v9598_v53, %v6550_v54  ;;  %v9594_v59 = vld [vmem:[%s15487_s3 + $0x44] sm:$0xf]  ;;  %v9617_v20 = vld [vmem:[%s15487_s3 + $0xf4] sm:$0xf0] }
  0x26   :  { %594 = vmatpush.bf16.msra.mxu3 %v6645_v44  ;;  %v6681_v58 = vor.u32 %v9630_v55, %v6678_v56  ;;  %v6534_v60 = vld [vmem:[%s15487_s3 + $0x50] sm:$0xf0]  ;;  %v9626_v61 = vld [vmem:[%s15487_s3 + $0x144] sm:$0xf]  ;;  %581 = vmatpush.bf16.msra.mxu2 %v6501_v10  ;;  %v6748_v21 = vld [vmem:[%s15487_s3 + $0x1e8] sm:$0xf]  ;;  %v6621_v22 = vor.u32 %v9617_v20, %v6620_v19 }
  0x27   :  { %v6662_v62 = vld [vmem:[%s15487_s3 + $0x150] sm:$0xf0]  ;;  %v6537_v63 = vor.u32 %v9594_v59, %v6534_v60  ;;  %v9590_v1 = vld [vmem:[%s15487_s3 + $0x24] sm:$0xf]  ;;  %v9649_v23 = vld [vmem:[%s15487_s3 + $0x1f4] sm:$0xf0] }
  0x28   :  { %603 = vmatpush.bf16.msrb.mxu0 %v6601_v35  ;;  %v6665_v0 = vor.u32 %v9626_v61, %v6662_v62  ;;  %v6518_v2 = vld [vmem:[%s15487_s3 + $0x30] sm:$0xf0]  ;;  %v9622_v3 = vld [vmem:[%s15487_s3 + $0x124] sm:$0xf]  ;;  %v9615_v24 = vld [vmem:[%s15487_s3 + $0xec] sm:$0xf]  ;;  %v6749_v26 = vor.u32 %v9649_v23, %v6748_v21 }
  0x29   :  { %617 = vmatpush.bf16.msrb.mxu1 %v6729_v38  ;;  %v6646_v4 = vld [vmem:[%s15487_s3 + $0x130] sm:$0xf0]  ;;  %v6521_v5 = vor.u32 %v9590_v1, %v6518_v2  ;;  %v9586_v12 = vld [vmem:[%s15487_s3 + $0x4] sm:$0xf]  ;;  %v6622_v25 = vld [vmem:[%s15487_s3 + $0xf8] sm:$0xf0] }
  0x2a   :  { %v6649_v6 = vor.u32 %v9622_v3, %v6646_v4  ;;  %v6502_v13 = vld [vmem:[%s15487_s3 + $0x10] sm:$0xf0]  ;;  %v9618_v16 = vld [vmem:[%s15487_s3 + $0x104] sm:$0xf]  ;;  %595 = vmatpush.bf16.msra.mxu3 %v6629_v14  ;;  %v6625_v27 = vor.u32 %v9615_v24, %v6622_v25  ;;  %v9647_v28 = vld [vmem:[%s15487_s3 + $0x1ec] sm:$0xf]  ;;  %630 = vmatpush.bf16.msrb.mxu2 %v6621_v22 }
  0x2b   :  { %v6505_v15 = vor.u32 %v9586_v12, %v6502_v13  ;;  %v6630_v17 = vld [vmem:[%s15487_s3 + $0x110] sm:$0xf0]  ;;  %v6750_v29 = vld [vmem:[%s15487_s3 + $0x1f8] sm:$0xf0]  ;;  %v6604_v30 = vld [vmem:[%s15487_s3 + $0xc8] sm:$0xf] }
  0x2c   :  { %604 = vmatpush.bf16.msrb.mxu0 %v6585_v45  ;;  %v6633_v18 = vor.u32 %v9618_v16, %v6630_v17  ;;  %v6753_v31 = vor.u32 %v9647_v28, %v6750_v29  ;;  %v9613_v32 = vld [vmem:[%s15487_s3 + $0xd4] sm:$0xf0]  ;;  %v6732_v33 = vld [vmem:[%s15487_s3 + $0x1c8] sm:$0xf]  ;;  %v9611_v37 = vld [vmem:[%s15487_s3 + $0xcc] sm:$0xf] }
  0x2d   :  { %618 = vmatpush.bf16.msrb.mxu1 %v6713_v46  ;;  %v9645_v34 = vld [vmem:[%s15487_s3 + $0x1d4] sm:$0xf0]  ;;  %v6605_v35 = vor.u32 %v9613_v32, %v6604_v30  ;;  %v6606_v38 = vld [vmem:[%s15487_s3 + $0xd8] sm:$0xf0]  ;;  %v9643_v39 = vld [vmem:[%s15487_s3 + $0x1cc] sm:$0xf] }
  0x2e   :  { %644 = vmatpush.bf16.msrb.mxu3 %v6749_v26  ;;  %v6733_v36 = vor.u32 %v9645_v34, %v6732_v33  ;;  %v6609_v40 = vor.u32 %v9611_v37, %v6606_v38  ;;  %v6734_v41 = vld [vmem:[%s15487_s3 + $0x1d8] sm:$0xf0]  ;;  %v6588_v43 = vld [vmem:[%s15487_s3 + $0xa8] sm:$0xf]  ;;  %v9609_v44 = vld [vmem:[%s15487_s3 + $0xb4] sm:$0xf0] }
  0x2f   :  { %v6737_v42 = vor.u32 %v9643_v39, %v6734_v41  ;;  %v6716_v45 = vld [vmem:[%s15487_s3 + $0x1a8] sm:$0xf]  ;;  %631 = vmatpush.bf16.msrb.mxu2 %v6605_v35  ;;  %v6589_v46 = vor.u32 %v9609_v44, %v6588_v43  ;;  %v9641_v47 = vld [vmem:[%s15487_s3 + $0x1b4] sm:$0xf0]  ;;  %v9607_v48 = vld [vmem:[%s15487_s3 + $0xac] sm:$0xf] }
  0x30   :  { %605 = vmatpush.bf16.msrb.mxu0 %v6569_v51  ;;  %v6590_v49 = vld [vmem:[%s15487_s3 + $0xb8] sm:$0xf0]  ;;  %v6717_v50 = vor.u32 %v9641_v47, %v6716_v45  ;;  %v6572_v55 = vld [vmem:[%s15487_s3 + $0x88] sm:$0xf]  ;;  %v9605_v56 = vld [vmem:[%s15487_s3 + $0x94] sm:$0xf0] }
  0x31   :  { %619 = vmatpush.bf16.msrb.mxu1 %v6697_v52  ;;  %v6593_v51 = vor.u32 %v9607_v48, %v6590_v49  ;;  %v9639_v52 = vld [vmem:[%s15487_s3 + $0x1ac] sm:$0xf]  ;;  %v6718_v53 = vld [vmem:[%s15487_s3 + $0x1b8] sm:$0xf0]  ;;  %v9637_v59 = vld [vmem:[%s15487_s3 + $0x194] sm:$0xf0] }
  0x32   :  { %645 = vmatpush.bf16.msrb.mxu3 %v6733_v36  ;;  %v6721_v54 = vor.u32 %v9639_v52, %v6718_v53  ;;  %v9603_v60 = vld [vmem:[%s15487_s3 + $0x8c] sm:$0xf]  ;;  %v6574_v61 = vld [vmem:[%s15487_s3 + $0x98] sm:$0xf0]  ;;  %v6556_v3 = vld [vmem:[%s15487_s3 + $0x68] sm:$0xf] }
  0x33   :  { %632 = vmatpush.bf16.msrb.mxu2 %v6589_v46  ;;  %v6702_v1 = vld [vmem:[%s15487_s3 + $0x198] sm:$0xf0]  ;;  %v9601_v4 = vld [vmem:[%s15487_s3 + $0x74] sm:$0xf0]  ;;  %v9599_v8 = vld [vmem:[%s15487_s3 + $0x6c] sm:$0xf] }
  0x34   :  { %606 = vmatpush.bf16.msrb.mxu0 %v6553_v57  ;;  %v6700_v57 = vld [vmem:[%s15487_s3 + $0x188] sm:$0xf]  ;;  %v9633_v7 = vld [vmem:[%s15487_s3 + $0x174] sm:$0xf0]  ;;  %v6558_v9 = vld [vmem:[%s15487_s3 + $0x78] sm:$0xf0] }
  0x35   :  { %620 = vmatpush.bf16.msrb.mxu1 %v6681_v58  ;;  %v6573_v58 = vor.u32 %v9605_v56, %v6572_v55  ;;  %v6701_v62 = vor.u32 %v9637_v59, %v6700_v57  ;;  %v6561_v11 = vor.u32 %v9599_v8, %v6558_v9  ;;  %v9631_v12 = vld [vmem:[%s15487_s3 + $0x16c] sm:$0xf]  ;;  %v6686_v13 = vld [vmem:[%s15487_s3 + $0x178] sm:$0xf0]  ;;  %v6540_v14 = vld [vmem:[%s15487_s3 + $0x48] sm:$0xf] }
  0x36   :  { %646 = vmatpush.bf16.msrb.mxu3 %v6717_v50  ;;  %v9597_v16 = vld [vmem:[%s15487_s3 + $0x54] sm:$0xf0]  ;;  %v6668_v17 = vld [vmem:[%s15487_s3 + $0x148] sm:$0xf]  ;;  %v9595_v19 = vld [vmem:[%s15487_s3 + $0x4c] sm:$0xf] }
  0x37   :  { %633 = vmatpush.bf16.msrb.mxu2 %v6573_v58  ;;  %v6542_v20 = vld [vmem:[%s15487_s3 + $0x58] sm:$0xf0]  ;;  %v9627_v21 = vld [vmem:[%s15487_s3 + $0x14c] sm:$0xf]  ;;  %v6541_v22 = vor.u32 %v9597_v16, %v6540_v14  ;;  %v6524_v26 = vld [vmem:[%s15487_s3 + $0x28] sm:$0xf] }
  0x38   :  { %607 = vmatpush.bf16.msrb.mxu0 %v6537_v63  ;;  %v6577_v63 = vor.u32 %v9603_v60, %v6574_v61  ;;  %v6670_v23 = vld [vmem:[%s15487_s3 + $0x158] sm:$0xf0]  ;;  %v6545_v25 = vor.u32 %v9595_v19, %v6542_v20  ;;  %v6652_v28 = vld [vmem:[%s15487_s3 + $0x128] sm:$0xf]  ;;  %v9625_v30 = vld [vmem:[%s15487_s3 + $0x134] sm:$0xf0] }
  0x39   :  { %621 = vmatpush.bf16.msrb.mxu1 %v6665_v0  ;;  %v9635_v0 = vld [vmem:[%s15487_s3 + $0x18c] sm:$0xf]  ;;  %v6673_v29 = vor.u32 %v9627_v21, %v6670_v23  ;;  %v6526_v32 = vld [vmem:[%s15487_s3 + $0x38] sm:$0xf0]  ;;  %v6653_v36 = vor.u32 %v9625_v30, %v6652_v28  ;;  %v6508_v38 = vld [vmem:[%s15487_s3 + $0x8] sm:$0xf] }
  0x3a   :  { %v6705_v2 = vor.u32 %v9635_v0, %v6702_v1  ;;  %647 = vmatpush.bf16.msrb.mxu3 %v6701_v62  ;;  %v9623_v33 = vld [vmem:[%s15487_s3 + $0x12c] sm:$0xf]  ;;  %v6654_v34 = vld [vmem:[%s15487_s3 + $0x138] sm:$0xf0]  ;;  %v9589_v39 = vld [vmem:[%s15487_s3 + $0x14] sm:$0xf0] }
  0x3b   :  { %v6657_v41 = vor.u32 %v9623_v33, %v6654_v34  ;;  %v9587_v43 = vld [vmem:[%s15487_s3 + $0xc] sm:$0xf]  ;;  %v6510_v44 = vld [vmem:[%s15487_s3 + $0x18] sm:$0xf0]  ;;  %v6509_v47 = vor.u32 %v9589_v39, %v6508_v38  ;;  %v52_v50 = vld [vmem:[%s15486_s2] sm:$0x3] }
  0x3c   :  { %608 = vmatpush.bf16.msrb.mxu0 %v6521_v5  ;;  %v6684_v5 = vld [vmem:[%s15487_s3 + $0x168] sm:$0xf]  ;;  %v9619_v45 = vld [vmem:[%s15487_s3 + $0x10c] sm:$0xf]  ;;  %v6638_v46 = vld [vmem:[%s15487_s3 + $0x118] sm:$0xf0]  ;;  %v6513_v49 = vor.u32 %v9587_v43, %v6510_v44 }
  0x3d   :  { %622 = vmatpush.bf16.msrb.mxu1 %v6649_v6  ;;  %v6557_v6 = vor.u32 %v9601_v4, %v6556_v3  ;;  %v6685_v10 = vor.u32 %v9633_v7, %v6684_v5  ;;  %v54_v53 = vperm.slane %v52_v50, 0  ;;  %v55_v55 = vperm.slane %v52_v50, 1  ;;  %v7236_v59 = vld [vmem:[%s15489_s5 + $0x3c0] sm:$0xf]  ;;  %s6422_s15 = sshll.u32 %s15493_s9, 4  ;;  %s10414_s16 = smov 896   ;;  %s6423_s15 = int_to_ptr.hbm [resolvable:$true] %s6422_s15 }
  0x3e   :  { %v9774_v60 = vld [vmem:[%s15489_s5 + $0x3dc] sm:$0xf0]  ;;  %s10415_s17 = smov 56  }
  0x3f   :  { %634 = vmatpush.bf16.msrb.mxu2 %v6557_v6  ;;  %648 = vmatpush.bf16.msrb.mxu3 %v6685_v10  ;;  %v6980_v0 = vld [vmem:[%s15489_s5 + $0x1c0] sm:$0xf] }
  0x40   :  { %609 = vmatpush.bf16.msrb.mxu0 %v6505_v15  ;;  %v6689_v15 = vor.u32 %v9631_v12, %v6686_v13  ;;  %v9710_v1 = vld [vmem:[%s15489_s5 + $0x1dc] sm:$0xf0]  ;;  %v7237_v12 = vor.u32 %v9774_v60, %v7236_v59 }
  0x41   :  { %623 = vmatpush.bf16.msrb.mxu1 %v6633_v18  ;;  %v9629_v18 = vld [vmem:[%s15487_s3 + $0x154] sm:$0xf0]  ;;  %v7748_v4 = vld [vmem:[%s15489_s5 + $0x7c0] sm:$0xf] }
  0x42   :  { %v6669_v24 = vor.u32 %v9629_v18, %v6668_v17  ;;  %v9902_v5 = vld [vmem:[%s15489_s5 + $0x7dc] sm:$0xf0]  ;;  %v6981_v18 = vor.u32 %v9710_v1, %v6980_v0 }
  0x43   :  { %635 = vmatpush.bf16.msrb.mxu2 %v6541_v22  ;;  %v7492_v7 = vld [vmem:[%s15489_s5 + $0x5c0] sm:$0xf]  ;;  %v7749_v22 = vor.u32 %v9902_v5, %v7748_v4 }
  0x44   :  { %658 = vmatpush.bf16.msra.mxu0 %v6625_v27  ;;  %v9593_v27 = vld [vmem:[%s15487_s3 + $0x34] sm:$0xf0]  ;;  %649 = vmatpush.bf16.msrb.mxu3 %v6669_v24  ;;  %v9838_v9 = vld [vmem:[%s15489_s5 + $0x5dc] sm:$0xf0] }
  0x45   :  { %672 = vmatpush.bf16.msra.mxu1 %v6753_v31  ;;  %v9591_v31 = vld [vmem:[%s15487_s3 + $0x2c] sm:$0xf]  ;;  %v6525_v35 = vor.u32 %v9593_v27, %v6524_v26  ;;  %v7204_v16 = vld [vmem:[%s15489_s5 + $0x380] sm:$0xf]  ;;  %v7493_v24 = vor.u32 %v9838_v9, %v7492_v7 }
  0x46   :  { %v6529_v37 = vor.u32 %v9591_v31, %v6526_v32  ;;  %v9766_v17 = vld [vmem:[%s15489_s5 + $0x39c] sm:$0xf0] }
  0x47   :  { %636 = vmatpush.bf16.msrb.mxu2 %v6525_v35  ;;  %v6948_v20 = vld [vmem:[%s15489_s5 + $0x180] sm:$0xf]  ;;  %v7205_v28 = vor.u32 %v9766_v17, %v7204_v16 }
  0x48   :  { %659 = vmatpush.bf16.msra.mxu0 %v6609_v40  ;;  %v6636_v40 = vld [vmem:[%s15487_s3 + $0x108] sm:$0xf]  ;;  %650 = vmatpush.bf16.msrb.mxu3 %v6653_v36  ;;  %v9702_v21 = vld [vmem:[%s15489_s5 + $0x19c] sm:$0xf0] }
  0x49   :  { %673 = vmatpush.bf16.msra.mxu1 %v6737_v42  ;;  %v9621_v42 = vld [vmem:[%s15487_s3 + $0x114] sm:$0xf0]  ;;  %v7716_v23 = vld [vmem:[%s15489_s5 + $0x780] sm:$0xf]  ;;  %v6949_v31 = vor.u32 %v9702_v21, %v6948_v20  ;;  %v9770_v21 = vld [vmem:[%s15489_s5 + $0x3c4] sm:$0xf] }
  0x4a   :  { %v6637_v48 = vor.u32 %v9621_v42, %v6636_v40  ;;  %v7460_v26 = vld [vmem:[%s15489_s5 + $0x580] sm:$0xf] }
  0x4b   :  { %637 = vmatpush.bf16.msrb.mxu2 %v6509_v47  ;;  %v9830_v27 = vld [vmem:[%s15489_s5 + $0x59c] sm:$0xf0] }
  0x4c   :  { %660 = vmatpush.bf16.msra.mxu0 %v6593_v51  ;;  %v6641_v51 = vor.u32 %v9619_v45, %v6638_v46  ;;  %651 = vmatpush.bf16.msrb.mxu3 %v6637_v48  ;;  %v9758_v30 = vld [vmem:[%s15489_s5 + $0x35c] sm:$0xf0]  ;;  %v7461_v36 = vor.u32 %v9830_v27, %v7460_v26  ;;  %v6982_v26 = vld [vmem:[%s15489_s5 + $0x1e0] sm:$0xf0] }
  0x4d   :  { %674 = vmatpush.bf16.msra.mxu1 %v6721_v54  ;;  %v6916_v32 = vld [vmem:[%s15489_s5 + $0x140] sm:$0xf] }
  0x4e   :  { %v9694_v33 = vld [vmem:[%s15489_s5 + $0x15c] sm:$0xf0] }
  0x4f   :  { %v7684_v35 = vld [vmem:[%s15489_s5 + $0x740] sm:$0xf]  ;;  %v6917_v43 = vor.u32 %v9694_v33, %v6916_v32  ;;  %v7206_v32 = vld [vmem:[%s15489_s5 + $0x3a0] sm:$0xf0] }
  0x50   :  { %661 = vmatpush.bf16.msra.mxu0 %v6577_v63  ;;  %v7428_v38 = vld [vmem:[%s15489_s5 + $0x540] sm:$0xf]  ;;  %v9698_v33 = vld [vmem:[%s15489_s5 + $0x184] sm:$0xf] }
  0x51   :  { %675 = vmatpush.bf16.msra.mxu1 %v6705_v2  ;;  %v9822_v39 = vld [vmem:[%s15489_s5 + $0x55c] sm:$0xf0] }
  0x52   :  { %v9750_v42 = vld [vmem:[%s15489_s5 + $0x31c] sm:$0xf0]  ;;  %v7429_v48 = vor.u32 %v9822_v39, %v7428_v38  ;;  %v7174_v38 = vld [vmem:[%s15489_s5 + $0x360] sm:$0xf0] }
  0x53   :  { %v6884_v44 = vld [vmem:[%s15489_s5 + $0x100] sm:$0xf] }
  0x54   :  { %662 = vmatpush.bf16.msra.mxu0 %v6561_v11  ;;  %v9686_v45 = vld [vmem:[%s15489_s5 + $0x11c] sm:$0xf0] }
  0x55   :  { %676 = vmatpush.bf16.msra.mxu1 %v6689_v15  ;;  %v7652_v47 = vld [vmem:[%s15489_s5 + $0x700] sm:$0xf] }
  0x56   :  { %v7396_v50 = vld [vmem:[%s15489_s5 + $0x500] sm:$0xf] }
  0x57   :  { %v7620_v59 = vld [vmem:[%s15489_s5 + $0x6c0] sm:$0xf] }
  0x58   :  { %663 = vmatpush.bf16.msra.mxu0 %v6545_v25  ;;  %v9894_v25 = vld [vmem:[%s15489_s5 + $0x79c] sm:$0xf0] }
  0x59   :  { %677 = vmatpush.bf16.msra.mxu1 %v6673_v29  ;;  %v7172_v29 = vld [vmem:[%s15489_s5 + $0x340] sm:$0xf]  ;;  %v7717_v34 = vor.u32 %v9894_v25, %v7716_v23  ;;  %v9706_v25 = vld [vmem:[%s15489_s5 + $0x1c4] sm:$0xf] }
  0x5a   :  { %v7173_v40 = vor.u32 %v9758_v30, %v7172_v29  ;;  %v7076_v1 = vld [vmem:[%s15489_s5 + $0x280] sm:$0xf]  ;;  %v9762_v30 = vld [vmem:[%s15489_s5 + $0x384] sm:$0xf] }
  0x5b   :  { %v6820_v4 = vld [vmem:[%s15489_s5 + $0x80] sm:$0xf] }
  0x5c   :  { %664 = vmatpush.bf16.msra.mxu0 %v6529_v37  ;;  %v9886_v37 = vld [vmem:[%s15489_s5 + $0x75c] sm:$0xf0] }
  0x5d   :  { %678 = vmatpush.bf16.msra.mxu1 %v6657_v41  ;;  %v7140_v41 = vld [vmem:[%s15489_s5 + $0x300] sm:$0xf]  ;;  %v7685_v46 = vor.u32 %v9886_v37, %v7684_v35  ;;  %v7209_v35 = vor.u32 %v9762_v30, %v7206_v32  ;;  %v9754_v37 = vld [vmem:[%s15489_s5 + $0x344] sm:$0xf] }
  0x5e   :  { %v9670_v5 = vld [vmem:[%s15489_s5 + $0x9c] sm:$0xf0]  ;;  %v7177_v39 = vor.u32 %v9754_v37, %v7174_v38  ;;  %v9714_v30 = vld [vmem:[%s15489_s5 + $0x204] sm:$0xf] }
  0x5f   :  { %v9862_v9 = vld [vmem:[%s15489_s5 + $0x69c] sm:$0xf0]  ;;  %v9874_v32 = vld [vmem:[%s15489_s5 + $0x704] sm:$0xf] }
  0x60   :  { %665 = vmatpush.bf16.msra.mxu0 %v6513_v49  ;;  %v9878_v49 = vld [vmem:[%s15489_s5 + $0x71c] sm:$0xf0]  ;;  %v6790_v37 = vld [vmem:[%s15489_s5 + $0x60] sm:$0xf0] }
  0x61   :  { %679 = vmatpush.bf16.msra.mxu1 %v6641_v51  ;;  %v9814_v51 = vld [vmem:[%s15489_s5 + $0x51c] sm:$0xf0] }
  0x62   :  { %v7397_v60 = vor.u32 %v9814_v51, %v7396_v50  ;;  %v9654_v23 = vld [vmem:[%s15489_s5 + $0x1c] sm:$0xf0]  ;;  %v6918_v50 = vld [vmem:[%s15489_s5 + $0x160] sm:$0xf0] }
  0xa0   :  { %v147_v52 = vpop.f32.mrf.mxu0 }
  0xa1   :  { %v161_v54 = vpop.f32.mrf.mxu1  ;;  %v148_v56 = vadd.f32 %v147_v52, %v54_v53  ;;  %v7141_v52 = vor.u32 %v9750_v42, %v7140_v41  ;;  %v9854_v41 = vld [vmem:[%s15489_s5 + $0x65c] sm:$0xf0] }
  0xa2   :  { %v162_v57 = vadd.f32 %v161_v54, %v55_v55  ;;  %v9742_v54 = vld [vmem:[%s15489_s5 + $0x2dc] sm:$0xf0] }
  0xa3   :  { %vm166_vm0 = vcmp.ge.f32.partialorder %v148_v56, 0.0  ;;  %v170_v61 = vmul.f32 0.2, %v148_v56 }
  0xa4   :  { %v171_v2 = vmul.f32 0.2, %v162_v57  ;;  %vm167_vm1 = vcmp.ge.f32.partialorder %v162_v57, 0.0 }
  0xa5   :  { %v174_v10 = vsel %vm166_vm0, %v148_v56, %v170_v61  ;;  %v6852_v56 = vld [vmem:[%s15489_s5 + $0xc0] sm:$0xf] }
  0xa6   :  { %v175_v13 = vsel %vm167_vm1, %v162_v57, %v171_v2  ;;  %v9678_v57 = vld [vmem:[%s15489_s5 + $0xdc] sm:$0xf0] }
  0xa7   :  { %v9870_v61 = vld [vmem:[%s15489_s5 + $0x6dc] sm:$0xf0]  ;;  %v6853_v2 = vor.u32 %v9678_v57, %v6852_v56  ;;  %v7110_v56 = vld [vmem:[%s15489_s5 + $0x2e0] sm:$0xf0] }
  0xa8   :  { %v149_v58 = vpop.f32.mrf.mxu0  ;;  %v9898_v57 = vld [vmem:[%s15489_s5 + $0x7c4] sm:$0xf] }
  0xa9   :  { %v150_v62 = vadd.f32 %v149_v58, %v54_v53  ;;  %v163_v63 = vpop.f32.mrf.mxu1  ;;  %v7108_v53 = vld [vmem:[%s15489_s5 + $0x2c0] sm:$0xf]  ;;  %v7653_v58 = vor.u32 %v9878_v49, %v7652_v47  ;;  %v9690_v49 = vld [vmem:[%s15489_s5 + $0x144] sm:$0xf] }
  0xaa   :  { %v164_v3 = vadd.f32 %v163_v63, %v55_v55  ;;  %v6885_v55 = vor.u32 %v9686_v45, %v6884_v44  ;;  %v9806_v63 = vld [vmem:[%s15489_s5 + $0x4dc] sm:$0xf0]  ;;  %v7109_v0 = vor.u32 %v9742_v54, %v7108_v53  ;;  %v7142_v44 = vld [vmem:[%s15489_s5 + $0x320] sm:$0xf0]  ;;  %v6921_v51 = vor.u32 %v9690_v49, %v6918_v50 }
  0xab   :  { %vm168_vm2 = vcmp.ge.f32.partialorder %v150_v62, 0.0  ;;  %v172_v6 = vmul.f32 0.2, %v150_v62  ;;  %v9798_v47 = vld [vmem:[%s15489_s5 + $0x49c] sm:$0xf0] }
  0xac   :  { %vm169_vm3 = vcmp.ge.f32.partialorder %v164_v3, 0.0  ;;  %v173_v8 = vmul.f32 0.2, %v164_v3  ;;  %v9846_v53 = vld [vmem:[%s15489_s5 + $0x61c] sm:$0xf0] }
  0xad   :  { %v176_v11 = vsel %vm168_vm2, %v150_v62, %v172_v6  ;;  %v7364_v62 = vld [vmem:[%s15489_s5 + $0x4c0] sm:$0xf]  ;;  %v7621_v6 = vor.u32 %v9870_v61, %v7620_v59  ;;  %v7750_v59 = vld [vmem:[%s15489_s5 + $0x7e0] sm:$0xf0] }
  0xae   :  { %v10980_v14 = vpack.c.bf16 %v176_v11, %v174_v10  ;;  %v177_v15 = vsel %vm169_vm3, %v164_v3, %v173_v8  ;;  %v9734_v3 = vld [vmem:[%s15489_s5 + $0x29c] sm:$0xf0]  ;;  %v7365_v7 = vor.u32 %v9806_v63, %v7364_v62  ;;  %v7753_v62 = vor.u32 %v9898_v57, %v7750_v59  ;;  %v7398_v49 = vld [vmem:[%s15489_s5 + $0x520] sm:$0xf0] }
  0xaf   :  { %v10988_v19 = vpack.c.bf16 %v177_v15, %v175_v13  ;;  %v7588_v8 = vld [vmem:[%s15489_s5 + $0x680] sm:$0xf]  ;;  %v7077_v10 = vor.u32 %v9734_v3, %v7076_v1  ;;  %v6886_v1 = vld [vmem:[%s15489_s5 + $0x120] sm:$0xf0] }
  0xb0   :  { %582 = vmatmul.bf16.vlgmr.msra.gmra.mxu2 %v10980_v14  ;;  %610 = vmatmul.bf16.vlgmr.msrb.gmra.mxu0 %v10980_v14  ;;  %v7044_v11 = vld [vmem:[%s15489_s5 + $0x240] sm:$0xf]  ;;  %v7589_v16 = vor.u32 %v9862_v9, %v7588_v8  ;;  %v9730_v3 = vld [vmem:[%s15489_s5 + $0x284] sm:$0xf] }
  0xb1   :  { %596 = vmatmul.bf16.vlgmr.msra.gmra.mxu3 %v10988_v19  ;;  %624 = vmatmul.bf16.vlgmr.msrb.gmra.mxu1 %v10988_v19  ;;  %v9726_v13 = vld [vmem:[%s15489_s5 + $0x25c] sm:$0xf0]  ;;  %v9850_v57 = vld [vmem:[%s15489_s5 + $0x644] sm:$0xf] }
  0xb2   :  { %2282 = vmatpush.bf16.msra.mxu3 %v7237_v12  ;;  %2268 = vmatpush.bf16.msra.mxu2 %v6981_v18  ;;  %v6821_v12 = vor.u32 %v9670_v5, %v6820_v4  ;;  %v9662_v15 = vld [vmem:[%s15489_s5 + $0x5c] sm:$0xf0]  ;;  %v7045_v17 = vor.u32 %v9726_v13, %v7044_v11  ;;  %v7078_v4 = vld [vmem:[%s15489_s5 + $0x2a0] sm:$0xf0] }
  0xb3   :  { %2310 = vmatpush.bf16.msrb.mxu1 %v7749_v22  ;;  %2296 = vmatpush.bf16.msrb.mxu0 %v7493_v24  ;;  %v7012_v18 = vld [vmem:[%s15489_s5 + $0x200] sm:$0xf]  ;;  %v7238_v24 = vld [vmem:[%s15489_s5 + $0x3e0] sm:$0xf0] }
  0xb4   :  { %v6756_v22 = vld [vmem:[%s15489_s5] sm:$0xf]  ;;  %v7241_v29 = vor.u32 %v9770_v21, %v7238_v24  ;;  %v9890_v5 = vld [vmem:[%s15489_s5 + $0x784] sm:$0xf] }
  0xb5   :  { %v9790_v61 = vld [vmem:[%s15489_s5 + $0x45c] sm:$0xf0]  ;;  %v6854_v13 = vld [vmem:[%s15489_s5 + $0xe0] sm:$0xf0] }
  0xb6   :  { %2283 = vmatpush.bf16.msra.mxu3 %v7205_v28  ;;  %2269 = vmatpush.bf16.msra.mxu2 %v6949_v31  ;;  %v6757_v28 = vor.u32 %v9654_v23, %v6756_v22  ;;  %v6985_v31 = vor.u32 %v9706_v25, %v6982_v26  ;;  %v7268_v8 = vld [vmem:[%s15489_s5 + $0x400] sm:$0xf]  ;;  %v7686_v22 = vld [vmem:[%s15489_s5 + $0x760] sm:$0xf0] }
  0xb7   :  { %2311 = vmatpush.bf16.msrb.mxu1 %v7717_v34  ;;  %2297 = vmatpush.bf16.msrb.mxu0 %v7461_v36  ;;  %v6950_v34 = vld [vmem:[%s15489_s5 + $0x1a0] sm:$0xf0]  ;;  %v9782_v9 = vld [vmem:[%s15489_s5 + $0x41c] sm:$0xf0] }
  0xb8   :  { %v6953_v36 = vor.u32 %v9698_v33, %v6950_v34  ;;  %v7269_v11 = vor.u32 %v9782_v9, %v7268_v8  ;;  %v9666_v24 = vld [vmem:[%s15489_s5 + $0x84] sm:$0xf]  ;;  %v11331_v59 = vld [vmem:[%s15488_s4] sm:$0xf] }
  0xb9   :  { %v6822_v25 = vld [vmem:[%s15489_s5 + $0xa0] sm:$0xf0] }
  0xba   :  { %2284 = vmatpush.bf16.msra.mxu3 %v7173_v40  ;;  %2270 = vmatpush.bf16.msra.mxu2 %v6917_v43  ;;  %v7556_v40 = vld [vmem:[%s15489_s5 + $0x640] sm:$0xf]  ;;  %v9746_v43 = vld [vmem:[%s15489_s5 + $0x304] sm:$0xf] }
  0xbb   :  { %2312 = vmatpush.bf16.msrb.mxu1 %v7685_v46  ;;  %2298 = vmatpush.bf16.msrb.mxu0 %v7429_v48  ;;  %v7557_v42 = vor.u32 %v9854_v41, %v7556_v40  ;;  %v7145_v45 = vor.u32 %v9746_v43, %v7142_v44  ;;  %v7332_v46 = vld [vmem:[%s15489_s5 + $0x480] sm:$0xf]  ;;  %v9826_v26 = vld [vmem:[%s15489_s5 + $0x584] sm:$0xf] }
  0xbc   :  { %v7333_v48 = vor.u32 %v9798_v47, %v7332_v46  ;;  %v7654_v34 = vld [vmem:[%s15489_s5 + $0x720] sm:$0xf0] }
  0xbd   :  { %v7430_v40 = vld [vmem:[%s15489_s5 + $0x560] sm:$0xf0] }
  0xbe   :  { %2285 = vmatpush.bf16.msra.mxu3 %v7141_v52  ;;  %2271 = vmatpush.bf16.msra.mxu2 %v6885_v55  ;;  %v7524_v52 = vld [vmem:[%s15489_s5 + $0x600] sm:$0xf]  ;;  %v9738_v55 = vld [vmem:[%s15489_s5 + $0x2c4] sm:$0xf] }
  0xbf   :  { %2313 = vmatpush.bf16.msrb.mxu1 %v7653_v58  ;;  %2299 = vmatpush.bf16.msrb.mxu0 %v7397_v60  ;;  %v7525_v54 = vor.u32 %v9846_v53, %v7524_v52  ;;  %v7113_v58 = vor.u32 %v9738_v55, %v7110_v56  ;;  %v7300_v60 = vld [vmem:[%s15489_s5 + $0x440] sm:$0xf]  ;;  %v7622_v43 = vld [vmem:[%s15489_s5 + $0x6e0] sm:$0xf0] }
  0xc0   :  { %638 = vmatmul.bf16.vlgmr.msrb.gmra.mxu2 %v10980_v14  ;;  %666 = vmatmul.bf16.vlgmr.msra.gmra.mxu0 %v10980_v14  ;;  %v6788_v14 = vld [vmem:[%s15489_s5 + $0x40] sm:$0xf]  ;;  %v7301_v63 = vor.u32 %v9790_v61, %v7300_v60  ;;  %v6758_v46 = vld [vmem:[%s15489_s5 + $0x20] sm:$0xf0] }
  0xc1   :  { %652 = vmatmul.bf16.vlgmr.msrb.gmra.mxu3 %v10988_v19  ;;  %680 = vmatmul.bf16.vlgmr.msra.gmra.mxu1 %v10988_v19  ;;  %v9718_v19 = vld [vmem:[%s15489_s5 + $0x21c] sm:$0xf0]  ;;  %v6789_v20 = vor.u32 %v9662_v15, %v6788_v14  ;;  %v9834_v14 = vld [vmem:[%s15489_s5 + $0x5c4] sm:$0xf] }
  0xc2   :  { %2286 = vmatpush.bf16.msra.mxu3 %v7109_v0  ;;  %2272 = vmatpush.bf16.msra.mxu2 %v6853_v2  ;;  %v7013_v27 = vor.u32 %v9718_v19, %v7012_v18  ;;  %v9682_v0 = vld [vmem:[%s15489_s5 + $0x104] sm:$0xf] }
  0xc3   :  { %2314 = vmatpush.bf16.msrb.mxu1 %v7621_v6  ;;  %2300 = vmatpush.bf16.msrb.mxu0 %v7365_v7  ;;  %v6889_v2 = vor.u32 %v9682_v0, %v6886_v1  ;;  %v7081_v6 = vor.u32 %v9730_v3, %v7078_v4  ;;  %v7718_v7 = vld [vmem:[%s15489_s5 + $0x7a0] sm:$0xf0]  ;;  %v247_v0 = vperm.slane %v11331_v59, 1 }
  0xc4   :  { %v9722_v18 = vld [vmem:[%s15489_s5 + $0x244] sm:$0xf] }
  0xc5   :  { %v7046_v19 = vld [vmem:[%s15489_s5 + $0x260] sm:$0xf0] }
  0xc6   :  { %2287 = vmatpush.bf16.msra.mxu3 %v7077_v10  ;;  %2273 = vmatpush.bf16.msra.mxu2 %v6821_v12  ;;  %v7721_v10 = vor.u32 %v9890_v5, %v7718_v7  ;;  %v9674_v12 = vld [vmem:[%s15489_s5 + $0xc4] sm:$0xf]  ;;  %v7049_v21 = vor.u32 %v9722_v18, %v7046_v19 }
  0xc7   :  { %2315 = vmatpush.bf16.msrb.mxu1 %v7589_v16  ;;  %2301 = vmatpush.bf16.msrb.mxu0 %v7333_v48  ;;  %v6857_v15 = vor.u32 %v9674_v12, %v6854_v13  ;;  %v7494_v16 = vld [vmem:[%s15489_s5 + $0x5e0] sm:$0xf0] }
  0xc8   :  { %v9810_v47 = vld [vmem:[%s15489_s5 + $0x504] sm:$0xf] }
  0xc9   :  { %v7401_v50 = vor.u32 %v9810_v47, %v7398_v49  ;;  %v7590_v52 = vld [vmem:[%s15489_s5 + $0x6a0] sm:$0xf0]  ;;  %v9759_v47 = vld [vmem:[%s15489_s5 + $0x364] sm:$0xf0] }
  0xca   :  { %2288 = vmatpush.bf16.msra.mxu3 %v7045_v17  ;;  %2274 = vmatpush.bf16.msra.mxu2 %v6789_v20  ;;  %v7497_v17 = vor.u32 %v9834_v14, %v7494_v16  ;;  %v9882_v20 = vld [vmem:[%s15489_s5 + $0x744] sm:$0xf] }
  0xcb   :  { %2316 = vmatpush.bf16.msrb.mxu1 %v7557_v42  ;;  %2302 = vmatpush.bf16.msrb.mxu0 %v7301_v63  ;;  %v7689_v23 = vor.u32 %v9882_v20, %v7686_v22  ;;  %v9866_v42 = vld [vmem:[%s15489_s5 + $0x6c4] sm:$0xf] }
  0xcc   :  { %v7625_v44 = vor.u32 %v9866_v42, %v7622_v43  ;;  %v7366_v55 = vld [vmem:[%s15489_s5 + $0x4e0] sm:$0xf0]  ;;  %v9711_v42 = vld [vmem:[%s15489_s5 + $0x1e4] sm:$0xf0] }
  0xcd   :  { %v9794_v61 = vld [vmem:[%s15489_s5 + $0x484] sm:$0xf] }
  0xce   :  { %2289 = vmatpush.bf16.msra.mxu3 %v7013_v27  ;;  %2275 = vmatpush.bf16.msra.mxu2 %v6757_v28  ;;  %v6825_v27 = vor.u32 %v9666_v24, %v6822_v25  ;;  %v7462_v28 = vld [vmem:[%s15489_s5 + $0x5a0] sm:$0xf0]  ;;  %v9775_v24 = vld [vmem:[%s15489_s5 + $0x3e4] sm:$0xf0] }
  0xcf   :  { %2317 = vmatpush.bf16.msrb.mxu1 %v7525_v54  ;;  %2303 = vmatpush.bf16.msrb.mxu0 %v7269_v11  ;;  %v9802_v54 = vld [vmem:[%s15489_s5 + $0x4c4] sm:$0xf] }
  0xd0   :  { %v7369_v56 = vor.u32 %v9802_v54, %v7366_v55  ;;  %v9842_v1 = vld [vmem:[%s15489_s5 + $0x604] sm:$0xf]  ;;  %v6956_v54 = vld [vmem:[%s15489_s5 + $0x188] sm:$0xf] }
  0xd1   :  { %v7302_v7 = vld [vmem:[%s15489_s5 + $0x460] sm:$0xf0]  ;;  %v9703_v55 = vld [vmem:[%s15489_s5 + $0x1a4] sm:$0xf0] }
  0xd2   :  { %2338 = vmatpush.bf16.msrb.mxu3 %v7241_v29  ;;  %2324 = vmatpush.bf16.msrb.mxu2 %v6985_v31  ;;  %v7465_v29 = vor.u32 %v9826_v26, %v7462_v28  ;;  %v7014_v31 = vld [vmem:[%s15489_s5 + $0x220] sm:$0xf0]  ;;  %v249_v28 = vperm.slane %v11331_v59, 3 }
  0xd3   :  { %2366 = vmatpush.bf16.msra.mxu1 %v7753_v62  ;;  %2352 = vmatpush.bf16.msra.mxu0 %v7497_v17  ;;  %v7017_v33 = vor.u32 %v9714_v30, %v7014_v31  ;;  %v7334_v62 = vld [vmem:[%s15489_s5 + $0x4a0] sm:$0xf0] }
  0xd4   :  { %v7337_v63 = vor.u32 %v9794_v61, %v7334_v62  ;;  %v9778_v12 = vld [vmem:[%s15489_s5 + $0x404] sm:$0xf]  ;;  %v9751_v61 = vld [vmem:[%s15489_s5 + $0x324] sm:$0xf0] }
  0xd5   :  { %v7270_v13 = vld [vmem:[%s15489_s5 + $0x420] sm:$0xf0] }
  0xd6   :  { %2339 = vmatpush.bf16.msrb.mxu3 %v7209_v35  ;;  %2325 = vmatpush.bf16.msrb.mxu2 %v6953_v36  ;;  %v7657_v35 = vor.u32 %v9874_v32, %v7654_v34  ;;  %v9658_v36 = vld [vmem:[%s15489_s5 + $0x44] sm:$0xf]  ;;  %v7273_v16 = vor.u32 %v9778_v12, %v7270_v13 }
  0xd7   :  { %2367 = vmatpush.bf16.msra.mxu1 %v7721_v10  ;;  %2353 = vmatpush.bf16.msra.mxu0 %v7465_v29  ;;  %v6793_v38 = vor.u32 %v9658_v36, %v6790_v37  ;;  %v246_v10 = vperm.slane %v11331_v59, 0  ;;  %v7212_v36 = vld [vmem:[%s15489_s5 + $0x388] sm:$0xf] }
  0xd8   :  { %v9767_v37 = vld [vmem:[%s15489_s5 + $0x3a4] sm:$0xf0] }
  0xda   :  { %2340 = vmatpush.bf16.msrb.mxu3 %v7177_v39  ;;  %2326 = vmatpush.bf16.msrb.mxu2 %v6921_v51  ;;  %v9818_v39 = vld [vmem:[%s15489_s5 + $0x544] sm:$0xf] }
  0xdb   :  { %2368 = vmatpush.bf16.msra.mxu1 %v7689_v23  ;;  %v7433_v41 = vor.u32 %v9818_v39, %v7430_v40  ;;  %v9858_v51 = vld [vmem:[%s15489_s5 + $0x684] sm:$0xf]  ;;  %v7244_v23 = vld [vmem:[%s15489_s5 + $0x3c8] sm:$0xf] }
  0xdc   :  { %v7593_v53 = vor.u32 %v9858_v51, %v7590_v52 }
  0xdd   :  { %2354 = vmatpush.bf16.msra.mxu0 %v7433_v41  ;;  %v6988_v41 = vld [vmem:[%s15489_s5 + $0x1c8] sm:$0xf] }
  0xde   :  { %2341 = vmatpush.bf16.msrb.mxu3 %v7145_v45  ;;  %2327 = vmatpush.bf16.msrb.mxu2 %v6889_v2  ;;  %v9650_v45 = vld [vmem:[%s15489_s5 + $0x4] sm:$0xf]  ;;  %v6989_v51 = vor.u32 %v9711_v42, %v6988_v41  ;;  %v7692_v41 = vld [vmem:[%s15489_s5 + $0x748] sm:$0xf] }
  0xdf   :  { %2369 = vmatpush.bf16.msra.mxu1 %v7657_v35  ;;  %v6761_v48 = vor.u32 %v9650_v45, %v6758_v46  ;;  %v7526_v2 = vld [vmem:[%s15489_s5 + $0x620] sm:$0xf0]  ;;  %v7213_v45 = vor.u32 %v9767_v37, %v7212_v36  ;;  %v7180_v46 = vld [vmem:[%s15489_s5 + $0x348] sm:$0xf] }
  0xe0   :  { %v7529_v4 = vor.u32 %v9842_v1, %v7526_v2  ;;  %v6924_v2 = vld [vmem:[%s15489_s5 + $0x148] sm:$0xf] }
  0xe1   :  { %2355 = vmatpush.bf16.msra.mxu0 %v7401_v50  ;;  %v248_v50 = vperm.slane %v11331_v59, 2  ;;  %v7148_v59 = vld [vmem:[%s15489_s5 + $0x308] sm:$0xf] }
  0xe2   :  { %2342 = vmatpush.bf16.msrb.mxu3 %v7113_v58  ;;  %2328 = vmatpush.bf16.msrb.mxu2 %v6857_v15  ;;  %v7558_v58 = vld [vmem:[%s15489_s5 + $0x660] sm:$0xf0]  ;;  %v9887_v42 = vld [vmem:[%s15489_s5 + $0x764] sm:$0xf0] }
  0xe3   :  { %2370 = vmatpush.bf16.msra.mxu1 %v7625_v44  ;;  %v7561_v60 = vor.u32 %v9850_v57, %v7558_v58  ;;  %v7181_v58 = vor.u32 %v9759_v47, %v7180_v46  ;;  %v6828_v47 = vld [vmem:[%s15489_s5 + $0x88] sm:$0xf] }
  0xe5   :  { %2356 = vmatpush.bf16.msra.mxu0 %v7369_v56 }
  0xe6   :  { %2343 = vmatpush.bf16.msrb.mxu3 %v7081_v6  ;;  %2329 = vmatpush.bf16.msrb.mxu2 %v6825_v27  ;;  %v9786_v6 = vld [vmem:[%s15489_s5 + $0x444] sm:$0xf] }
  0xe7   :  { %2371 = vmatpush.bf16.msra.mxu1 %v7593_v53  ;;  %v7305_v8 = vor.u32 %v9786_v6, %v7302_v7  ;;  %v7149_v6 = vor.u32 %v9751_v61, %v7148_v59  ;;  %v7116_v7 = vld [vmem:[%s15489_s5 + $0x2c8] sm:$0xf]  ;;  %v9771_v61 = vld [vmem:[%s15489_s5 + $0x3cc] sm:$0xf] }
  0xe9   :  { %2357 = vmatpush.bf16.msra.mxu0 %v7337_v63 }
  0xea   :  { %2344 = vmatpush.bf16.msrb.mxu3 %v7049_v21  ;;  %2330 = vmatpush.bf16.msrb.mxu2 %v6793_v38 }
  0xeb   :  { %2372 = vmatpush.bf16.msra.mxu1 %v7561_v60 }
  0xed   :  { %2358 = vmatpush.bf16.msra.mxu0 %v7305_v8  ;;  %v9743_v8 = vld [vmem:[%s15489_s5 + $0x2e4] sm:$0xf0] }
  0xee   :  { %2345 = vmatpush.bf16.msrb.mxu3 %v7017_v33  ;;  %2331 = vmatpush.bf16.msrb.mxu2 %v6761_v48  ;;  %v7245_v33 = vor.u32 %v9775_v24, %v7244_v23 }
  0xef   :  { %2373 = vmatpush.bf16.msra.mxu1 %v7529_v4 }
  0xf1   :  { %2359 = vmatpush.bf16.msra.mxu0 %v7273_v16  ;;  %v6892_v16 = vld [vmem:[%s15489_s5 + $0x108] sm:$0xf] }
 0x12d   :  { %v611_v3 = vpop.f32.mrf.mxu0 }
 0x12e   :  { %v625_v5 = vpop.f32.mrf.mxu1  ;;  %v612_v9 = vadd.f32 %v611_v3, %v247_v0  ;;  %v9695_v3 = vld [vmem:[%s15489_s5 + $0x164] sm:$0xf0] }
 0x12f   :  { %v6925_v13 = vor.u32 %v9695_v3, %v6924_v2  ;;  %v9823_v2 = vld [vmem:[%s15489_s5 + $0x564] sm:$0xf0] }
 0x130   :  { %v626_v14 = vadd.f32 %v625_v5, %v612_v9  ;;  %v7756_v9 = vld [vmem:[%s15489_s5 + $0x7c8] sm:$0xf] }
 0x132   :  { %v695_v21 = vmul.f32 0.2, %v626_v14  ;;  %vm687_vm4 = vcmp.ge.f32.partialorder %v626_v14, 0.0 }
 0x133   :  { %v583_v11 = vpop.f32.mrf.mxu2 }
 0x134   :  { %v597_v15 = vpop.f32.mrf.mxu3  ;;  %v584_v18 = vadd.f32 %v583_v11, %v246_v10  ;;  %v703_v29 = vsel %vm687_vm4, %v626_v14, %v695_v21 }
 0x135   :  { %v613_v17 = vpop.f32.mrf.mxu0 }
 0x136   :  { %v614_v19 = vadd.f32 %v613_v17, %v247_v0  ;;  %v627_v20 = vpop.f32.mrf.mxu1  ;;  %v598_v25 = vadd.f32 %v597_v15, %v584_v18  ;;  %v6957_v0 = vor.u32 %v9703_v55, %v6956_v54  ;;  %v7117_v15 = vor.u32 %v9743_v8, %v7116_v7  ;;  %v9687_v17 = vld [vmem:[%s15489_s5 + $0x124] sm:$0xf0] }
 0x137   :  { %v7693_v54 = vor.u32 %v9887_v42, %v7692_v41  ;;  %v7020_v55 = vld [vmem:[%s15489_s5 + $0x208] sm:$0xf] }
 0x138   :  { %v628_v22 = vadd.f32 %v627_v20, %v614_v19  ;;  %v694_v38 = vmul.f32 0.2, %v598_v25  ;;  %vm686_vm6 = vcmp.ge.f32.partialorder %v598_v25, 0.0  ;;  %v9871_v7 = vld [vmem:[%s15489_s5 + $0x6e4] sm:$0xf0] }
 0x139   :  { %v7340_v41 = vld [vmem:[%s15489_s5 + $0x488] sm:$0xf] }
 0x13a   :  { %vm691_vm5 = vcmp.ge.f32.partialorder %v628_v22, 0.0  ;;  %v699_v26 = vmul.f32 0.2, %v628_v22  ;;  %v702_v48 = vsel %vm686_vm6, %v598_v25, %v694_v38  ;;  %v9735_v25 = vld [vmem:[%s15489_s5 + $0x2a4] sm:$0xf0] }
 0x13b   :  { %v585_v27 = vpop.f32.mrf.mxu2  ;;  %v9799_v42 = vld [vmem:[%s15489_s5 + $0x4a4] sm:$0xf0] }
 0x13c   :  { %v707_v30 = vsel %vm691_vm5, %v628_v22, %v699_v26  ;;  %v586_v31 = vadd.f32 %v585_v27, %v246_v10  ;;  %v599_v32 = vpop.f32.mrf.mxu3  ;;  %v9903_v10 = vld [vmem:[%s15489_s5 + $0x7e4] sm:$0xf0] }
 0x13d   :  { %v11366_v34 = vpack.c.bf16 %v707_v30, %v703_v29  ;;  %v667_v35 = vpop.f32.mrf.mxu0  ;;  %v7757_v21 = vor.u32 %v9903_v10, %v7756_v9  ;;  %v7084_v22 = vld [vmem:[%s15489_s5 + $0x288] sm:$0xf]  ;;  %v6893_v30 = vor.u32 %v9687_v17, %v6892_v16  ;;  %v9763_v10 = vld [vmem:[%s15489_s5 + $0x38c] sm:$0xf] }
 0x13e   :  { %v600_v39 = vadd.f32 %v599_v32, %v586_v31  ;;  %v681_v40 = vpop.f32.mrf.mxu1  ;;  %v668_v44 = vadd.f32 %v667_v35, %v249_v28  ;;  %v7724_v26 = vld [vmem:[%s15489_s5 + $0x788] sm:$0xf]  ;;  %v7085_v37 = vor.u32 %v9735_v25, %v7084_v22  ;;  %v9707_v17 = vld [vmem:[%s15489_s5 + $0x1cc] sm:$0xf] }
 0x13f   :  { %2290 = vmatmul.bf16.vlgmr.msra.gmra.mxu3 %v11366_v34  ;;  %v9895_v27 = vld [vmem:[%s15489_s5 + $0x7a4] sm:$0xf0]  ;;  %v9755_v25 = vld [vmem:[%s15489_s5 + $0x34c] sm:$0xf] }
 0x140   :  { %vm690_vm7 = vcmp.ge.f32.partialorder %v600_v39, 0.0  ;;  %v698_v43 = vmul.f32 0.2, %v600_v39  ;;  %2394 = vmatpush.bf16.msra.mxu3 %v7245_v33  ;;  %v682_v56 = vadd.f32 %v681_v40, %v668_v44  ;;  %v6860_v31 = vld [vmem:[%s15489_s5 + $0xc8] sm:$0xf]  ;;  %v7725_v38 = vor.u32 %v9895_v27, %v7724_v26 }
 0x141   :  { %v9679_v32 = vld [vmem:[%s15489_s5 + $0xe4] sm:$0xf0]  ;;  %v7182_v26 = vld [vmem:[%s15489_s5 + $0x368] sm:$0xf0] }
 0x142   :  { %v706_v49 = vsel %vm690_vm7, %v600_v39, %v698_v43  ;;  %v697_v4 = vmul.f32 0.2, %v682_v56  ;;  %vm689_vm8 = vcmp.ge.f32.partialorder %v682_v56, 0.0  ;;  %v7500_v33 = vld [vmem:[%s15489_s5 + $0x5c8] sm:$0xf] }
 0x143   :  { %v11388_v52 = vpack.c.bf16 %v706_v49, %v702_v48  ;;  %v639_v53 = vpop.f32.mrf.mxu2  ;;  %v9839_v35 = vld [vmem:[%s15489_s5 + $0x5e4] sm:$0xf0] }
 0x144   :  { %v653_v57 = vpop.f32.mrf.mxu3  ;;  %2395 = vmatpush.bf16.msra.mxu3 %v7213_v45  ;;  %v640_v62 = vadd.f32 %v639_v53, %v248_v50  ;;  %v705_v18 = vsel %vm689_vm8, %v682_v56, %v697_v4  ;;  %v7052_v39 = vld [vmem:[%s15489_s5 + $0x248] sm:$0xf]  ;;  %v6861_v45 = vor.u32 %v9679_v32, %v6860_v31  ;;  %v7501_v46 = vor.u32 %v9839_v35, %v7500_v33  ;;  %v9699_v31 = vld [vmem:[%s15489_s5 + $0x18c] sm:$0xf] }
 0x145   :  { %v669_v60 = vpop.f32.mrf.mxu0  ;;  %2276 = vmatmul.bf16.vlgmr.msra.gmra.mxu2 %v11388_v52  ;;  %v9727_v40 = vld [vmem:[%s15489_s5 + $0x264] sm:$0xf0]  ;;  %v6958_v32 = vld [vmem:[%s15489_s5 + $0x1a8] sm:$0xf0]  ;;  %v7185_v33 = vor.u32 %v9755_v25, %v7182_v26 }
 0x146   :  { %v670_v63 = vadd.f32 %v669_v60, %v249_v28  ;;  %2380 = vmatpush.bf16.msra.mxu2 %v6989_v51  ;;  %v683_v1 = vpop.f32.mrf.mxu1  ;;  %v654_v11 = vadd.f32 %v653_v57, %v640_v62  ;;  %v9671_v49 = vld [vmem:[%s15489_s5 + $0xa4] sm:$0xf0]  ;;  %v7053_v53 = vor.u32 %v9727_v40, %v7052_v39  ;;  %v7246_v62 = vld [vmem:[%s15489_s5 + $0x3e8] sm:$0xf0]  ;;  %v6961_v40 = vor.u32 %v9699_v31, %v6958_v32 }
 0x147   :  { %v9831_v51 = vld [vmem:[%s15489_s5 + $0x5a4] sm:$0xf0]  ;;  %v6829_v60 = vor.u32 %v9671_v49, %v6828_v47  ;;  %v7150_v39 = vld [vmem:[%s15489_s5 + $0x328] sm:$0xf0] }
 0x148   :  { %v684_v5 = vadd.f32 %v683_v1, %v670_v63  ;;  %2396 = vmatpush.bf16.msra.mxu3 %v7181_v58  ;;  %v696_v28 = vmul.f32 0.2, %v654_v11  ;;  %vm688_vm10 = vcmp.ge.f32.partialorder %v654_v11, 0.0  ;;  %v9719_v56 = vld [vmem:[%s15489_s5 + $0x224] sm:$0xf0] }
 0x149   :  { %v7660_v57 = vld [vmem:[%s15489_s5 + $0x708] sm:$0xf]  ;;  %v7021_v3 = vor.u32 %v9719_v56, %v7020_v55  ;;  %v7758_v55 = vld [vmem:[%s15489_s5 + $0x7e8] sm:$0xf0] }
 0x14a   :  { %vm693_vm9 = vcmp.ge.f32.partialorder %v684_v5, 0.0  ;;  %v701_v12 = vmul.f32 0.2, %v684_v5  ;;  %2381 = vmatpush.bf16.msra.mxu2 %v6957_v0  ;;  %v704_v43 = vsel %vm688_vm10, %v654_v11, %v696_v28  ;;  %v9879_v58 = vld [vmem:[%s15489_s5 + $0x724] sm:$0xf0] }
 0x14b   :  { %v641_v14 = vpop.f32.mrf.mxu2  ;;  %v6796_v63 = vld [vmem:[%s15489_s5 + $0x48] sm:$0xf]  ;;  %v7661_v4 = vor.u32 %v9879_v58, %v7660_v57  ;;  %v7214_v11 = vld [vmem:[%s15489_s5 + $0x3a8] sm:$0xf0] }
 0x14c   :  { %v709_v19 = vsel %vm693_vm9, %v684_v5, %v701_v12  ;;  %v642_v20 = vadd.f32 %v641_v14, %v248_v50  ;;  %2397 = vmatpush.bf16.msra.mxu3 %v7149_v6  ;;  %v655_v24 = vpop.f32.mrf.mxu3  ;;  %v7468_v50 = vld [vmem:[%s15489_s5 + $0x588] sm:$0xf]  ;;  %v7249_v5 = vor.u32 %v9771_v61, %v7246_v62  ;;  %v6894_v61 = vld [vmem:[%s15489_s5 + $0x128] sm:$0xf0] }
 0x14d   :  { %v11430_v23 = vpack.c.bf16 %v709_v19, %v705_v18  ;;  %v7469_v59 = vor.u32 %v9831_v51, %v7468_v50  ;;  %v9663_v0 = vld [vmem:[%s15489_s5 + $0x64] sm:$0xf0]  ;;  %v6990_v18 = vld [vmem:[%s15489_s5 + $0x1e8] sm:$0xf0]  ;;  %v7217_v19 = vor.u32 %v9763_v10, %v7214_v11  ;;  %v7341_v51 = vor.u32 %v9799_v42, %v7340_v41 }
 0x14e   :  { %v656_v29 = vadd.f32 %v655_v24, %v642_v20  ;;  %2382 = vmatpush.bf16.msra.mxu2 %v6925_v13  ;;  %v7436_v1 = vld [vmem:[%s15489_s5 + $0x548] sm:$0xf]  ;;  %v6797_v8 = vor.u32 %v9663_v0, %v6796_v63  ;;  %v6993_v27 = vor.u32 %v9707_v17, %v6990_v18  ;;  %v9739_v50 = vld [vmem:[%s15489_s5 + $0x2cc] sm:$0xf] }
 0x14f   :  { %2318 = vmatmul.bf16.vlgmr.msrb.gmra.mxu1 %v11430_v23  ;;  %2346 = vmatmul.bf16.vlgmr.msrb.gmra.mxu3 %v11366_v34  ;;  %v7628_v6 = vld [vmem:[%s15489_s5 + $0x6c8] sm:$0xf]  ;;  %v7437_v9 = vor.u32 %v9823_v2, %v7436_v1  ;;  %v9731_v0 = vld [vmem:[%s15489_s5 + $0x28c] sm:$0xf] }
 0x150   :  { %vm692_vm11 = vcmp.ge.f32.partialorder %v656_v29, 0.0  ;;  %v700_v36 = vmul.f32 0.2, %v656_v29  ;;  %2398 = vmatpush.bf16.msra.mxu3 %v7117_v15  ;;  %2422 = vmatpush.bf16.msrb.mxu1 %v7757_v21  ;;  %v6764_v12 = vld [vmem:[%s15489_s5 + $0x8] sm:$0xf]  ;;  %v7629_v16 = vor.u32 %v9871_v7, %v7628_v6 }
 0x151   :  { %v9655_v13 = vld [vmem:[%s15489_s5 + $0x24] sm:$0xf0]  ;;  %v7086_v2 = vld [vmem:[%s15489_s5 + $0x2a8] sm:$0xf0] }
 0x152   :  { %v708_v44 = vsel %vm692_vm11, %v656_v29, %v700_v36  ;;  %2383 = vmatpush.bf16.msra.mxu2 %v6893_v30  ;;  %v7404_v14 = vld [vmem:[%s15489_s5 + $0x508] sm:$0xf]  ;;  %v6765_v22 = vor.u32 %v9655_v13, %v6764_v12  ;;  %v9835_v10 = vld [vmem:[%s15489_s5 + $0x5cc] sm:$0xf]  ;;  %v7089_v12 = vor.u32 %v9731_v0, %v7086_v2  ;;  %v7188_v0 = vld [vmem:[%s15489_s5 + $0x350] sm:$0xf] }
 0x153   :  { %v11470_v48 = vpack.c.bf16 %v708_v44, %v704_v43  ;;  %v9815_v15 = vld [vmem:[%s15489_s5 + $0x524] sm:$0xf0]  ;;  %v9691_v44 = vld [vmem:[%s15489_s5 + $0x14c] sm:$0xf] }
 0x154   :  { %2399 = vmatpush.bf16.msra.mxu3 %v7085_v37  ;;  %2423 = vmatpush.bf16.msrb.mxu1 %v7725_v38  ;;  %v7596_v20 = vld [vmem:[%s15489_s5 + $0x688] sm:$0xf]  ;;  %v7405_v24 = vor.u32 %v9815_v15, %v7404_v14  ;;  %v9747_v38 = vld [vmem:[%s15489_s5 + $0x30c] sm:$0xf] }
 0x155   :  { %2304 = vmatmul.bf16.vlgmr.msrb.gmra.mxu0 %v11470_v48  ;;  %2332 = vmatmul.bf16.vlgmr.msrb.gmra.mxu2 %v11388_v52  ;;  %v9863_v21 = vld [vmem:[%s15489_s5 + $0x6a4] sm:$0xf0]  ;;  %v7502_v11 = vld [vmem:[%s15489_s5 + $0x5e8] sm:$0xf0] }
 0x156   :  { %2384 = vmatpush.bf16.msra.mxu2 %v6861_v45  ;;  %2408 = vmatpush.bf16.msrb.mxu0 %v7501_v46  ;;  %v7372_v28 = vld [vmem:[%s15489_s5 + $0x4c8] sm:$0xf]  ;;  %v7597_v30 = vor.u32 %v9863_v21, %v7596_v20  ;;  %v6926_v45 = vld [vmem:[%s15489_s5 + $0x168] sm:$0xf0]  ;;  %v7153_v46 = vor.u32 %v9747_v38, %v7150_v39  ;;  %v7505_v20 = vor.u32 %v9835_v10, %v7502_v11 }
 0x157   :  { %v9807_v29 = vld [vmem:[%s15489_s5 + $0x4e4] sm:$0xf0]  ;;  %v6929_v56 = vor.u32 %v9691_v44, %v6926_v45  ;;  %v9723_v14 = vld [vmem:[%s15489_s5 + $0x24c] sm:$0xf] }
 0x158   :  { %2400 = vmatpush.bf16.msra.mxu3 %v7053_v53  ;;  %2424 = vmatpush.bf16.msrb.mxu1 %v7693_v54  ;;  %v7564_v35 = vld [vmem:[%s15489_s5 + $0x648] sm:$0xf]  ;;  %v7373_v37 = vor.u32 %v9807_v29, %v7372_v28  ;;  %v7118_v53 = vld [vmem:[%s15489_s5 + $0x2e8] sm:$0xf0] }
 0x159   :  { %v9855_v36 = vld [vmem:[%s15489_s5 + $0x664] sm:$0xf0]  ;;  %v9899_v54 = vld [vmem:[%s15489_s5 + $0x7cc] sm:$0xf]  ;;  %v7121_v62 = vor.u32 %v9739_v50, %v7118_v53  ;;  %v9768_v50 = vld [vmem:[%s15489_s5 + $0x3ac] sm:$0xf0] }
 0x15a   :  { %2385 = vmatpush.bf16.msra.mxu2 %v6829_v60  ;;  %2409 = vmatpush.bf16.msrb.mxu0 %v7469_v59  ;;  %v7565_v43 = vor.u32 %v9855_v36, %v7564_v35  ;;  %v7532_v47 = vld [vmem:[%s15489_s5 + $0x608] sm:$0xf]  ;;  %v9683_v59 = vld [vmem:[%s15489_s5 + $0x10c] sm:$0xf]  ;;  %v7761_v63 = vor.u32 %v9899_v54, %v7758_v55  ;;  %v7252_v35 = vld [vmem:[%s15489_s5 + $0x3d0] sm:$0xf] }
 0x15b   :  { %v9847_v49 = vld [vmem:[%s15489_s5 + $0x624] sm:$0xf0]  ;;  %v9883_v17 = vld [vmem:[%s15489_s5 + $0x74c] sm:$0xf]  ;;  %v9776_v36 = vld [vmem:[%s15489_s5 + $0x3ec] sm:$0xf0] }
 0x15c   :  { %2401 = vmatpush.bf16.msra.mxu3 %v7021_v3  ;;  %2425 = vmatpush.bf16.msrb.mxu1 %v7661_v4  ;;  %v7308_v57 = vld [vmem:[%s15489_s5 + $0x448] sm:$0xf]  ;;  %v7533_v60 = vor.u32 %v9847_v49, %v7532_v47  ;;  %v9891_v3 = vld [vmem:[%s15489_s5 + $0x78c] sm:$0xf]  ;;  %v7220_v49 = vld [vmem:[%s15489_s5 + $0x390] sm:$0xf] }
 0x15d   :  { %v9791_v58 = vld [vmem:[%s15489_s5 + $0x464] sm:$0xf0]  ;;  %v7726_v4 = vld [vmem:[%s15489_s5 + $0x7a8] sm:$0xf0] }
 0x15e   :  { %2386 = vmatpush.bf16.msra.mxu2 %v6797_v8  ;;  %2410 = vmatpush.bf16.msrb.mxu0 %v7437_v9  ;;  %v7309_v1 = vor.u32 %v9791_v58, %v7308_v57  ;;  %v7276_v6 = vld [vmem:[%s15489_s5 + $0x408] sm:$0xf]  ;;  %v9675_v8 = vld [vmem:[%s15489_s5 + $0xcc] sm:$0xf]  ;;  %v7729_v13 = vor.u32 %v9891_v3, %v7726_v4  ;;  %v6996_v57 = vld [vmem:[%s15489_s5 + $0x1d0] sm:$0xf] }
 0x15f   :  { %2374 = vmatmul.bf16.vlgmr.msra.gmra.mxu1 %v11430_v23  ;;  %2402 = vmatmul.bf16.vlgmr.msra.gmra.mxu3 %v11366_v34  ;;  %v9783_v7 = vld [vmem:[%s15489_s5 + $0x424] sm:$0xf0]  ;;  %v6862_v9 = vld [vmem:[%s15489_s5 + $0xe8] sm:$0xf0]  ;;  %v9712_v58 = vld [vmem:[%s15489_s5 + $0x1ec] sm:$0xf0] }
 0x160   :  { %2450 = vmatpush.bf16.msrb.mxu3 %v7249_v5  ;;  %2426 = vmatpush.bf16.msrb.mxu1 %v7629_v16  ;;  %v6897_v5 = vor.u32 %v9683_v59, %v6894_v61  ;;  %v7277_v15 = vor.u32 %v9783_v7, %v7276_v6  ;;  %v7054_v16 = vld [vmem:[%s15489_s5 + $0x268] sm:$0xf0]  ;;  %v6997_v2 = vor.u32 %v9712_v58, %v6996_v57  ;;  %v6964_v6 = vld [vmem:[%s15489_s5 + $0x190] sm:$0xf] }
 0x161   :  { %v7694_v18 = vld [vmem:[%s15489_s5 + $0x768] sm:$0xf0]  ;;  %v7057_v26 = vor.u32 %v9723_v14, %v7054_v16  ;;  %v9704_v7 = vld [vmem:[%s15489_s5 + $0x1ac] sm:$0xf0] }
 0x162   :  { %2387 = vmatpush.bf16.msra.mxu2 %v6765_v22  ;;  %2411 = vmatpush.bf16.msrb.mxu0 %v7405_v24  ;;  %v9667_v21 = vld [vmem:[%s15489_s5 + $0x8c] sm:$0xf]  ;;  %v6965_v14 = vor.u32 %v9704_v7, %v6964_v6  ;;  %v9880_v6 = vld [vmem:[%s15489_s5 + $0x72c] sm:$0xf0] }
 0x163   :  { %v6830_v22 = vld [vmem:[%s15489_s5 + $0xa8] sm:$0xf0] }
 0x164   :  { %2451 = vmatpush.bf16.msrb.mxu3 %v7217_v19  ;;  %2427 = vmatpush.bf16.msrb.mxu1 %v7597_v30  ;;  %v6865_v19 = vor.u32 %v9675_v8, %v6862_v9  ;;  %v9827_v24 = vld [vmem:[%s15489_s5 + $0x58c] sm:$0xf]  ;;  %v6833_v32 = vor.u32 %v9667_v21, %v6830_v22 }
 0x165   :  { %2360 = vmatmul.bf16.vlgmr.msra.gmra.mxu0 %v11470_v48  ;;  %2388 = vmatmul.bf16.vlgmr.msra.gmra.mxu2 %v11388_v52  ;;  %v7470_v25 = vld [vmem:[%s15489_s5 + $0x5a8] sm:$0xf0] }
 0x166   :  { %2436 = vmatpush.bf16.msrb.mxu2 %v6993_v27  ;;  %2412 = vmatpush.bf16.msrb.mxu0 %v7373_v37  ;;  %v7697_v27 = vor.u32 %v9883_v17, %v7694_v18  ;;  %v9715_v28 = vld [vmem:[%s15489_s5 + $0x20c] sm:$0xf]  ;;  %v6932_v18 = vld [vmem:[%s15489_s5 + $0x150] sm:$0xf] }
 0x167   :  { %v7022_v29 = vld [vmem:[%s15489_s5 + $0x228] sm:$0xf0] }
 0x168   :  { %2452 = vmatpush.bf16.msrb.mxu3 %v7185_v33  ;;  %2428 = vmatpush.bf16.msrb.mxu1 %v7565_v43  ;;  %v9875_v30 = vld [vmem:[%s15489_s5 + $0x70c] sm:$0xf]  ;;  %v7473_v33 = vor.u32 %v9827_v24, %v7470_v25  ;;  %v7025_v41 = vor.u32 %v9715_v28, %v7022_v29  ;;  %v7253_v43 = vor.u32 %v9776_v36, %v7252_v35  ;;  %v7124_v24 = vld [vmem:[%s15489_s5 + $0x2d0] sm:$0xf] }
 0x169   :  { %v7662_v31 = vld [vmem:[%s15489_s5 + $0x728] sm:$0xf0]  ;;  %v9904_v28 = vld [vmem:[%s15489_s5 + $0x7ec] sm:$0xf0] }
 0x16a   :  { %2437 = vmatpush.bf16.msrb.mxu2 %v6961_v40  ;;  %2413 = vmatpush.bf16.msrb.mxu0 %v7341_v51  ;;  %v9659_v37 = vld [vmem:[%s15489_s5 + $0x4c] sm:$0xf]  ;;  %v7665_v42 = vor.u32 %v9875_v30, %v7662_v31  ;;  %v9688_v35 = vld [vmem:[%s15489_s5 + $0x12c] sm:$0xf0] }
 0x16b   :  { %v6798_v38 = vld [vmem:[%s15489_s5 + $0x68] sm:$0xf0] }
 0x16c   :  { %2453 = vmatpush.bf16.msrb.mxu3 %v7153_v46  ;;  %2429 = vmatpush.bf16.msrb.mxu1 %v7533_v60  ;;  %v9819_v39 = vld [vmem:[%s15489_s5 + $0x54c] sm:$0xf]  ;;  %v6801_v46 = vor.u32 %v9659_v37, %v6798_v38  ;;  %v7221_v60 = vor.u32 %v9768_v50, %v7220_v49  ;;  %v7092_v38 = vld [vmem:[%s15489_s5 + $0x290] sm:$0xf] }
 0x16d   :  { %v7438_v40 = vld [vmem:[%s15489_s5 + $0x568] sm:$0xf0]  ;;  %v7508_v49 = vld [vmem:[%s15489_s5 + $0x5d0] sm:$0xf] }
 0x16e   :  { %2438 = vmatpush.bf16.msrb.mxu2 %v6929_v56  ;;  %2414 = vmatpush.bf16.msrb.mxu0 %v7309_v1  ;;  %v9867_v44 = vld [vmem:[%s15489_s5 + $0x6cc] sm:$0xf]  ;;  %v7441_v47 = vor.u32 %v9819_v39, %v7438_v40  ;;  %v9760_v1 = vld [vmem:[%s15489_s5 + $0x36c] sm:$0xf0] }
 0x16f   :  { %2430 = vmatmul.bf16.vlgmr.msrb.gmra.mxu1 %v11430_v23  ;;  %v7630_v45 = vld [vmem:[%s15489_s5 + $0x6e8] sm:$0xf0]  ;;  %v7189_v8 = vor.u32 %v9760_v1, %v7188_v0  ;;  %v9736_v40 = vld [vmem:[%s15489_s5 + $0x2ac] sm:$0xf0] }
 0x170   :  { %2454 = vmatpush.bf16.msrb.mxu3 %v7121_v62  ;;  %2478 = vmatpush.bf16.msra.mxu1 %v7761_v63  ;;  %v9651_v51 = vld [vmem:[%s15489_s5 + $0xc] sm:$0xf]  ;;  %v7633_v56 = vor.u32 %v9867_v44, %v7630_v45  ;;  %v9840_v50 = vld [vmem:[%s15489_s5 + $0x5ec] sm:$0xf0] }
 0x171   :  { %v6766_v53 = vld [vmem:[%s15489_s5 + $0x28] sm:$0xf0]  ;;  %v7509_v58 = vor.u32 %v9840_v50, %v7508_v49  ;;  %v9832_v0 = vld [vmem:[%s15489_s5 + $0x5ac] sm:$0xf0] }
 0x172   :  { %2439 = vmatpush.bf16.msrb.mxu2 %v6897_v5  ;;  %2415 = vmatpush.bf16.msrb.mxu0 %v7277_v15  ;;  %v9811_v54 = vld [vmem:[%s15489_s5 + $0x50c] sm:$0xf]  ;;  %v6769_v62 = vor.u32 %v9651_v51, %v6766_v53  ;;  %v7093_v51 = vor.u32 %v9736_v40, %v7092_v38  ;;  %v9756_v38 = vld [vmem:[%s15489_s5 + $0x354] sm:$0xf]  ;;  %v7572_v49 = vld [vmem:[%s15489_s5 + $0x650] sm:$0xf] }
 0x173   :  { %v7406_v55 = vld [vmem:[%s15489_s5 + $0x528] sm:$0xf0]  ;;  %v7190_v40 = vld [vmem:[%s15489_s5 + $0x370] sm:$0xf0]  ;;  %v9856_v50 = vld [vmem:[%s15489_s5 + $0x66c] sm:$0xf0] }
 0x174   :  { %2455 = vmatpush.bf16.msrb.mxu3 %v7089_v12  ;;  %2479 = vmatpush.bf16.msra.mxu1 %v7729_v13  ;;  %v9859_v59 = vld [vmem:[%s15489_s5 + $0x68c] sm:$0xf]  ;;  %v7409_v63 = vor.u32 %v9811_v54, %v7406_v55  ;;  %v7156_v12 = vld [vmem:[%s15489_s5 + $0x310] sm:$0xf] }
 0x175   :  { %2416 = vmatmul.bf16.vlgmr.msrb.gmra.mxu0 %v11470_v48  ;;  %v7598_v61 = vld [vmem:[%s15489_s5 + $0x6a8] sm:$0xf0]  ;;  %v9752_v13 = vld [vmem:[%s15489_s5 + $0x32c] sm:$0xf0] }
 0x176   :  { %2440 = vmatpush.bf16.msrb.mxu2 %v6865_v19  ;;  %2464 = vmatpush.bf16.msra.mxu0 %v7505_v20  ;;  %v9803_v3 = vld [vmem:[%s15489_s5 + $0x4cc] sm:$0xf]  ;;  %v7601_v5 = vor.u32 %v9859_v59, %v7598_v61  ;;  %v9696_v19 = vld [vmem:[%s15489_s5 + $0x16c] sm:$0xf0]  ;;  %v7157_v20 = vor.u32 %v9752_v13, %v7156_v12 }
 0x177   :  { %v7374_v4 = vld [vmem:[%s15489_s5 + $0x4e8] sm:$0xf0]  ;;  %v6933_v29 = vor.u32 %v9696_v19, %v6932_v18  ;;  %v7060_v55 = vld [vmem:[%s15489_s5 + $0x250] sm:$0xf] }
 0x178   :  { %2456 = vmatpush.bf16.msrb.mxu3 %v7057_v26  ;;  %2480 = vmatpush.bf16.msra.mxu1 %v7697_v27  ;;  %v9851_v9 = vld [vmem:[%s15489_s5 + $0x64c] sm:$0xf]  ;;  %v7377_v11 = vor.u32 %v9803_v3, %v7374_v4  ;;  %v9744_v26 = vld [vmem:[%s15489_s5 + $0x2ec] sm:$0xf0] }
 0x179   :  { %v7566_v10 = vld [vmem:[%s15489_s5 + $0x668] sm:$0xf0]  ;;  %v7764_v27 = vld [vmem:[%s15489_s5 + $0x7d0] sm:$0xf]  ;;  %v7125_v36 = vor.u32 %v9744_v26, %v7124_v24  ;;  %v7222_v24 = vld [vmem:[%s15489_s5 + $0x3b0] sm:$0xf0] }
 0x17a   :  { %2441 = vmatpush.bf16.msrb.mxu2 %v6833_v32  ;;  %2465 = vmatpush.bf16.msra.mxu0 %v7473_v33  ;;  %v9795_v15 = vld [vmem:[%s15489_s5 + $0x48c] sm:$0xf]  ;;  %v7569_v17 = vor.u32 %v9851_v9, %v7566_v10  ;;  %v6900_v33 = vld [vmem:[%s15489_s5 + $0x110] sm:$0xf]  ;;  %v7765_v37 = vor.u32 %v9904_v28, %v7764_v27  ;;  %v9772_v9 = vld [vmem:[%s15489_s5 + $0x3d4] sm:$0xf] }
 0x17b   :  { %v7342_v16 = vld [vmem:[%s15489_s5 + $0x4a8] sm:$0xf0]  ;;  %v9888_v59 = vld [vmem:[%s15489_s5 + $0x76c] sm:$0xf0]  ;;  %v7254_v10 = vld [vmem:[%s15489_s5 + $0x3f0] sm:$0xf0] }
 0x17c   :  { %2457 = vmatpush.bf16.msrb.mxu3 %v7025_v41  ;;  %2481 = vmatpush.bf16.msra.mxu1 %v7665_v42  ;;  %v9843_v21 = vld [vmem:[%s15489_s5 + $0x60c] sm:$0xf]  ;;  %v7345_v25 = vor.u32 %v9795_v15, %v7342_v16  ;;  %v7732_v41 = vld [vmem:[%s15489_s5 + $0x790] sm:$0xf] }
 0x17d   :  { %v7534_v22 = vld [vmem:[%s15489_s5 + $0x628] sm:$0xf0]  ;;  %v9896_v42 = vld [vmem:[%s15489_s5 + $0x7ac] sm:$0xf0] }
 0x17e   :  { %2442 = vmatpush.bf16.msrb.mxu2 %v6801_v46  ;;  %2466 = vmatpush.bf16.msra.mxu0 %v7441_v47  ;;  %v9787_v30 = vld [vmem:[%s15489_s5 + $0x44c] sm:$0xf]  ;;  %v7537_v32 = vor.u32 %v9843_v21, %v7534_v22  ;;  %v6868_v46 = vld [vmem:[%s15489_s5 + $0xd0] sm:$0xf]  ;;  %v7733_v53 = vor.u32 %v9896_v42, %v7732_v41  ;;  %v9764_v22 = vld [vmem:[%s15489_s5 + $0x394] sm:$0xf] }
 0x17f   :  { %2458 = vmatmul.bf16.vlgmr.msrb.gmra.mxu3 %v11366_v34  ;;  %v7310_v31 = vld [vmem:[%s15489_s5 + $0x468] sm:$0xf0]  ;;  %v9680_v47 = vld [vmem:[%s15489_s5 + $0xec] sm:$0xf0] }
 0x180   :  { %2506 = vmatpush.bf16.msra.mxu3 %v7253_v43  ;;  %2482 = vmatpush.bf16.msra.mxu1 %v7633_v56  ;;  %v7313_v39 = vor.u32 %v9787_v30, %v7310_v31  ;;  %v6901_v43 = vor.u32 %v9688_v35, %v6900_v33  ;;  %v9779_v44 = vld [vmem:[%s15489_s5 + $0x40c] sm:$0xf]  ;;  %v9728_v56 = vld [vmem:[%s15489_s5 + $0x26c] sm:$0xf0]  ;;  %v6869_v57 = vor.u32 %v9680_v47, %v6868_v46  ;;  %v6998_v30 = vld [vmem:[%s15489_s5 + $0x1f0] sm:$0xf0] }
 0x181   :  { %v7278_v45 = vld [vmem:[%s15489_s5 + $0x428] sm:$0xf0]  ;;  %v6836_v61 = vld [vmem:[%s15489_s5 + $0x90] sm:$0xf]  ;;  %v7061_v1 = vor.u32 %v9728_v56, %v7060_v55  ;;  %v7193_v46 = vor.u32 %v9756_v38, %v7190_v40  ;;  %v7478_v38 = vld [vmem:[%s15489_s5 + $0x5b0] sm:$0xf0] }
 0x182   :  { %2443 = vmatpush.bf16.msrb.mxu2 %v6769_v62  ;;  %2467 = vmatpush.bf16.msra.mxu0 %v7409_v63  ;;  %v7281_v54 = vor.u32 %v9779_v44, %v7278_v45  ;;  %v9672_v62 = vld [vmem:[%s15489_s5 + $0xac] sm:$0xf0]  ;;  %v6966_v44 = vld [vmem:[%s15489_s5 + $0x1b0] sm:$0xf0] }
 0x183   :  { %v7476_v63 = vld [vmem:[%s15489_s5 + $0x590] sm:$0xf]  ;;  %v6837_v7 = vor.u32 %v9672_v62, %v6836_v61  ;;  %v9716_v40 = vld [vmem:[%s15489_s5 + $0x214] sm:$0xf] }
 0x184   :  { %2507 = vmatpush.bf16.msra.mxu3 %v7221_v60  ;;  %2483 = vmatpush.bf16.msra.mxu1 %v7601_v5  ;;  %v7700_v60 = vld [vmem:[%s15489_s5 + $0x750] sm:$0xf] }
 0x185   :  { %2444 = vmatmul.bf16.vlgmr.msrb.gmra.mxu2 %v11388_v52  ;;  %v7701_v3 = vor.u32 %v9888_v59, %v7700_v60  ;;  %v9720_v4 = vld [vmem:[%s15489_s5 + $0x22c] sm:$0xf0]  ;;  %v7573_v60 = vor.u32 %v9856_v50, %v7572_v49  ;;  %v9777_v49 = vld [vmem:[%s15489_s5 + $0x3f4] sm:$0xf0]  ;;  %v9660_v50 = vld [vmem:[%s15489_s5 + $0x54] sm:$0xf] }
 0x186   :  { %2492 = vmatpush.bf16.msra.mxu2 %v6997_v2  ;;  %2468 = vmatpush.bf16.msra.mxu0 %v7377_v11  ;;  %v7028_v2 = vld [vmem:[%s15489_s5 + $0x210] sm:$0xf] }
 0x187   :  { %v7668_v5 = vld [vmem:[%s15489_s5 + $0x710] sm:$0xf]  ;;  %v7029_v15 = vor.u32 %v9720_v4, %v7028_v2  ;;  %v7766_v4 = vld [vmem:[%s15489_s5 + $0x7f0] sm:$0xf0] }
 0x188   :  { %2508 = vmatpush.bf16.msra.mxu3 %v7189_v8  ;;  %2484 = vmatpush.bf16.msra.mxu1 %v7569_v17  ;;  %v7477_v8 = vor.u32 %v9832_v0, %v7476_v63  ;;  %v6804_v11 = vld [vmem:[%s15489_s5 + $0x50] sm:$0xf]  ;;  %v7669_v16 = vor.u32 %v9880_v6, %v7668_v5  ;;  %v7257_v17 = vor.u32 %v9772_v9, %v7254_v10  ;;  %v9740_v0 = vld [vmem:[%s15489_s5 + $0x2d4] sm:$0xf] }
 0x189   :  { %v9664_v12 = vld [vmem:[%s15489_s5 + $0x6c] sm:$0xf0] }
 0x18a   :  { %2493 = vmatpush.bf16.msra.mxu2 %v6965_v14  ;;  %2469 = vmatpush.bf16.msra.mxu0 %v7345_v25  ;;  %v7444_v13 = vld [vmem:[%s15489_s5 + $0x550] sm:$0xf] }
 0x18b   :  { %v9824_v14 = vld [vmem:[%s15489_s5 + $0x56c] sm:$0xf0] }
 0x18c   :  { %2509 = vmatpush.bf16.msra.mxu3 %v7157_v20  ;;  %2485 = vmatpush.bf16.msra.mxu1 %v7537_v32  ;;  %v7636_v18 = vld [vmem:[%s15489_s5 + $0x6d0] sm:$0xf]  ;;  %v6805_v20 = vor.u32 %v9664_v12, %v6804_v11  ;;  %v7445_v21 = vor.u32 %v9824_v14, %v7444_v13  ;;  %v7225_v32 = vor.u32 %v9764_v22, %v7222_v24  ;;  %v9732_v12 = vld [vmem:[%s15489_s5 + $0x294] sm:$0xf] }
 0x18d   :  { %v9872_v19 = vld [vmem:[%s15489_s5 + $0x6ec] sm:$0xf0]  ;;  %v7094_v13 = vld [vmem:[%s15489_s5 + $0x2b0] sm:$0xf0] }
 0x18e   :  { %2494 = vmatpush.bf16.msra.mxu2 %v6933_v29  ;;  %2470 = vmatpush.bf16.msra.mxu0 %v7313_v39  ;;  %v6772_v25 = vld [vmem:[%s15489_s5 + $0x10] sm:$0xf]  ;;  %v9708_v29 = vld [vmem:[%s15489_s5 + $0x1d4] sm:$0xf]  ;;  %v7637_v31 = vor.u32 %v9872_v19, %v7636_v18 }
 0x18f   :  { %2486 = vmatmul.bf16.vlgmr.msra.gmra.mxu1 %v11430_v23  ;;  %v9656_v26 = vld [vmem:[%s15489_s5 + $0x2c] sm:$0xf0]  ;;  %v7001_v39 = vor.u32 %v9708_v29, %v6998_v30  ;;  %v9836_v22 = vld [vmem:[%s15489_s5 + $0x5d4] sm:$0xf] }
 0x190   :  { %2510 = vmatpush.bf16.msra.mxu3 %v7125_v36  ;;  %2534 = vmatpush.bf16.msrb.mxu1 %v7765_v37  ;;  %v7412_v27 = vld [vmem:[%s15489_s5 + $0x510] sm:$0xf]  ;;  %v6773_v33 = vor.u32 %v9656_v26, %v6772_v25  ;;  %v7510_v24 = vld [vmem:[%s15489_s5 + $0x5f0] sm:$0xf0]  ;;  %v7097_v25 = vor.u32 %v9732_v12, %v7094_v13  ;;  %v7196_v12 = vld [vmem:[%s15489_s5 + $0x358] sm:$0xf] }
 0x191   :  { %v9816_v28 = vld [vmem:[%s15489_s5 + $0x52c] sm:$0xf0]  ;;  %v9724_v29 = vld [vmem:[%s15489_s5 + $0x254] sm:$0xf] }
 0x192   :  { %2495 = vmatpush.bf16.msra.mxu2 %v6901_v43  ;;  %2471 = vmatpush.bf16.msra.mxu0 %v7281_v54  ;;  %v7413_v35 = vor.u32 %v9816_v28, %v7412_v27  ;;  %v7604_v36 = vld [vmem:[%s15489_s5 + $0x690] sm:$0xf]  ;;  %v9700_v43 = vld [vmem:[%s15489_s5 + $0x194] sm:$0xf] }
 0x193   :  { %v9864_v37 = vld [vmem:[%s15489_s5 + $0x6ac] sm:$0xf0]  ;;  %v7158_v54 = vld [vmem:[%s15489_s5 + $0x330] sm:$0xf0] }
 0x194   :  { %2511 = vmatpush.bf16.msra.mxu3 %v7093_v51  ;;  %2535 = vmatpush.bf16.msrb.mxu1 %v7733_v53  ;;  %v7380_v41 = vld [vmem:[%s15489_s5 + $0x4d0] sm:$0xf]  ;;  %v7605_v45 = vor.u32 %v9864_v37, %v7604_v36  ;;  %v9748_v51 = vld [vmem:[%s15489_s5 + $0x314] sm:$0xf]  ;;  %v6969_v53 = vor.u32 %v9700_v43, %v6966_v44 }
 0x195   :  { %2472 = vmatmul.bf16.vlgmr.msra.gmra.mxu0 %v11470_v48  ;;  %v9808_v42 = vld [vmem:[%s15489_s5 + $0x4ec] sm:$0xf0]  ;;  %v7161_v61 = vor.u32 %v9748_v51, %v7158_v54  ;;  %v7062_v30 = vld [vmem:[%s15489_s5 + $0x270] sm:$0xf0] }
 0x196   :  { %2496 = vmatpush.bf16.msra.mxu2 %v6869_v57  ;;  %2520 = vmatpush.bf16.msrb.mxu0 %v7509_v58  ;;  %v7381_v47 = vor.u32 %v9808_v42, %v7380_v41  ;;  %v7348_v55 = vld [vmem:[%s15489_s5 + $0x490] sm:$0xf]  ;;  %v9692_v57 = vld [vmem:[%s15489_s5 + $0x154] sm:$0xf] }
 0x197   :  { %v9800_v56 = vld [vmem:[%s15489_s5 + $0x4ac] sm:$0xf0]  ;;  %v6934_v58 = vld [vmem:[%s15489_s5 + $0x170] sm:$0xf0] }
 0x198   :  { %2512 = vmatpush.bf16.msra.mxu3 %v7061_v1  ;;  %2536 = vmatpush.bf16.msrb.mxu1 %v7701_v3  ;;  %v7540_v59 = vld [vmem:[%s15489_s5 + $0x610] sm:$0xf]  ;;  %v7349_v62 = vor.u32 %v9800_v56, %v7348_v55  ;;  %v7126_v1 = vld [vmem:[%s15489_s5 + $0x2f0] sm:$0xf0]  ;;  %v6937_v2 = vor.u32 %v9692_v57, %v6934_v58 }
 0x199   :  { %v9848_v63 = vld [vmem:[%s15489_s5 + $0x62c] sm:$0xf0]  ;;  %v9900_v3 = vld [vmem:[%s15489_s5 + $0x7d4] sm:$0xf]  ;;  %v7129_v10 = vor.u32 %v9740_v0, %v7126_v1 }
 0x19a   :  { %2497 = vmatpush.bf16.msra.mxu2 %v6837_v7  ;;  %2521 = vmatpush.bf16.msrb.mxu0 %v7477_v8  ;;  %v7316_v5 = vld [vmem:[%s15489_s5 + $0x450] sm:$0xf]  ;;  %v9684_v7 = vld [vmem:[%s15489_s5 + $0x114] sm:$0xf]  ;;  %v7541_v9 = vor.u32 %v9848_v63, %v7540_v59  ;;  %v7769_v11 = vor.u32 %v9900_v3, %v7766_v4  ;;  %v9769_v63 = vld [vmem:[%s15489_s5 + $0x3b4] sm:$0xf0] }
 0x19b   :  { %v9792_v6 = vld [vmem:[%s15489_s5 + $0x46c] sm:$0xf0]  ;;  %v6902_v8 = vld [vmem:[%s15489_s5 + $0x130] sm:$0xf0]  ;;  %v7004_v4 = vld [vmem:[%s15489_s5 + $0x1d8] sm:$0xf] }
 0x19c   :  { %2513 = vmatpush.bf16.msra.mxu3 %v7029_v15  ;;  %2537 = vmatpush.bf16.msrb.mxu1 %v7669_v16  ;;  %v7317_v14 = vor.u32 %v9792_v6, %v7316_v5  ;;  %v6905_v15 = vor.u32 %v9684_v7, %v6902_v8  ;;  %v9892_v16 = vld [vmem:[%s15489_s5 + $0x794] sm:$0xf]  ;;  %v7284_v18 = vld [vmem:[%s15489_s5 + $0x410] sm:$0xf]  ;;  %v9713_v5 = vld [vmem:[%s15489_s5 + $0x1f4] sm:$0xf0] }
 0x19d   :  { %v9784_v19 = vld [vmem:[%s15489_s5 + $0x42c] sm:$0xf0]  ;;  %v6838_v36 = vld [vmem:[%s15489_s5 + $0xb0] sm:$0xf0]  ;;  %v7005_v13 = vor.u32 %v9713_v5, %v7004_v4  ;;  %v7068_v4 = vld [vmem:[%s15489_s5 + $0x258] sm:$0xf] }
 0x19e   :  { %2498 = vmatpush.bf16.msra.mxu2 %v6805_v20  ;;  %2522 = vmatpush.bf16.msrb.mxu0 %v7445_v21  ;;  %v9676_v20 = vld [vmem:[%s15489_s5 + $0xd4] sm:$0xf]  ;;  %v7285_v27 = vor.u32 %v9784_v19, %v7284_v18  ;;  %v9705_v18 = vld [vmem:[%s15489_s5 + $0x1b4] sm:$0xf0] }
 0x19f   :  { %2514 = vmatmul.bf16.vlgmr.msra.gmra.mxu3 %v11366_v34  ;;  %v6870_v21 = vld [vmem:[%s15489_s5 + $0xf0] sm:$0xf0]  ;;  %v9729_v5 = vld [vmem:[%s15489_s5 + $0x274] sm:$0xf0] }
 0x1a0   :  { %2562 = vmatpush.bf16.msrb.mxu3 %v7257_v17  ;;  %2538 = vmatpush.bf16.msrb.mxu1 %v7637_v31  ;;  %v7734_v17 = vld [vmem:[%s15489_s5 + $0x7b0] sm:$0xf0]  ;;  %v6873_v28 = vor.u32 %v9676_v20, %v6870_v21 }
 0x1a1   :  { %v7737_v26 = vor.u32 %v9892_v16, %v7734_v17  ;;  %v9884_v31 = vld [vmem:[%s15489_s5 + $0x754] sm:$0xf]  ;;  %v6972_v17 = vld [vmem:[%s15489_s5 + $0x198] sm:$0xf] }
 0x1a2   :  { %2499 = vmatpush.bf16.msra.mxu2 %v6773_v33  ;;  %2523 = vmatpush.bf16.msrb.mxu0 %v7413_v35  ;;  %v7702_v33 = vld [vmem:[%s15489_s5 + $0x770] sm:$0xf0] }
 0x1a3   :  { %v9668_v35 = vld [vmem:[%s15489_s5 + $0x94] sm:$0xf]  ;;  %v7705_v41 = vor.u32 %v9884_v31, %v7702_v33  ;;  %v9697_v31 = vld [vmem:[%s15489_s5 + $0x174] sm:$0xf0] }
 0x1a4   :  { %2563 = vmatpush.bf16.msrb.mxu3 %v7225_v32  ;;  %2539 = vmatpush.bf16.msrb.mxu1 %v7605_v45  ;;  %v7513_v32 = vor.u32 %v9836_v22, %v7510_v24  ;;  %v9828_v37 = vld [vmem:[%s15489_s5 + $0x594] sm:$0xf]  ;;  %v6841_v42 = vor.u32 %v9668_v35, %v6838_v36 }
 0x1a5   :  { %2500 = vmatmul.bf16.vlgmr.msra.gmra.mxu2 %v11388_v52  ;;  %v7030_v43 = vld [vmem:[%s15489_s5 + $0x230] sm:$0xf0] }
 0x1a6   :  { %2548 = vmatpush.bf16.msrb.mxu2 %v7001_v39  ;;  %2524 = vmatpush.bf16.msrb.mxu0 %v7381_v47  ;;  %v7065_v39 = vor.u32 %v9724_v29, %v7062_v30  ;;  %v9876_v44 = vld [vmem:[%s15489_s5 + $0x714] sm:$0xf]  ;;  %v7260_v47 = vld [vmem:[%s15489_s5 + $0x3d8] sm:$0xf]  ;;  %v7033_v55 = vor.u32 %v9716_v40, %v7030_v43 }
 0x1a7   :  { %v7670_v45 = vld [vmem:[%s15489_s5 + $0x730] sm:$0xf0]  ;;  %v7261_v57 = vor.u32 %v9777_v49, %v7260_v47  ;;  %v6940_v30 = vld [vmem:[%s15489_s5 + $0x158] sm:$0xf] }
 0x1a8   :  { %2564 = vmatpush.bf16.msrb.mxu3 %v7193_v46  ;;  %2540 = vmatpush.bf16.msrb.mxu1 %v7573_v60  ;;  %v7481_v46 = vor.u32 %v9828_v37, %v7478_v38  ;;  %v6806_v51 = vld [vmem:[%s15489_s5 + $0x70] sm:$0xf0]  ;;  %v7673_v56 = vor.u32 %v9876_v44, %v7670_v45  ;;  %v7132_v38 = vld [vmem:[%s15489_s5 + $0x2d8] sm:$0xf]  ;;  %v6941_v40 = vor.u32 %v9697_v31, %v6940_v30 }
 0x1a9   :  { %v7446_v54 = vld [vmem:[%s15489_s5 + $0x570] sm:$0xf0]  ;;  %v6809_v59 = vor.u32 %v9660_v50, %v6806_v51  ;;  %v6908_v45 = vld [vmem:[%s15489_s5 + $0x118] sm:$0xf] }
 0x1aa   :  { %2549 = vmatpush.bf16.msrb.mxu2 %v6969_v53  ;;  %2525 = vmatpush.bf16.msrb.mxu0 %v7349_v62  ;;  %v9820_v53 = vld [vmem:[%s15489_s5 + $0x554] sm:$0xf]  ;;  %v7228_v62 = vld [vmem:[%s15489_s5 + $0x398] sm:$0xf] }
 0x1ab   :  { %v9868_v58 = vld [vmem:[%s15489_s5 + $0x6d4] sm:$0xf]  ;;  %v7229_v7 = vor.u32 %v9769_v63, %v7228_v62  ;;  %v7100_v51 = vld [vmem:[%s15489_s5 + $0x298] sm:$0xf] }
 0x1ac   :  { %2565 = vmatpush.bf16.msrb.mxu3 %v7161_v61  ;;  %2541 = vmatpush.bf16.msrb.mxu1 %v7541_v9  ;;  %v7638_v60 = vld [vmem:[%s15489_s5 + $0x6f0] sm:$0xf0]  ;;  %v7449_v61 = vor.u32 %v9820_v53, %v7446_v54  ;;  %v9737_v53 = vld [vmem:[%s15489_s5 + $0x2b4] sm:$0xf0] }
 0x1ad   :  { %v9652_v0 = vld [vmem:[%s15489_s5 + $0x14] sm:$0xf]  ;;  %v7641_v6 = vor.u32 %v9868_v58, %v7638_v60  ;;  %v7516_v62 = vld [vmem:[%s15489_s5 + $0x5d8] sm:$0xf] }
 0x1ae   :  { %2550 = vmatpush.bf16.msrb.mxu2 %v6937_v2  ;;  %2526 = vmatpush.bf16.msrb.mxu0 %v7317_v14  ;;  %v6774_v1 = vld [vmem:[%s15489_s5 + $0x30] sm:$0xf0]  ;;  %v9761_v14 = vld [vmem:[%s15489_s5 + $0x374] sm:$0xf0] }
 0x1af   :  { %2542 = vmatmul.bf16.vlgmr.msrb.gmra.mxu1 %v11430_v23  ;;  %v9812_v2 = vld [vmem:[%s15489_s5 + $0x514] sm:$0xf]  ;;  %v6777_v8 = vor.u32 %v9652_v0, %v6774_v1  ;;  %v7197_v20 = vor.u32 %v9761_v14, %v7196_v12  ;;  %v9841_v63 = vld [vmem:[%s15489_s5 + $0x5f4] sm:$0xf0]  ;;  %v7101_v0 = vor.u32 %v9737_v53, %v7100_v51 }
 0x1b0   :  { %2566 = vmatpush.bf16.msrb.mxu3 %v7129_v10  ;;  %2590 = vmatpush.bf16.msra.mxu1 %v7769_v11  ;;  %v7414_v3 = vld [vmem:[%s15489_s5 + $0x530] sm:$0xf0]  ;;  %v9833_v12 = vld [vmem:[%s15489_s5 + $0x5b4] sm:$0xf0] }
 0x1b1   :  { %v7417_v9 = vor.u32 %v9812_v2, %v7414_v3  ;;  %v9860_v10 = vld [vmem:[%s15489_s5 + $0x694] sm:$0xf]  ;;  %v7036_v14 = vld [vmem:[%s15489_s5 + $0x218] sm:$0xf] }
 0x1b2   :  { %2551 = vmatpush.bf16.msrb.mxu2 %v6905_v15  ;;  %2527 = vmatpush.bf16.msrb.mxu0 %v7285_v27  ;;  %v7606_v11 = vld [vmem:[%s15489_s5 + $0x6b0] sm:$0xf0]  ;;  %v9753_v27 = vld [vmem:[%s15489_s5 + $0x334] sm:$0xf0] }
 0x1b3   :  { %v9804_v15 = vld [vmem:[%s15489_s5 + $0x4d4] sm:$0xf]  ;;  %v7609_v19 = vor.u32 %v9860_v10, %v7606_v11  ;;  %v9673_v10 = vld [vmem:[%s15489_s5 + $0xb4] sm:$0xf0] }
 0x1b4   :  { %2567 = vmatpush.bf16.msrb.mxu3 %v7097_v25  ;;  %2591 = vmatpush.bf16.msra.mxu1 %v7737_v26  ;;  %v7382_v16 = vld [vmem:[%s15489_s5 + $0x4f0] sm:$0xf0]  ;;  %v7164_v25 = vld [vmem:[%s15489_s5 + $0x318] sm:$0xf]  ;;  %v6973_v26 = vor.u32 %v9705_v18, %v6972_v17 }
 0x1b5   :  { %2528 = vmatmul.bf16.vlgmr.msrb.gmra.mxu0 %v11470_v48  ;;  %v7385_v21 = vor.u32 %v9804_v15, %v7382_v16  ;;  %v9852_v22 = vld [vmem:[%s15489_s5 + $0x654] sm:$0xf]  ;;  %v7165_v35 = vor.u32 %v9753_v27, %v7164_v25  ;;  %v7484_v11 = vld [vmem:[%s15489_s5 + $0x598] sm:$0xf] }
 0x1b6   :  { %2552 = vmatpush.bf16.msrb.mxu2 %v6873_v28  ;;  %2576 = vmatpush.bf16.msra.mxu0 %v7513_v32  ;;  %v7574_v24 = vld [vmem:[%s15489_s5 + $0x670] sm:$0xf0]  ;;  %v9721_v18 = vld [vmem:[%s15489_s5 + $0x234] sm:$0xf0] }
 0x1b7   :  { %v9796_v28 = vld [vmem:[%s15489_s5 + $0x494] sm:$0xf]  ;;  %v7577_v32 = vor.u32 %v9852_v22, %v7574_v24  ;;  %v9773_v22 = vld [vmem:[%s15489_s5 + $0x3dc] sm:$0xf]  ;;  %v6812_v25 = vld [vmem:[%s15489_s5 + $0x58] sm:$0xf] }
 0x1b8   :  { %2568 = vmatpush.bf16.msrb.mxu3 %v7065_v39  ;;  %2592 = vmatpush.bf16.msra.mxu1 %v7705_v41  ;;  %v7350_v29 = vld [vmem:[%s15489_s5 + $0x4b0] sm:$0xf0]  ;;  %v9745_v39 = vld [vmem:[%s15489_s5 + $0x2f4] sm:$0xf0]  ;;  %v7262_v24 = vld [vmem:[%s15489_s5 + $0x3f8] sm:$0xf0] }
 0x1b9   :  { %v9844_v33 = vld [vmem:[%s15489_s5 + $0x614] sm:$0xf]  ;;  %v7353_v36 = vor.u32 %v9796_v28, %v7350_v29  ;;  %v7772_v41 = vld [vmem:[%s15489_s5 + $0x7d8] sm:$0xf]  ;;  %v7133_v49 = vor.u32 %v9745_v39, %v7132_v38  ;;  %v7037_v29 = vor.u32 %v9721_v18, %v7036_v14  ;;  %v7265_v31 = vor.u32 %v9773_v22, %v7262_v24  ;;  %v7230_v38 = vld [vmem:[%s15489_s5 + $0x3b8] sm:$0xf0] }
 0x1ba   :  { %2553 = vmatpush.bf16.msrb.mxu2 %v6841_v42  ;;  %2577 = vmatpush.bf16.msra.mxu0 %v7481_v46  ;;  %v7542_v37 = vld [vmem:[%s15489_s5 + $0x630] sm:$0xf0]  ;;  %v9905_v42 = vld [vmem:[%s15489_s5 + $0x7f4] sm:$0xf0]  ;;  %v9901_v22 = vld [vmem:[%s15489_s5 + $0x7dc] sm:$0xf] }
 0x1bb   :  { %v9788_v43 = vld [vmem:[%s15489_s5 + $0x454] sm:$0xf]  ;;  %v9689_v46 = vld [vmem:[%s15489_s5 + $0x134] sm:$0xf0]  ;;  %v7545_v47 = vor.u32 %v9844_v33, %v7542_v37  ;;  %v7773_v50 = vor.u32 %v9905_v42, %v7772_v41  ;;  %v9765_v37 = vld [vmem:[%s15489_s5 + $0x39c] sm:$0xf] }
 0x1bc   :  { %2569 = vmatpush.bf16.msrb.mxu3 %v7033_v55  ;;  %2593 = vmatpush.bf16.msra.mxu1 %v7673_v56  ;;  %v7318_v44 = vld [vmem:[%s15489_s5 + $0x470] sm:$0xf0]  ;;  %v6909_v55 = vor.u32 %v9689_v46, %v6908_v45  ;;  %v7740_v56 = vld [vmem:[%s15489_s5 + $0x798] sm:$0xf]  ;;  %v7006_v45 = vld [vmem:[%s15489_s5 + $0x1f8] sm:$0xf0] }
 0x1bd   :  { %v7321_v54 = vor.u32 %v9788_v43, %v7318_v44  ;;  %v9780_v58 = vld [vmem:[%s15489_s5 + $0x414] sm:$0xf]  ;;  %v7452_v27 = vld [vmem:[%s15489_s5 + $0x558] sm:$0xf]  ;;  %v9709_v44 = vld [vmem:[%s15489_s5 + $0x1dc] sm:$0xf] }
 0x1be   :  { %2554 = vmatpush.bf16.msrb.mxu2 %v6809_v59  ;;  %2578 = vmatpush.bf16.msra.mxu0 %v7449_v61  ;;  %v7286_v60 = vld [vmem:[%s15489_s5 + $0x430] sm:$0xf0]  ;;  %v6876_v59 = vld [vmem:[%s15489_s5 + $0xd8] sm:$0xf]  ;;  %v7774_v24 = vld [vmem:[%s15489_s5 + $0x7f8] sm:$0xf0] }
 0x1bf   :  { %2570 = vmatmul.bf16.vlgmr.msrb.gmra.mxu3 %v11366_v34  ;;  %v9681_v61 = vld [vmem:[%s15489_s5 + $0xf4] sm:$0xf0]  ;;  %v7289_v2 = vor.u32 %v9780_v58, %v7286_v60  ;;  %v7009_v58 = vor.u32 %v9709_v44, %v7006_v45  ;;  %v7198_v60 = vld [vmem:[%s15489_s5 + $0x378] sm:$0xf0] }
 0x1c0   :  { %2618 = vmatpush.bf16.msra.mxu3 %v7261_v57  ;;  %2594 = vmatpush.bf16.msra.mxu1 %v7641_v6  ;;  %v9897_v57 = vld [vmem:[%s15489_s5 + $0x7b4] sm:$0xf0]  ;;  %v6877_v3 = vor.u32 %v9681_v61, %v6876_v59  ;;  %v9677_v45 = vld [vmem:[%s15489_s5 + $0xdc] sm:$0xf] }
 0x1c1   :  { %v7741_v1 = vor.u32 %v9897_v57, %v7740_v56  ;;  %v7708_v6 = vld [vmem:[%s15489_s5 + $0x758] sm:$0xf] }
 0x1c2   :  { %2555 = vmatpush.bf16.msrb.mxu2 %v6777_v8  ;;  %2579 = vmatpush.bf16.msra.mxu0 %v7417_v9  ;;  %v9889_v8 = vld [vmem:[%s15489_s5 + $0x774] sm:$0xf0] }
 0x1c3   :  { %v6844_v9 = vld [vmem:[%s15489_s5 + $0x98] sm:$0xf]  ;;  %v7709_v16 = vor.u32 %v9889_v8, %v7708_v6 }
 0x1c4   :  { %2619 = vmatpush.bf16.msra.mxu3 %v7229_v7  ;;  %2595 = vmatpush.bf16.msra.mxu1 %v7609_v19  ;;  %v7517_v7 = vor.u32 %v9841_v63, %v7516_v62  ;;  %v6845_v17 = vor.u32 %v9673_v10, %v6844_v9  ;;  %v7676_v19 = vld [vmem:[%s15489_s5 + $0x718] sm:$0xf]  ;;  %v9701_v62 = vld [vmem:[%s15489_s5 + $0x19c] sm:$0xf] }
 0x1c5   :  { %2556 = vmatmul.bf16.vlgmr.msrb.gmra.mxu2 %v11388_v52  ;;  %v9825_v28 = vld [vmem:[%s15489_s5 + $0x574] sm:$0xf0]  ;;  %v6974_v63 = vld [vmem:[%s15489_s5 + $0x1b8] sm:$0xf0] }
 0x1c6   :  { %2604 = vmatpush.bf16.msra.mxu2 %v7005_v13  ;;  %2580 = vmatpush.bf16.msra.mxu0 %v7385_v21  ;;  %v7069_v13 = vor.u32 %v9729_v5, %v7068_v4  ;;  %v7485_v21 = vor.u32 %v9833_v12, %v7484_v11  ;;  %v9873_v33 = vld [vmem:[%s15489_s5 + $0x6f4] sm:$0xf0]  ;;  %v9749_v5 = vld [vmem:[%s15489_s5 + $0x31c] sm:$0xf]  ;;  %v6977_v6 = vor.u32 %v9701_v62, %v6974_v63 }
 0x1c7   :  { %v6780_v39 = vld [vmem:[%s15489_s5 + $0x18] sm:$0xf]  ;;  %v9693_v10 = vld [vmem:[%s15489_s5 + $0x15c] sm:$0xf] }
 0x1c8   :  { %2620 = vmatpush.bf16.msra.mxu3 %v7197_v20  ;;  %2596 = vmatpush.bf16.msra.mxu1 %v7577_v32  ;;  %v12271_v15 = vpop.f32.mrf.mxu2  ;;  %v9881_v20 = vld [vmem:[%s15489_s5 + $0x734] sm:$0xf0]  ;;  %v6942_v11 = vld [vmem:[%s15489_s5 + $0x178] sm:$0xf0] }
 0x1c9   :  { %v7677_v30 = vor.u32 %v9881_v20, %v7676_v19  ;;  %v7644_v32 = vld [vmem:[%s15489_s5 + $0x6d8] sm:$0xf]  ;;  %v9741_v19 = vld [vmem:[%s15489_s5 + $0x2dc] sm:$0xf] }
 0x1ca   :  { %2605 = vmatpush.bf16.msra.mxu2 %v6973_v26  ;;  %2581 = vmatpush.bf16.msra.mxu0 %v7353_v36  ;;  %v9665_v26 = vld [vmem:[%s15489_s5 + $0x74] sm:$0xf0]  ;;  %v7453_v36 = vor.u32 %v9825_v28, %v7452_v27  ;;  %v7645_v46 = vor.u32 %v9873_v33, %v7644_v32  ;;  %v7134_v20 = vld [vmem:[%s15489_s5 + $0x2f8] sm:$0xf0] }
 0x1cb   :  { %v9657_v41 = vld [vmem:[%s15489_s5 + $0x34] sm:$0xf0]  ;;  %v9685_v28 = vld [vmem:[%s15489_s5 + $0x11c] sm:$0xf]  ;;  %v7137_v33 = vor.u32 %v9741_v19, %v7134_v20 }
 0x1cc   :  { %2621 = vmatpush.bf16.msra.mxu3 %v7165_v35  ;;  %2597 = vmatpush.bf16.msra.mxu1 %v7545_v47  ;;  %v6813_v35 = vor.u32 %v9665_v26, %v6812_v25  ;;  %v7420_v42 = vld [vmem:[%s15489_s5 + $0x518] sm:$0xf]  ;;  %v7233_v47 = vor.u32 %v9765_v37, %v7230_v38  ;;  %v7102_v37 = vld [vmem:[%s15489_s5 + $0x2b8] sm:$0xf0] }
 0x1cd   :  { %v9817_v43 = vld [vmem:[%s15489_s5 + $0x534] sm:$0xf0]  ;;  %v7710_v63 = vld [vmem:[%s15489_s5 + $0x778] sm:$0xf0] }
 0x1ce   :  { %2606 = vmatpush.bf16.msra.mxu2 %v6941_v40  ;;  %2582 = vmatpush.bf16.msra.mxu0 %v7321_v54  ;;  %v12316_v40 = vpop.f32.mrf.mxu3  ;;  %v7421_v51 = vor.u32 %v9817_v43, %v7420_v42  ;;  %v7612_v53 = vld [vmem:[%s15489_s5 + $0x698] sm:$0xf]  ;;  %v7742_v42 = vld [vmem:[%s15489_s5 + $0x7b8] sm:$0xf0] }
 0x1cf   :  { %2598 = vmatmul.bf16.vlgmr.msra.gmra.mxu1 %v11430_v23  ;;  %v9865_v54 = vld [vmem:[%s15489_s5 + $0x6b4] sm:$0xf0]  ;;  %v9661_v19 = vld [vmem:[%s15489_s5 + $0x5c] sm:$0xf] }
 0x1d0   :  { %2622 = vmatpush.bf16.msra.mxu3 %v7133_v49  ;;  %2646 = vmatpush.bf16.msrb.mxu1 %v7773_v50  ;;  %v12333_v49 = vpop.f32.mrf.mxu1  ;;  %v6781_v50 = vor.u32 %v9657_v41, %v6780_v39  ;;  %v12344_v56 = vpop.f32.mrf.mxu2  ;;  %v7388_v59 = vld [vmem:[%s15489_s5 + $0x4d8] sm:$0xf]  ;;  %v9893_v41 = vld [vmem:[%s15489_s5 + $0x79c] sm:$0xf] }
 0x1d1   :  { %v9809_v61 = vld [vmem:[%s15489_s5 + $0x4f4] sm:$0xf0]  ;;  %v6814_v20 = vld [vmem:[%s15489_s5 + $0x78] sm:$0xf0] }
 0x1d2   :  { %2607 = vmatpush.bf16.msra.mxu2 %v6909_v55  ;;  %2583 = vmatpush.bf16.msra.mxu0 %v7289_v2  ;;  %v9757_v55 = vld [vmem:[%s15489_s5 + $0x35c] sm:$0xf]  ;;  %v12346_v57 = vpop.f32.mrf.mxu0  ;;  %v7389_v2 = vor.u32 %v9809_v61, %v7388_v59  ;;  %v9857_v4 = vld [vmem:[%s15489_s5 + $0x674] sm:$0xf0] }
 0x1d3   :  { %v7356_v8 = vld [vmem:[%s15489_s5 + $0x498] sm:$0xf]  ;;  %v7070_v59 = vld [vmem:[%s15489_s5 + $0x278] sm:$0xf0] }
 0x1d4   :  { %2623 = vmatpush.bf16.msra.mxu3 %v7101_v0  ;;  %2647 = vmatpush.bf16.msrb.mxu1 %v7741_v1  ;;  %v7613_v0 = vor.u32 %v9865_v54, %v7612_v53  ;;  %v7201_v1 = vor.u32 %v9757_v55, %v7198_v60  ;;  %v9801_v9 = vld [vmem:[%s15489_s5 + $0x4b4] sm:$0xf0]  ;;  %v7745_v53 = vor.u32 %v9893_v41, %v7742_v42  ;;  %v9725_v60 = vld [vmem:[%s15489_s5 + $0x25c] sm:$0xf] }
 0x1d5   :  { %2584 = vmatmul.bf16.vlgmr.msra.gmra.mxu0 %v11470_v48  ;;  %v7548_v14 = vld [vmem:[%s15489_s5 + $0x618] sm:$0xf]  ;;  %v9885_v61 = vld [vmem:[%s15489_s5 + $0x75c] sm:$0xf] }
 0x1d6   :  { %2608 = vmatpush.bf16.msra.mxu2 %v6877_v3  ;;  %2632 = vmatpush.bf16.msrb.mxu0 %v7517_v7  ;;  %v7580_v3 = vld [vmem:[%s15489_s5 + $0x658] sm:$0xf]  ;;  %v7166_v7 = vld [vmem:[%s15489_s5 + $0x338] sm:$0xf0]  ;;  %v12388_v12 = vpop.f32.mrf.mxu3 }
 0x1d7   :  { %v9849_v18 = vld [vmem:[%s15489_s5 + $0x634] sm:$0xf0]  ;;  %v9813_v41 = vld [vmem:[%s15489_s5 + $0x51c] sm:$0xf] }
 0x1d8   :  { %2624 = vmatpush.bf16.msra.mxu3 %v7069_v13  ;;  %2648 = vmatpush.bf16.msrb.mxu1 %v7709_v16  ;;  %v7581_v13 = vor.u32 %v9857_v4, %v7580_v3  ;;  %v7169_v16 = vor.u32 %v9749_v5, %v7166_v7  ;;  %v7324_v25 = vld [vmem:[%s15489_s5 + $0x458] sm:$0xf]  ;;  %v12412_v26 = vpop.f32.mrf.mxu1  ;;  %v7549_v32 = vor.u32 %v9849_v18, %v7548_v14  ;;  %v7486_v3 = vld [vmem:[%s15489_s5 + $0x5b8] sm:$0xf0]  ;;  %v10014_v18 = vld [vmem:[%s15491_s7 + $0x360] sm:$0xf0] }
 0x1d9   :  { %v9793_v27 = vld [vmem:[%s15489_s5 + $0x474] sm:$0xf0]  ;;  %v7073_v5 = vor.u32 %v9725_v60, %v7070_v59  ;;  %v7678_v14 = vld [vmem:[%s15489_s5 + $0x738] sm:$0xf0] }
 0x1da   :  { %2609 = vmatpush.bf16.msra.mxu2 %v6845_v17  ;;  %2633 = vmatpush.bf16.msrb.mxu0 %v7485_v21  ;;  %v7357_v17 = vor.u32 %v9801_v9, %v7356_v8  ;;  %v6945_v21 = vor.u32 %v9693_v10, %v6942_v11  ;;  %v7325_v38 = vor.u32 %v9793_v27, %v7324_v25  ;;  %v7292_v43 = vld [vmem:[%s15489_s5 + $0x418] sm:$0xf]  ;;  %v7038_v11 = vld [vmem:[%s15489_s5 + $0x238] sm:$0xf0] }
 0x1db   :  { %v9785_v44 = vld [vmem:[%s15489_s5 + $0x434] sm:$0xf0]  ;;  %v7713_v9 = vor.u32 %v9885_v61, %v7710_v63  ;;  %v7422_v42 = vld [vmem:[%s15489_s5 + $0x538] sm:$0xf0] }
 0x1dc   :  { %2625 = vmatpush.bf16.msra.mxu3 %v7037_v29  ;;  %2649 = vmatpush.bf16.msrb.mxu1 %v7677_v30  ;;  %v6910_v29 = vld [vmem:[%s15489_s5 + $0x138] sm:$0xf0]  ;;  %v12423_v30 = vpop.f32.mrf.mxu2  ;;  %v7293_v55 = vor.u32 %v9785_v44, %v7292_v43  ;;  %v12550_v43 = vld [vmem:[%s15490_s6] sm:$0xff]  ;;  %v7976_v44 = vld [vmem:[%s15491_s7 + $0x188] sm:$0xf] }
 0x1dd   :  { %v6913_v39 = vor.u32 %v9685_v28, %v6910_v29  ;;  %v9869_v28 = vld [vmem:[%s15489_s5 + $0x6dc] sm:$0xf]  ;;  %v8144_v59 = vld [vmem:[%s15491_s7 + $0x2d8] sm:$0xf] }
 0x1de   :  { %2610 = vmatpush.bf16.msra.mxu2 %v6813_v35  ;;  %2634 = vmatpush.bf16.msrb.mxu0 %v7453_v36  ;;  %v7777_v35 = vor.u32 %v9901_v22, %v7774_v24  ;;  %v9733_v36 = vld [vmem:[%s15489_s5 + $0x29c] sm:$0xf]  ;;  %v12457_v54 = vpop.f32.mrf.mxu3 }
 0x1df   :  { %2626 = vmatmul.bf16.vlgmr.msra.gmra.mxu3 %v11366_v34  ;;  %v7454_v22 = vld [vmem:[%s15489_s5 + $0x578] sm:$0xf0] }
 0x1e0   :  { %2674 = vmatpush.bf16.msrb.mxu3 %v7265_v31  ;;  %2650 = vmatpush.bf16.msrb.mxu1 %v7645_v46  ;;  %v12425_v31 = vpop.f32.mrf.mxu0  ;;  %v6878_v46 = vld [vmem:[%s15489_s5 + $0xf8] sm:$0xf0]  ;;  %v12484_v4 = vpop.f32.mrf.mxu1 }
 0x1e1   :  { %v7646_v29 = vld [vmem:[%s15489_s5 + $0x6f8] sm:$0xf0] }
 0x1e2   :  { %2611 = vmatpush.bf16.msra.mxu2 %v6781_v50  ;;  %2635 = vmatpush.bf16.msrb.mxu0 %v7421_v51  ;;  %v7518_v50 = vld [vmem:[%s15489_s5 + $0x5f8] sm:$0xf0]  ;;  %v7105_v51 = vor.u32 %v9733_v36, %v7102_v37  ;;  %v10007_v36 = vld [vmem:[%s15491_s7 + $0x328] sm:$0xf0] }
 0x1e3   :  { %v9653_v37 = vld [vmem:[%s15489_s5 + $0x1c] sm:$0xf] }
 0x1e4   :  { %2675 = vmatpush.bf16.msrb.mxu3 %v7233_v47  ;;  %2651 = vmatpush.bf16.msrb.mxu1 %v7613_v0  ;;  %v9837_v47 = vld [vmem:[%s15489_s5 + $0x5dc] sm:$0xf]  ;;  %v12489_v7 = vpop.f32.mrf.mxu2 }
 0x1e5   :  { %2612 = vmatmul.bf16.vlgmr.msra.gmra.mxu2 %v11388_v52  ;;  %v7521_v62 = vor.u32 %v9837_v47, %v7518_v50  ;;  %v9669_v0 = vld [vmem:[%s15489_s5 + $0x9c] sm:$0xf]  ;;  %v7649_v47 = vor.u32 %v9869_v28, %v7646_v29 }
 0x1e6   :  { %2660 = vmatpush.bf16.msrb.mxu2 %v7009_v58  ;;  %2636 = vmatpush.bf16.msrb.mxu0 %v7389_v2  ;;  %v6881_v58 = vor.u32 %v9677_v45, %v6878_v46  ;;  %v9829_v2 = vld [vmem:[%s15489_s5 + $0x59c] sm:$0xf]  ;;  %v9958_v45 = vld [vmem:[%s15491_s7 + $0x1a0] sm:$0xf0]  ;;  %v973_v46 = vperm.slane %v12550_v43, 1 }
 0x1e7   :  { %v7614_v60 = vld [vmem:[%s15489_s5 + $0x6b8] sm:$0xf0]  ;;  %v7977_v63 = vor.u32 %v9958_v45, %v7976_v44  ;;  %v8648_v44 = vld [vmem:[%s15491_s7 + $0x6c8] sm:$0xf]  ;;  %v10126_v45 = vld [vmem:[%s15491_s7 + $0x6e0] sm:$0xf0] }
 0x1e8   :  { %2676 = vmatpush.bf16.msrb.mxu3 %v7201_v1  ;;  %2652 = vmatpush.bf16.msrb.mxu1 %v7581_v13  ;;  %v6846_v1 = vld [vmem:[%s15489_s5 + $0xb8] sm:$0xf0]  ;;  %v12491_v8 = vpop.f32.mrf.mxu0 }
 0x1e9   :  { %v6849_v10 = vor.u32 %v9669_v0, %v6846_v1  ;;  %v9877_v13 = vld [vmem:[%s15489_s5 + $0x71c] sm:$0xf]  ;;  %v10000_v0 = vld [vmem:[%s15491_s7 + $0x2f0] sm:$0xf0] }
 0x1ea   :  { %2661 = vmatpush.bf16.msrb.mxu2 %v6977_v6  ;;  %2637 = vmatpush.bf16.msrb.mxu0 %v7357_v17  ;;  %v9717_v6 = vld [vmem:[%s15489_s5 + $0x21c] sm:$0xf]  ;;  %v8200_v17 = vld [vmem:[%s15491_s7 + $0x348] sm:$0xf]  ;;  %v7681_v25 = vor.u32 %v9877_v13, %v7678_v14  ;;  %v8116_v13 = vld [vmem:[%s15491_s7 + $0x2a0] sm:$0xf]  ;;  %v2334_v14 = vadd.f32 %v12423_v30, %v973_v46 }
 0x1eb   :  { %v7041_v24 = vor.u32 %v9717_v6, %v7038_v11  ;;  %v8201_v27 = vor.u32 %v10014_v18, %v8200_v17  ;;  %v9805_v1 = vld [vmem:[%s15489_s5 + $0x4dc] sm:$0xf]  ;;  %v8145_v6 = vor.u32 %v10000_v0, %v8144_v59  ;;  %v9944_v30 = vld [vmem:[%s15491_s7 + $0x130] sm:$0xf0] }
 0x1ec   :  { %2677 = vmatpush.bf16.msrb.mxu3 %v7169_v16  ;;  %2653 = vmatpush.bf16.msrb.mxu1 %v7549_v32  ;;  %v7489_v16 = vor.u32 %v9829_v2, %v7486_v3  ;;  %v6817_v32 = vor.u32 %v9661_v19, %v6814_v20  ;;  %v12570_v61 = vpop.f32.mrf.mxu2  ;;  %v7390_v2 = vld [vmem:[%s15489_s5 + $0x4f8] sm:$0xf0]  ;;  %v7948_v3 = vld [vmem:[%s15491_s7 + $0x150] sm:$0xf]  ;;  %v7920_v20 = vld [vmem:[%s15491_s7 + $0x118] sm:$0xf] }
 0x1ed   :  { %v7582_v11 = vld [vmem:[%s15489_s5 + $0x678] sm:$0xf0] }
 0x1ee   :  { %2662 = vmatpush.bf16.msrb.mxu2 %v6945_v21  ;;  %2638 = vmatpush.bf16.msrb.mxu0 %v7325_v38  ;;  %v9821_v21 = vld [vmem:[%s15489_s5 + $0x55c] sm:$0xf]  ;;  %v12536_v38 = vpop.f32.mrf.mxu3 }
 0x1ef   :  { %2654 = vmatmul.bf16.vlgmr.msrb.gmra.mxu1 %v11430_v23  ;;  %v9993_v17 = vld [vmem:[%s15491_s7 + $0x2b8] sm:$0xf0] }
 0x1f0   :  { %2678 = vmatpush.bf16.msrb.mxu3 %v7137_v33  ;;  %2702 = vmatpush.bf16.msra.mxu1 %v7777_v35  ;;  %v7457_v33 = vor.u32 %v9821_v21, %v7454_v22  ;;  %v8172_v35 = vld [vmem:[%s15491_s7 + $0x310] sm:$0xf]  ;;  %v9797_v18 = vld [vmem:[%s15489_s5 + $0x49c] sm:$0xf]  ;;  %v972_v21 = vperm.slane %v12550_v43, 0  ;;  %v2336_v22 = vadd.f32 %v12489_v7, %v973_v46  ;;  %v8117_v28 = vor.u32 %v9993_v17, %v8116_v13 }
 0x1f1   :  { %v8173_v50 = vor.u32 %v10007_v36, %v8172_v35  ;;  %v7358_v19 = vld [vmem:[%s15489_s5 + $0x4b8] sm:$0xf0]  ;;  %v8088_v7 = vld [vmem:[%s15491_s7 + $0x268] sm:$0xf]  ;;  %v7921_v35 = vor.u32 %v9944_v30, %v7920_v20  ;;  %v9923_v30 = vld [vmem:[%s15491_s7 + $0x88] sm:$0xf0] }
 0x1f2   :  { %2663 = vmatpush.bf16.msrb.mxu2 %v6913_v39  ;;  %2639 = vmatpush.bf16.msrb.mxu0 %v7293_v55  ;;  %v6782_v39 = vld [vmem:[%s15489_s5 + $0x38] sm:$0xf0]  ;;  %v7425_v55 = vor.u32 %v9813_v41, %v7422_v42  ;;  %v7361_v29 = vor.u32 %v9797_v18, %v7358_v19  ;;  %v2280_v41 = vadd.f32 %v12344_v56, %v972_v21  ;;  %v8032_v18 = vld [vmem:[%s15491_s7 + $0x1f8] sm:$0xf]  ;;  %v7836_v19 = vld [vmem:[%s15491_s7 + $0x70] sm:$0xf] }
 0x1f3   :  { %v9789_v36 = vld [vmem:[%s15489_s5 + $0x45c] sm:$0xf] }
 0x1f4   :  { %2679 = vmatpush.bf16.msrb.mxu3 %v7105_v51  ;;  %2703 = vmatpush.bf16.msra.mxu1 %v7745_v53  ;;  %v12559_v51 = vpop.f32.mrf.mxu1  ;;  %v6785_v53 = vor.u32 %v9653_v37, %v6782_v39  ;;  %v7326_v37 = vld [vmem:[%s15489_s5 + $0x478] sm:$0xf0]  ;;  %v7892_v39 = vld [vmem:[%s15491_s7 + $0xe0] sm:$0xf] }
 0x1f5   :  { %2640 = vmatmul.bf16.vlgmr.msrb.gmra.mxu0 %v11470_v48  ;;  %v9781_v0 = vld [vmem:[%s15489_s5 + $0x41c] sm:$0xf] }
 0x1f6   :  { %2664 = vmatpush.bf16.msrb.mxu2 %v6881_v58  ;;  %2688 = vmatpush.bf16.msra.mxu0 %v7521_v62  ;;  %v9861_v58 = vld [vmem:[%s15489_s5 + $0x69c] sm:$0xf]  ;;  %v12572_v62 = vpop.f32.mrf.mxu0 }
 0x1f8   :  { %2680 = vmatpush.bf16.msrb.mxu3 %v7073_v5  ;;  %2704 = vmatpush.bf16.msra.mxu1 %v7713_v9  ;;  %v7617_v5 = vor.u32 %v9861_v58, %v7614_v60  ;;  %v7393_v9 = vor.u32 %v9805_v1, %v7390_v2  ;;  %v7329_v58 = vor.u32 %v9789_v36, %v7326_v37  ;;  %v8060_v60 = vld [vmem:[%s15491_s7 + $0x230] sm:$0xf]  ;;  %v7294_v1 = vld [vmem:[%s15489_s5 + $0x438] sm:$0xf0]  ;;  %v7864_v2 = vld [vmem:[%s15491_s7 + $0xa8] sm:$0xf] }
 0x1f9   :  { %v7297_v13 = vor.u32 %v9781_v0, %v7294_v1  ;;  %v7837_v37 = vor.u32 %v9923_v30, %v7836_v19  ;;  %v7780_v1 = vld [vmem:[%s15491_s7] sm:$0xf] }
 0x1fa   :  { %2665 = vmatpush.bf16.msrb.mxu2 %v6849_v10  ;;  %2689 = vmatpush.bf16.msra.mxu0 %v7489_v16  ;;  %v9853_v10 = vld [vmem:[%s15489_s5 + $0x65c] sm:$0xf] }
 0x1fc   :  { %2681 = vmatpush.bf16.msrb.mxu3 %v7041_v24  ;;  %2705 = vmatpush.bf16.msra.mxu1 %v7681_v25  ;;  %v12617_v24 = vpop.f32.mrf.mxu3  ;;  %v7585_v25 = vor.u32 %v9853_v10, %v7582_v11  ;;  %v12643_v42 = vpop.f32.mrf.mxu1 }
 0x1fe   :  { %2666 = vmatpush.bf16.msrb.mxu2 %v6817_v32  ;;  %2690 = vmatpush.bf16.msra.mxu0 %v7457_v33  ;;  %v7550_v32 = vld [vmem:[%s15489_s5 + $0x638] sm:$0xf0]  ;;  %v2348_v33 = vadd.f32 %v12457_v54, %v2334_v14  ;;  %v12658_v56 = vpop.f32.mrf.mxu0 }
 0x1ff   :  { %2682 = vmatmul.bf16.vlgmr.msrb.gmra.mxu3 %v11366_v34  ;;  %v9951_v34 = vld [vmem:[%s15491_s7 + $0x168] sm:$0xf0]  ;;  %v9937_v54 = vld [vmem:[%s15491_s7 + $0xf8] sm:$0xf0] }
 0x200   :  { %5618 = vmatpush.bf16.msra.mxu3 %v8201_v27  ;;  %2706 = vmatpush.bf16.msra.mxu1 %v7649_v47  ;;  %v7949_v16 = vor.u32 %v9951_v34, %v7948_v3  ;;  %v9845_v27 = vld [vmem:[%s15489_s5 + $0x61c] sm:$0xf]  ;;  %v2362_v46 = vadd.f32 %v12491_v8, %v2348_v33  ;;  %v2350_v47 = vadd.f32 %v12536_v38, %v2336_v22  ;;  %v9979_v8 = vld [vmem:[%s15491_s7 + $0x248] sm:$0xf0]  ;;  %v7808_v33 = vld [vmem:[%s15491_s7 + $0x38] sm:$0xf] }
 0x201   :  { %v7893_v59 = vor.u32 %v9937_v54, %v7892_v39  ;;  %v2278_v3 = vadd.f32 %v12271_v15, %v972_v21  ;;  %v2294_v34 = vadd.f32 %v12388_v12, %v2280_v41  ;;  %v8620_v15 = vld [vmem:[%s15491_s7 + $0x690] sm:$0xf]  ;;  %v10119_v12 = vld [vmem:[%s15491_s7 + $0x6a8] sm:$0xf0]  ;;  %v8061_v11 = vor.u32 %v9979_v8, %v8060_v60  ;;  %v9916_v41 = vld [vmem:[%s15491_s7 + $0x50] sm:$0xf0] }
 0x202   :  { %2667 = vmatpush.bf16.msrb.mxu2 %v6785_v53  ;;  %2691 = vmatpush.bf16.msra.mxu0 %v7425_v55  ;;  %v7553_v53 = vor.u32 %v9845_v27, %v7550_v32  ;;  %v2364_v38 = vadd.f32 %v12572_v62, %v2350_v47  ;;  %v9930_v62 = vld [vmem:[%s15491_s7 + $0xc0] sm:$0xf0]  ;;  %v8621_v20 = vor.u32 %v10119_v12, %v8620_v15  ;;  %v8396_v21 = vld [vmem:[%s15491_s7 + $0x4d0] sm:$0xf]  ;;  %v10063_v22 = vld [vmem:[%s15491_s7 + $0x4e8] sm:$0xf0] }
 0x203   :  { %v2308_v10 = vadd.f32 %v12425_v31, %v2294_v34  ;;  %v9972_v31 = vld [vmem:[%s15491_s7 + $0x210] sm:$0xf0]  ;;  %v8397_v39 = vor.u32 %v10063_v22, %v8396_v21  ;;  %v8368_v54 = vld [vmem:[%s15491_s7 + $0x498] sm:$0xf]  ;;  %v10105_v47 = vld [vmem:[%s15491_s7 + $0x638] sm:$0xf0] }
 0x204   :  { %5619 = vmatpush.bf16.msra.mxu3 %v8173_v50  ;;  %2707 = vmatpush.bf16.msra.mxu1 %v7617_v5  ;;  %v12656_v50 = vpop.f32.mrf.mxu2  ;;  %v8424_v5 = vld [vmem:[%s15491_s7 + $0x508] sm:$0xf]  ;;  %v2378_v14 = vadd.f32 %v12559_v51, %v2364_v38  ;;  %v2292_v51 = vadd.f32 %v12316_v40, %v2278_v3  ;;  %v10112_v40 = vld [vmem:[%s15491_s7 + $0x670] sm:$0xf0]  ;;  %v8033_v32 = vor.u32 %v9972_v31, %v8032_v18  ;;  %v974_v60 = vperm.slane %v12550_v43, 2 }
 0x205   :  { %2668 = vmatmul.bf16.vlgmr.msrb.gmra.mxu2 %v11388_v52  ;;  %v9986_v52 = vld [vmem:[%s15491_s7 + $0x280] sm:$0xf0]  ;;  %v8340_v34 = vld [vmem:[%s15491_s7 + $0x460] sm:$0xf] }
 0x206   :  { %5604 = vmatpush.bf16.msra.mxu2 %v7977_v63  ;;  %2692 = vmatpush.bf16.msra.mxu0 %v7393_v9  ;;  %v8089_v55 = vor.u32 %v9986_v52, %v8088_v7  ;;  %v8649_v63 = vor.u32 %v10126_v45, %v8648_v44  ;;  %v12688_v9 = vadd.f32 %v12484_v4, %v2362_v46  ;;  %v8004_v7 = vld [vmem:[%s15491_s7 + $0x1c0] sm:$0xf]  ;;  %v9965_v52 = vld [vmem:[%s15491_s7 + $0x1d8] sm:$0xf0]  ;;  %v12742_v36 = vpop.f32.mrf.mxu0  ;;  %vm2725_vm12 = vcmp.ge.f32.partialorder %v2378_v14, 0.0 }
 0x207   :  { %v7865_v4 = vor.u32 %v9930_v62, %v7864_v2  ;;  %v975_v44 = vperm.slane %v12550_v43, 3  ;;  %v10056_v45 = vld [vmem:[%s15491_s7 + $0x4b0] sm:$0xf0]  ;;  %v8564_v46 = vld [vmem:[%s15491_s7 + $0x620] sm:$0xf]  ;;  %v2392_v18 = vadd.f32 %v12656_v50, %v974_v60 }
 0x208   :  { %5620 = vmatpush.bf16.msra.mxu3 %v8145_v6  ;;  %2708 = vmatpush.bf16.msra.mxu1 %v7585_v25  ;;  %v10070_v6 = vld [vmem:[%s15491_s7 + $0x520] sm:$0xf0]  ;;  %v2733_v25 = vmul.f32 0.2, %v12688_v9  ;;  %vm2717_vm13 = vcmp.ge.f32.partialorder %v12688_v9, 0.0  ;;  %v8369_v0 = vor.u32 %v10056_v45, %v8368_v54  ;;  %v8565_v3 = vor.u32 %v10105_v47, %v8564_v46 }
 0x209   :  { %v8425_v17 = vor.u32 %v10070_v6, %v8424_v5  ;;  %v10049_v62 = vld [vmem:[%s15491_s7 + $0x478] sm:$0xf0]  ;;  %v8872_v5 = vld [vmem:[%s15491_s7 + $0x888] sm:$0xf]  ;;  %v10182_v12 = vld [vmem:[%s15491_s7 + $0x8a0] sm:$0xf0] }
 0x20a   :  { %5605 = vmatpush.bf16.msra.mxu2 %v7949_v16  ;;  %2693 = vmatpush.bf16.msra.mxu0 %v7361_v29  ;;  %v12698_v16 = vpop.f32.mrf.mxu3  ;;  %v12728_v29 = vpop.f32.mrf.mxu1  ;;  %v2749_v15 = vsel %vm2717_vm13, %v12688_v9, %v2733_v25  ;;  %v9068_v9 = vld [vmem:[%s15491_s7 + $0xa10] sm:$0xf]  ;;  %v8873_v21 = vor.u32 %v10182_v12, %v8872_v5  ;;  %v8312_v25 = vld [vmem:[%s15491_s7 + $0x428] sm:$0xf]  ;;  %v10035_v46 = vld [vmem:[%s15491_s7 + $0x408] sm:$0xf0] }
 0x20b   :  { %v8844_v50 = vld [vmem:[%s15491_s7 + $0x850] sm:$0xf]  ;;  %v8452_v12 = vld [vmem:[%s15491_s7 + $0x540] sm:$0xf] }
 0x20c   :  { %5621 = vmatpush.bf16.msra.mxu3 %v8117_v28  ;;  %2709 = vmatpush.bf16.msra.mxu1 %v7553_v53  ;;  %v2445_v27 = vpop.f32.mrf.mxu2  ;;  %v2306_v28 = vadd.f32 %v12346_v57, %v2292_v51  ;;  %v2741_v57 = vmul.f32 0.2, %v2378_v14  ;;  %v9096_v53 = vld [vmem:[%s15491_s7 + $0xa48] sm:$0xf]  ;;  %v8284_v45 = vld [vmem:[%s15491_s7 + $0x3f0] sm:$0xf] }
 0x20d   :  { %v2446_v2 = vadd.f32 %v2445_v27, %v975_v44  ;;  %v10042_v27 = vld [vmem:[%s15491_s7 + $0x440] sm:$0xf0] }
 0x20e   :  { %5606 = vmatpush.bf16.msra.mxu2 %v7921_v35  ;;  %2694 = vmatpush.bf16.msra.mxu0 %v7329_v58  ;;  %v12740_v35 = vadd.f32 %v12412_v26, %v2308_v10  ;;  %v2320_v58 = vadd.f32 %v12333_v49, %v2306_v28  ;;  %v2757_v38 = vsel %vm2725_vm12, %v2378_v14, %v2741_v57  ;;  %v9909_v49 = vld [vmem:[%s15491_s7 + $0x18] sm:$0xf0]  ;;  %v8536_v10 = vld [vmem:[%s15491_s7 + $0x5e8] sm:$0xf]  ;;  %v10175_v28 = vld [vmem:[%s15491_s7 + $0x868] sm:$0xf0] }
 0x20f   :  { %2710 = vmatmul.bf16.vlgmr.msra.gmra.mxu1 %v11430_v23  ;;  %v8592_v23 = vld [vmem:[%s15491_s7 + $0x658] sm:$0xf]  ;;  %v7781_v51 = vor.u32 %v9909_v49, %v7780_v1  ;;  %v10224_v57 = vld [vmem:[%s15491_s7 + $0x9f0] sm:$0xf0]  ;;  %v8285_v1 = vor.u32 %v10035_v46, %v8284_v45  ;;  %v9292_v45 = vld [vmem:[%s15491_s7 + $0xbd0] sm:$0xf] }
 0x210   :  { %5622 = vmatpush.bf16.msra.mxu3 %v8089_v55  ;;  %5646 = vmatpush.bf16.msrb.mxu1 %v8649_v63  ;;  %v8593_v26 = vor.u32 %v10112_v40, %v8592_v23  ;;  %v10238_v55 = vld [vmem:[%s15491_s7 + $0xa60] sm:$0xf0]  ;;  %v2740_v8 = vmul.f32 0.2, %v12740_v35  ;;  %v7809_v63 = vor.u32 %v9916_v41, %v7808_v33  ;;  %vm2716_vm14 = vcmp.ge.f32.partialorder %v2320_v58, 0.0 }
 0x211   :  { %v9097_v6 = vor.u32 %v10238_v55, %v9096_v53  ;;  %vm2724_vm15 = vcmp.ge.f32.partialorder %v12740_v35, 0.0  ;;  %v2390_v40 = vadd.f32 %v12570_v61, %v974_v60  ;;  %v9040_v61 = vld [vmem:[%s15491_s7 + $0x9d8] sm:$0xf]  ;;  %v8313_v41 = vor.u32 %v10042_v27, %v8312_v25  ;;  %v10287_v46 = vld [vmem:[%s15491_s7 + $0xbe8] sm:$0xf0] }
 0x212   :  { %5607 = vmatpush.bf16.msra.mxu2 %v7893_v59  ;;  %2695 = vmatpush.bf16.msra.mxu0 %v7297_v13  ;;  %v2459_v59 = vpop.f32.mrf.mxu3  ;;  %v12802_v13 = vpack.c.bf16 %v2757_v38, %v2749_v15  ;;  %v2487_v14 = vpop.f32.mrf.mxu1  ;;  %v2756_v23 = vsel %vm2724_vm15, %v12740_v35, %v2740_v8  ;;  %v8480_v60 = vld [vmem:[%s15491_s7 + $0x578] sm:$0xf]  ;;  %v9041_v8 = vor.u32 %v10224_v57, %v9040_v61  ;;  %v10161_v15 = vld [vmem:[%s15491_s7 + $0x7f8] sm:$0xf0] }
 0x213   :  { %v2473_v19 = vpop.f32.mrf.mxu0  ;;  %v2460_v30 = vadd.f32 %v2459_v59, %v2446_v2  ;;  %v2404_v47 = vadd.f32 %v12617_v24, %v2390_v40  ;;  %v10217_v59 = vld [vmem:[%s15491_s7 + $0x9b8] sm:$0xf0]  ;;  %v10203_v40 = vld [vmem:[%s15491_s7 + $0x948] sm:$0xf0] }
 0x214   :  { %5623 = vmatpush.bf16.msra.mxu3 %v8061_v11  ;;  %5647 = vmatpush.bf16.msrb.mxu1 %v8621_v20  ;;  %v10098_v11 = vld [vmem:[%s15491_s7 + $0x600] sm:$0xf0]  ;;  %v2447_v31 = vpop.f32.mrf.mxu2  ;;  %v8341_v20 = vor.u32 %v10049_v62, %v8340_v34  ;;  %v8256_v34 = vld [vmem:[%s15491_s7 + $0x3b8] sm:$0xf]  ;;  %v10028_v62 = vld [vmem:[%s15491_s7 + $0x3d0] sm:$0xf0] }
 0x215   :  { %2696 = vmatmul.bf16.vlgmr.msra.gmra.mxu0 %v11470_v48  ;;  %v8005_v48 = vor.u32 %v9965_v52, %v8004_v7  ;;  %v8537_v22 = vor.u32 %v10098_v11, %v8536_v10  ;;  %v10091_v7 = vld [vmem:[%s15491_s7 + $0x5c8] sm:$0xf0]  ;;  %v2448_v33 = vadd.f32 %v2447_v31, %v975_v44  ;;  %v2474_v35 = vadd.f32 %v2473_v19, %v2460_v30  ;;  %v10077_v10 = vld [vmem:[%s15491_s7 + $0x558] sm:$0xf0]  ;;  %v8228_v31 = vld [vmem:[%s15491_s7 + $0x380] sm:$0xf] }
 0x216   :  { %5608 = vmatpush.bf16.msra.mxu2 %v7865_v4  ;;  %5632 = vmatpush.bf16.msrb.mxu0 %v8425_v17  ;;  %v10231_v4 = vld [vmem:[%s15491_s7 + $0xa28] sm:$0xf0]  ;;  %v2732_v17 = vmul.f32 0.2, %v2320_v58  ;;  %v8845_v44 = vor.u32 %v10175_v28, %v8844_v50  ;;  %v10021_v30 = vld [vmem:[%s15491_s7 + $0x398] sm:$0xf0] }
 0x217   :  { %v9069_v52 = vor.u32 %v10231_v4, %v9068_v9  ;;  %v2488_v38 = vadd.f32 %v2487_v14, %v2474_v35  ;;  %v10210_v4 = vld [vmem:[%s15491_s7 + $0x980] sm:$0xf0] }
 0x218   :  { %5624 = vmatpush.bf16.msra.mxu3 %v8033_v32  ;;  %5648 = vmatpush.bf16.msrb.mxu1 %v8593_v26  ;;  %v8508_v32 = vld [vmem:[%s15491_s7 + $0x5b0] sm:$0xf] }
 0x219   :  { %v8509_v26 = vor.u32 %v10091_v7, %v8508_v32  ;;  %v2735_v14 = vmul.f32 0.2, %v2488_v38  ;;  %vm2719_vm0 = vcmp.ge.f32.partialorder %v2488_v38, 0.0  ;;  %v8229_v7 = vor.u32 %v10021_v30, %v8228_v31  ;;  %v7950_v30 = vld [vmem:[%s15491_s7 + $0x16c] sm:$0xf0] }
 0x21a   :  { %5609 = vmatpush.bf16.msra.mxu2 %v7837_v37  ;;  %5633 = vmatpush.bf16.msrb.mxu0 %v8397_v39  ;;  %v2748_v37 = vsel %vm2716_vm14, %v2320_v58, %v2732_v17  ;;  %v2406_v39 = vadd.f32 %v12698_v16, %v2392_v18  ;;  %v8816_v16 = vld [vmem:[%s15491_s7 + $0x818] sm:$0xf]  ;;  %v2461_v55 = vpop.f32.mrf.mxu3  ;;  %v10168_v58 = vld [vmem:[%s15491_s7 + $0x830] sm:$0xf0]  ;;  %v8257_v18 = vor.u32 %v10028_v62, %v8256_v34  ;;  %v8676_v34 = vld [vmem:[%s15491_s7 + $0x700] sm:$0xf] }
 0x21b   :  { %v12844_v54 = vpack.c.bf16 %v2756_v23, %v2748_v37  ;;  %v2462_v24 = vadd.f32 %v2461_v55, %v2448_v33  ;;  %v8817_v2 = vor.u32 %v10168_v58, %v8816_v16  ;;  %v2751_v27 = vsel %vm2719_vm0, %v2488_v38, %v2735_v14  ;;  %v8956_v23 = vld [vmem:[%s15491_s7 + $0x930] sm:$0xf]  ;;  %v10294_v33 = vld [vmem:[%s15491_s7 + $0xc20] sm:$0xf0]  ;;  %v8704_v58 = vld [vmem:[%s15491_s7 + $0x738] sm:$0xf] }
 0x21c   :  { %5625 = vmatpush.bf16.msra.mxu3 %v8005_v48  ;;  %5649 = vmatpush.bf16.msrb.mxu1 %v8565_v3  ;;  %v2420_v53 = vadd.f32 %v12742_v36, %v2406_v39  ;;  %v10084_v48 = vld [vmem:[%s15491_s7 + $0x590] sm:$0xf0]  ;;  %v9012_v36 = vld [vmem:[%s15491_s7 + $0x9a0] sm:$0xf]  ;;  %v8732_v37 = vld [vmem:[%s15491_s7 + $0x770] sm:$0xf] }
 0x21d   :  { %v8481_v3 = vor.u32 %v10084_v48, %v8480_v60  ;;  %v9013_v11 = vor.u32 %v10217_v59, %v9012_v36  ;;  %v10147_v39 = vld [vmem:[%s15491_s7 + $0x788] sm:$0xf0]  ;;  %v9293_v60 = vor.u32 %v10287_v46, %v9292_v45  ;;  %v10140_v48 = vld [vmem:[%s15491_s7 + $0x750] sm:$0xf0]  ;;  %v9264_v38 = vld [vmem:[%s15491_s7 + $0xb98] sm:$0xf] }
 0x21e   :  { %5610 = vmatpush.bf16.msra.mxu2 %v7809_v63  ;;  %5634 = vmatpush.bf16.msrb.mxu0 %v8369_v0  ;;  %v2418_v63 = vadd.f32 %v12658_v56, %v2404_v47  ;;  %v2475_v0 = vpop.f32.mrf.mxu0  ;;  %v8788_v56 = vld [vmem:[%s15491_s7 + $0x7e0] sm:$0xf]  ;;  %v2434_v5 = vadd.f32 %v12728_v29, %v2420_v53  ;;  %v8984_v29 = vld [vmem:[%s15491_s7 + $0x968] sm:$0xf]  ;;  %v8733_v55 = vor.u32 %v10147_v39, %v8732_v37  ;;  %v976_v36 = vperm.slane %v12550_v43, 4 }
 0x21f   :  { %5626 = vmatmul.bf16.vlgmr.msra.gmra.mxu3 %v12802_v13  ;;  %v2476_v49 = vadd.f32 %v2475_v0, %v2462_v24  ;;  %v8985_v25 = vor.u32 %v10210_v4, %v8984_v29  ;;  %v10280_v24 = vld [vmem:[%s15491_s7 + $0xbb0] sm:$0xf0]  ;;  %v8900_v59 = vld [vmem:[%s15491_s7 + $0x8c0] sm:$0xf]  ;;  %v10011_v0 = vld [vmem:[%s15491_s7 + $0x34c] sm:$0xf] }
 0x220   :  { %5674 = vmatpush.bf16.msrb.mxu3 %v9097_v6  ;;  %5650 = vmatpush.bf16.msrb.mxu1 %v8537_v22  ;;  %v2489_v6 = vpop.f32.mrf.mxu1  ;;  %v2432_v17 = vadd.f32 %v12643_v42, %v2418_v63  ;;  %v8760_v42 = vld [vmem:[%s15491_s7 + $0x7a8] sm:$0xf]  ;;  %v10154_v22 = vld [vmem:[%s15491_s7 + $0x7c0] sm:$0xf0]  ;;  %vm2726_vm2 = vcmp.ge.f32.partialorder %v2434_v5, 0.0 }
 0x221   :  { %v2490_v9 = vadd.f32 %v2489_v6, %v2476_v49  ;;  %v8761_v35 = vor.u32 %v10154_v22, %v8760_v42  ;;  %v10189_v63 = vld [vmem:[%s15491_s7 + $0x8d8] sm:$0xf0]  ;;  %v8705_v49 = vor.u32 %v10140_v48, %v8704_v58  ;;  %v9955_v6 = vld [vmem:[%s15491_s7 + $0x18c] sm:$0xf]  ;;  %v9236_v14 = vld [vmem:[%s15491_s7 + $0xb60] sm:$0xf] }
 0x222   :  { %5611 = vmatpush.bf16.msra.mxu2 %v7781_v51  ;;  %5635 = vmatpush.bf16.msrb.mxu0 %v8341_v20  ;;  %v8789_v51 = vor.u32 %v10161_v15, %v8788_v56  ;;  %v8453_v20 = vor.u32 %v10077_v10, %v8452_v12  ;;  %v2734_v28 = vmul.f32 0.2, %v2432_v17  ;;  %vm2718_vm3 = vcmp.ge.f32.partialorder %v2432_v17, 0.0  ;;  %v10133_v62 = vld [vmem:[%s15491_s7 + $0x718] sm:$0xf0] }
 0x223   :  { %vm2727_vm1 = vcmp.ge.f32.partialorder %v2490_v9, 0.0  ;;  %v2743_v19 = vmul.f32 0.2, %v2490_v9  ;;  %v8901_v56 = vor.u32 %v10189_v63, %v8900_v59  ;;  %v7978_v15 = vld [vmem:[%s15491_s7 + $0x1a4] sm:$0xf0]  ;;  %v8677_v4 = vor.u32 %v10133_v62, %v8676_v34 }
 0x224   :  { %5675 = vmatpush.bf16.msrb.mxu3 %v9069_v52  ;;  %5651 = vmatpush.bf16.msrb.mxu1 %v8509_v26  ;;  %v9320_v52 = vld [vmem:[%s15491_s7 + $0xc08] sm:$0xf]  ;;  %v10196_v26 = vld [vmem:[%s15491_s7 + $0x910] sm:$0xf0]  ;;  %v2750_v16 = vsel %vm2718_vm3, %v2432_v17, %v2734_v28  ;;  %v9997_v42 = vld [vmem:[%s15491_s7 + $0x2dc] sm:$0xf] }
 0x225   :  { %5612 = vmatmul.bf16.vlgmr.msra.gmra.mxu2 %v12844_v54  ;;  %v2759_v50 = vsel %vm2727_vm1, %v2490_v9, %v2743_v19  ;;  %v9321_v61 = vor.u32 %v10294_v33, %v9320_v52  ;;  %v10004_v10 = vld [vmem:[%s15491_s7 + $0x314] sm:$0xf]  ;;  %v10273_v9 = vld [vmem:[%s15491_s7 + $0xb78] sm:$0xf0]  ;;  %v7981_v19 = vor.u32 %v9955_v6, %v7978_v15  ;;  %v8146_v22 = vld [vmem:[%s15491_s7 + $0x2f4] sm:$0xf0] }
 0x226   :  { %5660 = vmatpush.bf16.msrb.mxu2 %v8873_v21  ;;  %5636 = vmatpush.bf16.msrb.mxu0 %v8313_v41  ;;  %v2742_v21 = vmul.f32 0.2, %v2434_v5  ;;  %v12919_v32 = vpack.c.bf16 %v2759_v50, %v2751_v27  ;;  %v8957_v41 = vor.u32 %v10203_v40, %v8956_v23  ;;  %v9237_v17 = vor.u32 %v10273_v9, %v9236_v14  ;;  %v10266_v27 = vld [vmem:[%s15491_s7 + $0xb40] sm:$0xf0]  ;;  %v7922_v52 = vld [vmem:[%s15491_s7 + $0x134] sm:$0xf0] }
 0x227   :  { %v8149_v33 = vor.u32 %v9997_v42, %v8146_v22  ;;  %v9180_v37 = vld [vmem:[%s15491_s7 + $0xaf0] sm:$0xf]  ;;  %v10259_v39 = vld [vmem:[%s15491_s7 + $0xb08] sm:$0xf0]  ;;  %v9976_v34 = vld [vmem:[%s15491_s7 + $0x234] sm:$0xf] }
 0x228   :  { %5676 = vmatpush.bf16.msrb.mxu3 %v9041_v8  ;;  %5652 = vmatpush.bf16.msrb.mxu1 %v8481_v3  ;;  %v2758_v57 = vsel %vm2726_vm2, %v2434_v5, %v2742_v21  ;;  %v2501_v47 = vpop.f32.mrf.mxu2  ;;  %v2515_v3 = vpop.f32.mrf.mxu3  ;;  %v8062_v62 = vld [vmem:[%s15491_s7 + $0x24c] sm:$0xf0]  ;;  %v10343_v42 = vld [vmem:[%s15491_s7 + $0xda8] sm:$0xf0]  ;;  %v10060_v22 = vld [vmem:[%s15491_s7 + $0x4d4] sm:$0xf] }
 0x229   :  { %v12947_v53 = vpack.c.bf16 %v2758_v57, %v2750_v16  ;;  %v2502_v5 = vadd.f32 %v2501_v47, %v976_v36  ;;  %v8118_v57 = vld [vmem:[%s15491_s7 + $0x2bc] sm:$0xf0]  ;;  %v9934_v47 = vld [vmem:[%s15491_s7 + $0xe4] sm:$0xf] }
 0x22a   :  { %5661 = vmatpush.bf16.msrb.mxu2 %v8845_v44  ;;  %5637 = vmatpush.bf16.msrb.mxu0 %v8285_v1  ;;  %v8928_v44 = vld [vmem:[%s15491_s7 + $0x8f8] sm:$0xf]  ;;  %v8202_v1 = vld [vmem:[%s15491_s7 + $0x364] sm:$0xf0] }
 0x22b   :  { %v8929_v8 = vor.u32 %v10196_v26, %v8928_v44  ;;  %v8205_v12 = vor.u32 %v10011_v0, %v8202_v1  ;;  %v9181_v26 = vor.u32 %v10259_v39, %v9180_v37  ;;  %v9927_v1 = vld [vmem:[%s15491_s7 + $0xac] sm:$0xf]  ;;  %v10053_v37 = vld [vmem:[%s15491_s7 + $0x49c] sm:$0xf]  ;;  %v977_v39 = vperm.slane %v12550_v43, 5 }
 0x22c   :  { %5677 = vmatpush.bf16.msrb.mxu3 %v9013_v11  ;;  %5653 = vmatpush.bf16.msrb.mxu1 %v8453_v20  ;;  %v8174_v11 = vld [vmem:[%s15491_s7 + $0x32c] sm:$0xf0]  ;;  %v2543_v29 = vpop.f32.mrf.mxu1  ;;  %v9948_v20 = vld [vmem:[%s15491_s7 + $0x154] sm:$0xf] }
 0x22d   :  { %v8177_v21 = vor.u32 %v10004_v10, %v8174_v11  ;;  %v7953_v28 = vor.u32 %v9948_v20, %v7950_v30  ;;  %v9544_v10 = vld [vmem:[%s15491_s7 + $0xdc8] sm:$0xf]  ;;  %v10350_v11 = vld [vmem:[%s15491_s7 + $0xde0] sm:$0xf0]  ;;  %v9969_v20 = vld [vmem:[%s15491_s7 + $0x1fc] sm:$0xf] }
 0x22e   :  { %5662 = vmatpush.bf16.msrb.mxu2 %v8817_v2  ;;  %5638 = vmatpush.bf16.msrb.mxu0 %v8257_v18  ;;  %v9265_v2 = vor.u32 %v10280_v24, %v9264_v38  ;;  %v9152_v38 = vld [vmem:[%s15491_s7 + $0xab8] sm:$0xf]  ;;  %v10252_v24 = vld [vmem:[%s15491_s7 + $0xad0] sm:$0xf0] }
 0x22f   :  { %5654 = vmatmul.bf16.vlgmr.msrb.gmra.mxu1 %v12919_v32  ;;  %v9153_v63 = vor.u32 %v10252_v24, %v9152_v38  ;;  %v8034_v30 = vld [vmem:[%s15491_s7 + $0x214] sm:$0xf0]  ;;  %v10046_v38 = vld [vmem:[%s15491_s7 + $0x464] sm:$0xf] }
 0x230   :  { %5678 = vmatpush.bf16.msrb.mxu3 %v8985_v25  ;;  %v2503_v18 = vpop.f32.mrf.mxu2  ;;  %v9208_v25 = vld [vmem:[%s15491_s7 + $0xb28] sm:$0xf] }
 0x231   :  { %v2504_v50 = vadd.f32 %v2503_v18, %v976_v36  ;;  %v9209_v40 = vor.u32 %v10266_v27, %v9208_v25  ;;  %v9920_v18 = vld [vmem:[%s15491_s7 + $0x74] sm:$0xf] }
 0x232   :  { %5663 = vmatpush.bf16.msrb.mxu2 %v8789_v51  ;;  %5639 = vmatpush.bf16.msrb.mxu0 %v8229_v7  ;;  %v2529_v31 = vpop.f32.mrf.mxu0  ;;  %v2516_v51 = vadd.f32 %v2515_v3, %v2502_v5  ;;  %v9941_v7 = vld [vmem:[%s15491_s7 + $0x11c] sm:$0xf] }
 0x233   :  { %v7925_v46 = vor.u32 %v9941_v7, %v7922_v52  ;;  %v10245_v5 = vld [vmem:[%s15491_s7 + $0xa98] sm:$0xf0]  ;;  %v8037_v7 = vor.u32 %v9969_v20, %v8034_v30  ;;  %v9962_v52 = vld [vmem:[%s15491_s7 + $0x1c4] sm:$0xf]  ;;  %v10032_v20 = vld [vmem:[%s15491_s7 + $0x3f4] sm:$0xf] }
 0x234   :  { %5679 = vmatpush.bf16.msrb.mxu3 %v8957_v41  ;;  %v2530_v23 = vadd.f32 %v2529_v31, %v2516_v51  ;;  %v2545_v48 = vpop.f32.mrf.mxu1  ;;  %v7838_v31 = vld [vmem:[%s15491_s7 + $0x8c] sm:$0xf0] }
 0x235   :  { %5640 = vmatmul.bf16.vlgmr.msrb.gmra.mxu0 %v12947_v53  ;;  %v7841_v27 = vor.u32 %v9920_v18, %v7838_v31  ;;  %v9404_v18 = vld [vmem:[%s15491_s7 + $0xcb0] sm:$0xf] }
 0x236   :  { %5664 = vmatpush.bf16.msrb.mxu2 %v8761_v35  ;;  %5688 = vmatpush.bf16.msra.mxu0 %v9321_v61  ;;  %v9990_v35 = vld [vmem:[%s15491_s7 + $0x2a4] sm:$0xf]  ;;  %v2517_v61 = vpop.f32.mrf.mxu3  ;;  %v2544_v41 = vadd.f32 %v2543_v29, %v2530_v23  ;;  %v9545_v29 = vor.u32 %v10350_v11, %v9544_v10  ;;  %v8286_v30 = vld [vmem:[%s15491_s7 + $0x40c] sm:$0xf0] }
 0x237   :  { %v2518_v44 = vadd.f32 %v2517_v61, %v2504_v50  ;;  %v8121_v58 = vor.u32 %v9990_v35, %v8118_v57  ;;  %v9913_v50 = vld [vmem:[%s15491_s7 + $0x3c] sm:$0xf]  ;;  %v9488_v61 = vld [vmem:[%s15491_s7 + $0xd58] sm:$0xf]  ;;  %v10336_v57 = vld [vmem:[%s15491_s7 + $0xd70] sm:$0xf0] }
 0x238   :  { %5680 = vmatpush.bf16.msrb.mxu3 %v8929_v8  ;;  %v8090_v8 = vld [vmem:[%s15491_s7 + $0x284] sm:$0xf0]  ;;  %v2736_v36 = vmul.f32 0.2, %v2544_v41  ;;  %vm2720_vm4 = vcmp.ge.f32.partialorder %v2544_v41, 0.0  ;;  %5702 = vmatpush.bf16.msra.mxu1 %v9545_v29 }
 0x239   :  { %v10165_v29 = vld [vmem:[%s15491_s7 + $0x81c] sm:$0xf] }
 0x23a   :  { %5665 = vmatpush.bf16.msrb.mxu2 %v8733_v55  ;;  %5689 = vmatpush.bf16.msra.mxu0 %v9293_v60  ;;  %v2531_v45 = vpop.f32.mrf.mxu0  ;;  %v7894_v55 = vld [vmem:[%s15491_s7 + $0xfc] sm:$0xf0]  ;;  %v9983_v60 = vld [vmem:[%s15491_s7 + $0x26c] sm:$0xf]  ;;  %v2752_v6 = vsel %vm2720_vm4, %v2544_v41, %v2736_v36  ;;  %v9489_v41 = vor.u32 %v10336_v57, %v9488_v61  ;;  %v8762_v61 = vld [vmem:[%s15491_s7 + $0x7c4] sm:$0xf0] }
 0x23b   :  { %v2532_v16 = vadd.f32 %v2531_v45, %v2518_v44  ;;  %v7897_v0 = vor.u32 %v9934_v47, %v7894_v55  ;;  %v8093_v3 = vor.u32 %v9983_v60, %v8090_v8  ;;  %v8370_v44 = vld [vmem:[%s15491_s7 + $0x4b4] sm:$0xf0]  ;;  %v10179_v55 = vld [vmem:[%s15491_s7 + $0x88c] sm:$0xf]  ;;  %v10329_v8 = vld [vmem:[%s15491_s7 + $0xd38] sm:$0xf0] }
 0x23c   :  { %5681 = vmatpush.bf16.msrb.mxu3 %v8901_v56  ;;  %v9124_v56 = vld [vmem:[%s15491_s7 + $0xa80] sm:$0xf]  ;;  %v8373_v45 = vor.u32 %v10053_v37, %v8370_v44  ;;  %v8258_v37 = vld [vmem:[%s15491_s7 + $0x3d4] sm:$0xf0] }
 0x23d   :  { %v2546_v59 = vadd.f32 %v2545_v48, %v2532_v16  ;;  %v7782_v16 = vld [vmem:[%s15491_s7 + $0x1c] sm:$0xf0] }
 0x23e   :  { %5666 = vmatpush.bf16.msrb.mxu2 %v8705_v49  ;;  %5690 = vmatpush.bf16.msra.mxu0 %v9265_v2  ;;  %v7866_v49 = vld [vmem:[%s15491_s7 + $0xc4] sm:$0xf0]  ;;  %v9460_v48 = vld [vmem:[%s15491_s7 + $0xd20] sm:$0xf] }
 0x23f   :  { %vm2728_vm5 = vcmp.ge.f32.partialorder %v2546_v59, 0.0  ;;  %v2744_v2 = vmul.f32 0.2, %v2546_v59  ;;  %v7869_v9 = vor.u32 %v9927_v1, %v7866_v49  ;;  %v9461_v36 = vor.u32 %v10329_v8, %v9460_v48  ;;  %v8230_v48 = vld [vmem:[%s15491_s7 + $0x39c] sm:$0xf0] }
 0x240   :  { %5730 = vmatpush.bf16.msra.mxu3 %v8205_v12  ;;  %v9125_v12 = vor.u32 %v10245_v5, %v9124_v56  ;;  %v9432_v56 = vld [vmem:[%s15491_s7 + $0xce8] sm:$0xf]  ;;  %v10322_v5 = vld [vmem:[%s15491_s7 + $0xd00] sm:$0xf0] }
 0x241   :  { %v2760_v15 = vsel %vm2728_vm5, %v2546_v59, %v2744_v2  ;;  %v8342_v59 = vld [vmem:[%s15491_s7 + $0x47c] sm:$0xf0] }
 0x242   :  { %5667 = vmatpush.bf16.msrb.mxu2 %v8677_v4  ;;  %5691 = vmatpush.bf16.msra.mxu0 %v9237_v17  ;;  %v13077_v14 = vpack.c.bf16 %v2760_v15, %v2752_v6  ;;  %v10067_v4 = vld [vmem:[%s15491_s7 + $0x50c] sm:$0xf]  ;;  %v8426_v17 = vld [vmem:[%s15491_s7 + $0x524] sm:$0xf0]  ;;  %v2571_v43 = vpop.f32.mrf.mxu3  ;;  %v8345_v1 = vor.u32 %v10046_v38, %v8342_v59  ;;  %v9433_v15 = vor.u32 %v10322_v5, %v9432_v56 }
 0x243   :  { %v8429_v51 = vor.u32 %v10067_v4, %v8426_v17  ;;  %v10039_v6 = vld [vmem:[%s15491_s7 + $0x42c] sm:$0xf]  ;;  %v8818_v4 = vld [vmem:[%s15491_s7 + $0x834] sm:$0xf0] }
 0x244   :  { %5731 = vmatpush.bf16.msra.mxu3 %v8177_v21  ;;  %v9516_v21 = vld [vmem:[%s15491_s7 + $0xd90] sm:$0xf] }
 0x245   :  { %5668 = vmatmul.bf16.vlgmr.msrb.gmra.mxu2 %v13077_v14  ;;  %v9517_v23 = vor.u32 %v10343_v42, %v9516_v21 }
 0x246   :  { %5716 = vmatpush.bf16.msra.mxu2 %v7981_v19  ;;  %5692 = vmatpush.bf16.msra.mxu0 %v9209_v40  ;;  %v8065_v19 = vor.u32 %v9976_v34, %v8062_v62  ;;  %v8398_v40 = vld [vmem:[%s15491_s7 + $0x4ec] sm:$0xf0] }
 0x247   :  { %v8401_v35 = vor.u32 %v10060_v22, %v8398_v40  ;;  %5703 = vmatpush.bf16.msra.mxu1 %v9517_v23  ;;  %v8846_v34 = vld [vmem:[%s15491_s7 + $0x86c] sm:$0xf0]  ;;  %v8790_v23 = vld [vmem:[%s15491_s7 + $0x7fc] sm:$0xf0] }
 0x248   :  { %5732 = vmatpush.bf16.msra.mxu3 %v8149_v33  ;;  %v2557_v25 = vpop.f32.mrf.mxu2  ;;  %v8006_v33 = vld [vmem:[%s15491_s7 + $0x1dc] sm:$0xf0] }
 0x249   :  { %v8009_v47 = vor.u32 %v9962_v52, %v8006_v33  ;;  %v2558_v60 = vadd.f32 %v2557_v25, %v977_v39  ;;  %v8289_v25 = vor.u32 %v10032_v20, %v8286_v30  ;;  %v10025_v52 = vld [vmem:[%s15491_s7 + $0x3bc] sm:$0xf]  ;;  %v10130_v20 = vld [vmem:[%s15491_s7 + $0x704] sm:$0xf]  ;;  %v8678_v30 = vld [vmem:[%s15491_s7 + $0x71c] sm:$0xf0] }
 0x24a   :  { %5717 = vmatpush.bf16.msra.mxu2 %v7953_v28  ;;  %5693 = vmatpush.bf16.msra.mxu0 %v9181_v26  ;;  %v7810_v28 = vld [vmem:[%s15491_s7 + $0x54] sm:$0xf0]  ;;  %v2573_v31 = vpop.f32.mrf.mxu3 }
 0x24b   :  { %v7813_v26 = vor.u32 %v9913_v50, %v7810_v28  ;;  %5704 = vmatpush.bf16.msra.mxu1 %v9489_v41  ;;  %v2572_v62 = vadd.f32 %v2571_v43, %v2558_v60  ;;  %v10158_v50 = vld [vmem:[%s15491_s7 + $0x7e4] sm:$0xf]  ;;  %v9376_v28 = vld [vmem:[%s15491_s7 + $0xc78] sm:$0xf] }
 0x24c   :  { %5733 = vmatpush.bf16.msra.mxu3 %v8121_v58  ;;  %v8874_v58 = vld [vmem:[%s15491_s7 + $0x8a4] sm:$0xf0]  ;;  %v8793_v44 = vor.u32 %v10158_v50, %v8790_v23  ;;  %v10018_v60 = vld [vmem:[%s15491_s7 + $0x384] sm:$0xf] }
 0x24d   :  { %v10102_v23 = vld [vmem:[%s15491_s7 + $0x624] sm:$0xf] }
 0x24e   :  { %5718 = vmatpush.bf16.msra.mxu2 %v7925_v46  ;;  %5694 = vmatpush.bf16.msra.mxu0 %v9153_v63  ;;  %v9906_v46 = vld [vmem:[%s15491_s7 + $0x4] sm:$0xf]  ;;  %v2599_v63 = vpop.f32.mrf.mxu1 }
 0x24f   :  { %v7785_v24 = vor.u32 %v9906_v46, %v7782_v16  ;;  %5705 = vmatpush.bf16.msra.mxu1 %v9461_v36  ;;  %v8261_v46 = vor.u32 %v10025_v52, %v8258_v37  ;;  %v8734_v36 = vld [vmem:[%s15491_s7 + $0x78c] sm:$0xf0] }
 0x250   :  { %5734 = vmatpush.bf16.msra.mxu3 %v8093_v3  ;;  %v2559_v49 = vpop.f32.mrf.mxu2  ;;  %v10172_v3 = vld [vmem:[%s15491_s7 + $0x854] sm:$0xf] }
 0x251   :  { %v2560_v10 = vadd.f32 %v2559_v49, %v977_v39  ;;  %v10228_v49 = vld [vmem:[%s15491_s7 + $0xa14] sm:$0xf] }
 0x252   :  { %5719 = vmatpush.bf16.msra.mxu2 %v7897_v0  ;;  %5695 = vmatpush.bf16.msra.mxu0 %v9125_v12  ;;  %v8877_v0 = vor.u32 %v10179_v55, %v8874_v58  ;;  %v2585_v2 = vpop.f32.mrf.mxu0  ;;  %v8314_v12 = vld [vmem:[%s15491_s7 + $0x444] sm:$0xf0]  ;;  %v10301_v58 = vld [vmem:[%s15491_s7 + $0xc58] sm:$0xf0] }
 0x253   :  { %v2586_v11 = vadd.f32 %v2585_v2, %v2572_v62  ;;  %v8317_v17 = vor.u32 %v10039_v6, %v8314_v12  ;;  %5706 = vmatpush.bf16.msra.mxu1 %v9433_v15  ;;  %v2574_v42 = vadd.f32 %v2573_v31, %v2560_v10  ;;  %v9070_v2 = vld [vmem:[%s15491_s7 + $0xa2c] sm:$0xf0]  ;;  %v10116_v62 = vld [vmem:[%s15491_s7 + $0x694] sm:$0xf]  ;;  %v10137_v6 = vld [vmem:[%s15491_s7 + $0x73c] sm:$0xf] }
 0x254   :  { %5735 = vmatpush.bf16.msra.mxu3 %v8065_v19  ;;  %v8821_v19 = vor.u32 %v10165_v29, %v8818_v4  ;;  %v9073_v5 = vor.u32 %v10228_v49, %v9070_v2  ;;  %v8622_v15 = vld [vmem:[%s15491_s7 + $0x6ac] sm:$0xf0]  ;;  %v8706_v10 = vld [vmem:[%s15491_s7 + $0x754] sm:$0xf0]  ;;  %v10109_v4 = vld [vmem:[%s15491_s7 + $0x65c] sm:$0xf] }
 0x255   :  { %v2600_v21 = vadd.f32 %v2599_v63, %v2586_v11  ;;  %v8233_v63 = vor.u32 %v10018_v60, %v8230_v48  ;;  %v10221_v11 = vld [vmem:[%s15491_s7 + $0x9dc] sm:$0xf]  ;;  %v8625_v29 = vor.u32 %v10116_v62, %v8622_v15 }
 0x256   :  { %5720 = vmatpush.bf16.msra.mxu2 %v7869_v9  ;;  %5744 = vmatpush.bf16.msrb.mxu0 %v8429_v51  ;;  %v8849_v9 = vor.u32 %v10172_v3, %v8846_v34  ;;  %v10315_v51 = vld [vmem:[%s15491_s7 + $0xcc8] sm:$0xf0]  ;;  %v2601_v33 = vpop.f32.mrf.mxu1  ;;  %v8650_v3 = vld [vmem:[%s15491_s7 + $0x6e4] sm:$0xf0]  ;;  %v10193_v2 = vld [vmem:[%s15491_s7 + $0x8fc] sm:$0xf] }
 0x257   :  { %v9405_v22 = vor.u32 %v10315_v51, %v9404_v18  ;;  %v2737_v39 = vmul.f32 0.2, %v2600_v21  ;;  %vm2721_vm6 = vcmp.ge.f32.partialorder %v2600_v21, 0.0  ;;  %v13286_v18 = vld [vmem:[%s15490_s6] sm:$0xff] }
 0x258   :  { %5736 = vmatpush.bf16.msra.mxu3 %v8037_v7  ;;  %v10308_v7 = vld [vmem:[%s15491_s7 + $0xc90] sm:$0xf0]  ;;  %v978_v31 = vperm.slane %v13286_v18, 6 }
 0x259   :  { %5707 = vmatpush.bf16.msra.mxu1 %v9405_v22  ;;  %v9377_v57 = vor.u32 %v10308_v7, %v9376_v28  ;;  %v2753_v8 = vsel %vm2721_vm6, %v2600_v21, %v2737_v39  ;;  %v10214_v21 = vld [vmem:[%s15491_s7 + $0x9a4] sm:$0xf]  ;;  %v8681_v7 = vor.u32 %v10130_v20, %v8678_v30  ;;  %v7956_v39 = vld [vmem:[%s15491_s7 + $0x158] sm:$0xf]  ;;  %v7872_v20 = vld [vmem:[%s15491_s7 + $0xb0] sm:$0xf] }
 0x25a   :  { %5721 = vmatpush.bf16.msra.mxu2 %v7841_v27  ;;  %5745 = vmatpush.bf16.msrb.mxu0 %v8401_v35  ;;  %v2587_v27 = vpop.f32.mrf.mxu0  ;;  %v10151_v35 = vld [vmem:[%s15491_s7 + $0x7ac] sm:$0xf] }
 0x25b   :  { %v2588_v40 = vadd.f32 %v2587_v27, %v2574_v42  ;;  %v8765_v43 = vor.u32 %v10151_v35, %v8762_v61  ;;  %v9014_v42 = vld [vmem:[%s15491_s7 + $0x9bc] sm:$0xf0]  ;;  %v9959_v27 = vld [vmem:[%s15491_s7 + $0x1a8] sm:$0xf0]  ;;  %v8986_v61 = vld [vmem:[%s15491_s7 + $0x984] sm:$0xf0] }
 0x25c   :  { %5737 = vmatpush.bf16.msra.mxu3 %v8009_v47  ;;  %v9348_v47 = vld [vmem:[%s15491_s7 + $0xc40] sm:$0xf]  ;;  %v9017_v52 = vor.u32 %v10214_v21, %v9014_v42  ;;  %v10207_v35 = vld [vmem:[%s15491_s7 + $0x96c] sm:$0xf] }
 0x25d   :  { %v2602_v41 = vadd.f32 %v2601_v33, %v2588_v40  ;;  %5708 = vmatpush.bf16.msra.mxu1 %v9377_v57  ;;  %v9349_v59 = vor.u32 %v10301_v58, %v9348_v47  ;;  %v8566_v40 = vld [vmem:[%s15491_s7 + $0x63c] sm:$0xf0]  ;;  %v8989_v47 = vor.u32 %v10207_v35, %v8986_v61  ;;  %v8958_v58 = vld [vmem:[%s15491_s7 + $0x94c] sm:$0xf0] }
 0x25e   :  { %5722 = vmatpush.bf16.msra.mxu2 %v7813_v26  ;;  %5746 = vmatpush.bf16.msrb.mxu0 %v8373_v45  ;;  %v10235_v26 = vld [vmem:[%s15491_s7 + $0xa4c] sm:$0xf]  ;;  %v9098_v45 = vld [vmem:[%s15491_s7 + $0xa64] sm:$0xf0]  ;;  %v8569_v57 = vor.u32 %v10102_v23, %v8566_v40 }
 0x25f   :  { %vm2729_vm7 = vcmp.ge.f32.partialorder %v2602_v41, 0.0  ;;  %v2745_v16 = vmul.f32 0.2, %v2602_v41  ;;  %v9101_v55 = vor.u32 %v10235_v26, %v9098_v45  ;;  %v10095_v45 = vld [vmem:[%s15491_s7 + $0x5ec] sm:$0xf] }
 0x261   :  { %v2761_v38 = vsel %vm2729_vm7, %v2602_v41, %v2745_v16  ;;  %5709 = vmatpush.bf16.msra.mxu1 %v9349_v59  ;;  %v9952_v41 = vld [vmem:[%s15491_s7 + $0x170] sm:$0xf0]  ;;  %v8510_v59 = vld [vmem:[%s15491_s7 + $0x5cc] sm:$0xf0] }
 0x262   :  { %5723 = vmatpush.bf16.msra.mxu2 %v7785_v24  ;;  %5747 = vmatpush.bf16.msrb.mxu0 %v8345_v1  ;;  %v10144_v24 = vld [vmem:[%s15491_s7 + $0x774] sm:$0xf]  ;;  %v13247_v1 = vpack.c.bf16 %v2761_v38, %v2753_v8  ;;  %v2627_v50 = vpop.f32.mrf.mxu3  ;;  %v7928_v38 = vld [vmem:[%s15491_s7 + $0x120] sm:$0xf] }
 0x263   :  { %v8737_v56 = vor.u32 %v10144_v24, %v8734_v36  ;;  %v9945_v24 = vld [vmem:[%s15491_s7 + $0x138] sm:$0xf0]  ;;  %v10088_v36 = vld [vmem:[%s15491_s7 + $0x5b4] sm:$0xf] }
 0x264   :  { %5682 = vmatmul.bf16.vlgmr.msrb.gmra.mxu3 %v13247_v1  ;;  %v7929_v49 = vor.u32 %v9945_v24, %v7928_v38  ;;  %v8152_v38 = vld [vmem:[%s15491_s7 + $0x2e0] sm:$0xf]  ;;  %v10001_v24 = vld [vmem:[%s15491_s7 + $0x2f8] sm:$0xf0] }
 0x265   :  { %5724 = vmatmul.bf16.vlgmr.msra.gmra.mxu2 %v12844_v54  ;;  %5786 = vmatpush.bf16.msrb.mxu3 %v9101_v55  ;;  %v10200_v55 = vld [vmem:[%s15491_s7 + $0x934] sm:$0xf] }
 0x266   :  { %5772 = vmatpush.bf16.msrb.mxu2 %v8877_v0  ;;  %5748 = vmatpush.bf16.msrb.mxu0 %v8317_v17  ;;  %v10123_v0 = vld [vmem:[%s15491_s7 + $0x6cc] sm:$0xf]  ;;  %v8594_v17 = vld [vmem:[%s15491_s7 + $0x674] sm:$0xf0] }
 0x267   :  { %v8653_v34 = vor.u32 %v10123_v0, %v8650_v3  ;;  %v8597_v22 = vor.u32 %v10109_v4, %v8594_v17  ;;  %v8930_v3 = vld [vmem:[%s15491_s7 + $0x914] sm:$0xf0]  ;;  %v8902_v4 = vld [vmem:[%s15491_s7 + $0x8dc] sm:$0xf0] }
 0x268   :  { %v2613_v12 = vpop.f32.mrf.mxu2 }
 0x269   :  { %5758 = vmatpush.bf16.msrb.mxu1 %v8653_v34  ;;  %5787 = vmatpush.bf16.msrb.mxu3 %v9073_v5  ;;  %v2614_v28 = vadd.f32 %v2613_v12, %v978_v31  ;;  %v8513_v34 = vor.u32 %v10088_v36, %v8510_v59  ;;  %v7900_v5 = vld [vmem:[%s15491_s7 + $0xe8] sm:$0xf]  ;;  %v10081_v12 = vld [vmem:[%s15491_s7 + $0x57c] sm:$0xf]  ;;  %v979_v36 = vperm.slane %v13286_v18, 7 }
 0x26a   :  { %5773 = vmatpush.bf16.msrb.mxu2 %v8849_v9  ;;  %5749 = vmatpush.bf16.msrb.mxu0 %v8289_v25  ;;  %v9042_v9 = vld [vmem:[%s15491_s7 + $0x9f4] sm:$0xf0]  ;;  %v7984_v25 = vld [vmem:[%s15491_s7 + $0x190] sm:$0xf]  ;;  %v2629_v0 = vpop.f32.mrf.mxu3  ;;  %v9238_v18 = vld [vmem:[%s15491_s7 + $0xb7c] sm:$0xf0] }
 0x26b   :  { %v9045_v51 = vor.u32 %v10221_v11, %v9042_v9  ;;  %v7985_v33 = vor.u32 %v9959_v27, %v7984_v25  ;;  %v2628_v16 = vadd.f32 %v2627_v50, %v2614_v28  ;;  %v8933_v9 = vor.u32 %v10193_v2, %v8930_v3  ;;  %v8208_v25 = vld [vmem:[%s15491_s7 + $0x350] sm:$0xf]  ;;  %v10015_v27 = vld [vmem:[%s15491_s7 + $0x368] sm:$0xf0]  ;;  %v10074_v50 = vld [vmem:[%s15491_s7 + $0x544] sm:$0xf] }
 0x26c   :  { %v2655_v37 = vpop.f32.mrf.mxu1  ;;  %v8454_v28 = vld [vmem:[%s15491_s7 + $0x55c] sm:$0xf0]  ;;  %v8209_v61 = vor.u32 %v10015_v27, %v8208_v25  ;;  %v7788_v2 = vld [vmem:[%s15491_s7 + $0x8] sm:$0xf]  ;;  %v9910_v3 = vld [vmem:[%s15491_s7 + $0x20] sm:$0xf0] }
 0x26d   :  { %5759 = vmatpush.bf16.msrb.mxu1 %v8625_v29  ;;  %5788 = vmatpush.bf16.msrb.mxu3 %v9045_v51  ;;  %v10186_v29 = vld [vmem:[%s15491_s7 + $0x8c4] sm:$0xf]  ;;  %v9322_v51 = vld [vmem:[%s15491_s7 + $0xc24] sm:$0xf0]  ;;  %v10256_v27 = vld [vmem:[%s15491_s7 + $0xaf4] sm:$0xf] }
 0x26e   :  { %5774 = vmatpush.bf16.msrb.mxu2 %v8821_v19  ;;  %5750 = vmatpush.bf16.msrb.mxu0 %v8261_v46  ;;  %v8709_v19 = vor.u32 %v10137_v6, %v8706_v10  ;;  %v8538_v46 = vld [vmem:[%s15491_s7 + $0x604] sm:$0xf0]  ;;  %v9938_v6 = vld [vmem:[%s15491_s7 + $0x100] sm:$0xf0]  ;;  %v8482_v10 = vld [vmem:[%s15491_s7 + $0x594] sm:$0xf0]  ;;  %v8905_v40 = vor.u32 %v10186_v29, %v8902_v4 }
 0x26f   :  { %v8541_v60 = vor.u32 %v10095_v45, %v8538_v46  ;;  %v8485_v30 = vor.u32 %v10081_v12, %v8482_v10  ;;  %v10008_v45 = vld [vmem:[%s15491_s7 + $0x330] sm:$0xf0]  ;;  %v8457_v46 = vor.u32 %v10074_v50, %v8454_v28  ;;  %v7789_v12 = vor.u32 %v9910_v3, %v7788_v2  ;;  %v9182_v28 = vld [vmem:[%s15491_s7 + $0xb0c] sm:$0xf0]  ;;  %v10347_v3 = vld [vmem:[%s15491_s7 + $0xdcc] sm:$0xf] }
 0x271   :  { %5760 = vmatpush.bf16.msrb.mxu1 %v8597_v22  ;;  %5789 = vmatpush.bf16.msrb.mxu3 %v9017_v52  ;;  %v9931_v22 = vld [vmem:[%s15491_s7 + $0xc8] sm:$0xf0] }
 0x272   :  { %5775 = vmatpush.bf16.msrb.mxu2 %v8793_v44  ;;  %5751 = vmatpush.bf16.msrb.mxu0 %v8233_v63  ;;  %v2615_v44 = vpop.f32.mrf.mxu2  ;;  %v2641_v26 = vpop.f32.mrf.mxu0  ;;  %v8961_v63 = vor.u32 %v10200_v55, %v8958_v58  ;;  %v10277_v58 = vld [vmem:[%s15491_s7 + $0xb9c] sm:$0xf] }
 0x273   :  { %v2616_v48 = vadd.f32 %v2615_v44, %v978_v31  ;;  %v2642_v8 = vadd.f32 %v2641_v26, %v2628_v16  ;;  %v7901_v31 = vor.u32 %v9938_v6, %v7900_v5  ;;  %v9294_v44 = vld [vmem:[%s15491_s7 + $0xbec] sm:$0xf0]  ;;  %v8180_v26 = vld [vmem:[%s15491_s7 + $0x318] sm:$0xf]  ;;  %v10183_v6 = vld [vmem:[%s15491_s7 + $0x8a8] sm:$0xf0] }
 0x274   :  { %5738 = vmatmul.bf16.vlgmr.msra.gmra.mxu3 %v12802_v13  ;;  %v2657_v17 = vpop.f32.mrf.mxu1  ;;  %v8181_v55 = vor.u32 %v10008_v45, %v8180_v26  ;;  %v8880_v5 = vld [vmem:[%s15491_s7 + $0x890] sm:$0xf] }
 0x275   :  { %5761 = vmatpush.bf16.msrb.mxu1 %v8569_v57  ;;  %5790 = vmatpush.bf16.msrb.mxu3 %v8989_v47  ;;  %v2656_v62 = vadd.f32 %v2655_v37, %v2642_v8  ;;  %v10284_v57 = vld [vmem:[%s15491_s7 + $0xbd4] sm:$0xf]  ;;  %v7844_v37 = vld [vmem:[%s15491_s7 + $0x78] sm:$0xf]  ;;  %v8881_v4 = vor.u32 %v10183_v6, %v8880_v5  ;;  %v10155_v6 = vld [vmem:[%s15491_s7 + $0x7c8] sm:$0xf0] }
 0x276   :  { %5776 = vmatpush.bf16.msrb.mxu2 %v8765_v43  ;;  %v7957_v43 = vor.u32 %v9952_v41, %v7956_v39  ;;  %v9924_v39 = vld [vmem:[%s15491_s7 + $0x90] sm:$0xf0]  ;;  %v9266_v8 = vld [vmem:[%s15491_s7 + $0xbb4] sm:$0xf0] }
 0x277   :  { %v2738_v21 = vmul.f32 0.2, %v2656_v62  ;;  %vm2722_vm8 = vcmp.ge.f32.partialorder %v2656_v62, 0.0  ;;  %v7845_v16 = vor.u32 %v9924_v39, %v7844_v37  ;;  %v10249_v39 = vld [vmem:[%s15491_s7 + $0xabc] sm:$0xf] }
 0x279   :  { %5762 = vmatpush.bf16.msrb.mxu1 %v8541_v60  ;;  %5791 = vmatpush.bf16.msrb.mxu3 %v8961_v63  ;;  %v2754_v52 = vsel %vm2722_vm8, %v2656_v62, %v2738_v21  ;;  %v7816_v60 = vld [vmem:[%s15491_s7 + $0x40] sm:$0xf]  ;;  %v9269_v63 = vor.u32 %v10277_v58, %v9266_v8  ;;  %v9994_v62 = vld [vmem:[%s15491_s7 + $0x2c0] sm:$0xf0]  ;;  %v10176_v21 = vld [vmem:[%s15491_s7 + $0x870] sm:$0xf0] }
 0x27a   :  { %5777 = vmatpush.bf16.msrb.mxu2 %v8737_v56  ;;  %v2630_v56 = vadd.f32 %v2629_v0, %v2616_v48  ;;  %v2643_v15 = vpop.f32.mrf.mxu0  ;;  %v9917_v48 = vld [vmem:[%s15491_s7 + $0x58] sm:$0xf0]  ;;  %v8153_v0 = vor.u32 %v10001_v24, %v8152_v38  ;;  %v10162_v58 = vld [vmem:[%s15491_s7 + $0x800] sm:$0xf0] }
 0x27b   :  { %v7817_v59 = vor.u32 %v9917_v48, %v7816_v60  ;;  %v10242_v48 = vld [vmem:[%s15491_s7 + $0xa84] sm:$0xf] }
 0x27c   :  { %v2644_v11 = vadd.f32 %v2643_v15, %v2630_v56 }
 0x27d   :  { %5763 = vmatpush.bf16.msrb.mxu1 %v8513_v34  ;;  %5792 = vmatpush.bf16.msrb.mxu3 %v8933_v9  ;;  %v8124_v34 = vld [vmem:[%s15491_s7 + $0x2a8] sm:$0xf]  ;;  %v10263_v9 = vld [vmem:[%s15491_s7 + $0xb2c] sm:$0xf] }
 0x27e   :  { %5778 = vmatpush.bf16.msrb.mxu2 %v8709_v19  ;;  %v10291_v19 = vld [vmem:[%s15491_s7 + $0xc0c] sm:$0xf]  ;;  %v2658_v42 = vadd.f32 %v2657_v17, %v2644_v11  ;;  %v8125_v11 = vor.u32 %v9994_v62, %v8124_v34  ;;  %v9210_v17 = vld [vmem:[%s15491_s7 + $0xb44] sm:$0xf0]  ;;  %v8432_v34 = vld [vmem:[%s15491_s7 + $0x510] sm:$0xf] }
 0x27f   :  { %v9325_v35 = vor.u32 %v10291_v19, %v9322_v51  ;;  %v9987_v19 = vld [vmem:[%s15491_s7 + $0x288] sm:$0xf0] }
 0x280   :  { %vm2730_vm9 = vcmp.ge.f32.partialorder %v2658_v42, 0.0  ;;  %v2746_v23 = vmul.f32 0.2, %v2658_v42  ;;  %v10071_v62 = vld [vmem:[%s15491_s7 + $0x528] sm:$0xf0] }
 0x281   :  { %5764 = vmatpush.bf16.msrb.mxu1 %v8485_v30  ;;  %5793 = vmatpush.bf16.msrb.mxu3 %v8905_v40  ;;  %v8852_v30 = vld [vmem:[%s15491_s7 + $0x858] sm:$0xf] }
 0x282   :  { %5779 = vmatpush.bf16.msrb.mxu2 %v8681_v7  ;;  %v7873_v7 = vor.u32 %v9931_v22, %v7872_v20  ;;  %v2683_v56 = vpop.f32.mrf.mxu3  ;;  %v9213_v22 = vor.u32 %v10263_v9, %v9210_v17  ;;  %v8853_v40 = vor.u32 %v10176_v21, %v8852_v30  ;;  %v10064_v30 = vld [vmem:[%s15491_s7 + $0x4f0] sm:$0xf0] }
 0x284   :  { %5794 = vmatmul.bf16.vlgmr.msrb.gmra.mxu3 %v13247_v1 }
 0x285   :  { %5780 = vmatmul.bf16.vlgmr.msrb.gmra.mxu2 %v13077_v14  ;;  %5842 = vmatpush.bf16.msra.mxu3 %v8209_v61 }
 0x286   :  { %5828 = vmatpush.bf16.msra.mxu2 %v7985_v33  ;;  %v2762_v33 = vsel %vm2730_vm9, %v2658_v42, %v2746_v23  ;;  %5765 = vmatpush.bf16.msrb.mxu1 %v8457_v46  ;;  %v9154_v46 = vld [vmem:[%s15491_s7 + $0xad4] sm:$0xf0] }
 0x287   :  { %v13408_v41 = vpack.c.bf16 %v2762_v33, %v2754_v52  ;;  %v9980_v52 = vld [vmem:[%s15491_s7 + $0x250] sm:$0xf0]  ;;  %v8824_v33 = vld [vmem:[%s15491_s7 + $0x820] sm:$0xf]  ;;  %v9157_v38 = vor.u32 %v10249_v39, %v9154_v46 }
 0x288   :  { %v2669_v47 = vpop.f32.mrf.mxu2  ;;  %v9048_v39 = vld [vmem:[%s15491_s7 + $0x9e0] sm:$0xf] }
 0x289   :  { %5696 = vmatmul.bf16.vlgmr.msra.gmra.mxu0 %v13408_v41  ;;  %5843 = vmatpush.bf16.msra.mxu3 %v8181_v55  ;;  %v2670_v15 = vadd.f32 %v2669_v47, %v979_v36  ;;  %v9973_v47 = vld [vmem:[%s15491_s7 + $0x218] sm:$0xf0]  ;;  %v8796_v55 = vld [vmem:[%s15491_s7 + $0x7e8] sm:$0xf] }
 0x28a   :  { %5829 = vmatpush.bf16.msra.mxu2 %v7957_v43  ;;  %5800 = vmatpush.bf16.msra.mxu0 %v9325_v35  ;;  %v9297_v43 = vor.u32 %v10284_v57, %v9294_v44  ;;  %v10169_v35 = vld [vmem:[%s15491_s7 + $0x838] sm:$0xf0]  ;;  %v2685_v61 = vpop.f32.mrf.mxu3  ;;  %v9185_v57 = vor.u32 %v10256_v27, %v9182_v28  ;;  %v8797_v2 = vor.u32 %v10162_v58, %v8796_v55  ;;  %v9076_v27 = vld [vmem:[%s15491_s7 + $0xa18] sm:$0xf]  ;;  %v10050_v55 = vld [vmem:[%s15491_s7 + $0x480] sm:$0xf0] }
 0x28b   :  { %v2684_v42 = vadd.f32 %v2683_v56, %v2670_v15  ;;  %v8825_v45 = vor.u32 %v10169_v35, %v8824_v33  ;;  %v8768_v56 = vld [vmem:[%s15491_s7 + $0x7b0] sm:$0xf]  ;;  %v10057_v33 = vld [vmem:[%s15491_s7 + $0x4b8] sm:$0xf0] }
 0x28c   :  { %v2711_v29 = vpop.f32.mrf.mxu1 }
 0x28d   :  { %5844 = vmatpush.bf16.msra.mxu3 %v8153_v0 }
 0x28e   :  { %5830 = vmatpush.bf16.msra.mxu2 %v7929_v49  ;;  %5801 = vmatpush.bf16.msra.mxu0 %v9297_v43  ;;  %v10270_v49 = vld [vmem:[%s15491_s7 + $0xb64] sm:$0xf] }
 0x28f   :  { %v9241_v10 = vor.u32 %v10270_v49, %v9238_v18  ;;  %v9546_v18 = vld [vmem:[%s15491_s7 + $0xde4] sm:$0xf0] }
 0x290   :  { %v2671_v51 = vpop.f32.mrf.mxu2 }
 0x291   :  { %5845 = vmatpush.bf16.msra.mxu3 %v8125_v11  ;;  %v2672_v50 = vadd.f32 %v2671_v51, %v979_v36  ;;  %v9126_v36 = vld [vmem:[%s15491_s7 + $0xa9c] sm:$0xf0]  ;;  %v10239_v11 = vld [vmem:[%s15491_s7 + $0xa68] sm:$0xf0]  ;;  %v10340_v51 = vld [vmem:[%s15491_s7 + $0xd94] sm:$0xf] }
 0x292   :  { %5831 = vmatpush.bf16.msra.mxu2 %v7901_v31  ;;  %5802 = vmatpush.bf16.msra.mxu0 %v9269_v63  ;;  %v8096_v31 = vld [vmem:[%s15491_s7 + $0x270] sm:$0xf]  ;;  %v2697_v20 = vpop.f32.mrf.mxu0  ;;  %v9966_v63 = vld [vmem:[%s15491_s7 + $0x1e0] sm:$0xf0]  ;;  %v9129_v15 = vor.u32 %v10242_v48, %v9126_v36 }
 0x293   :  { %v8097_v25 = vor.u32 %v9987_v19, %v8096_v31  ;;  %v2698_v23 = vadd.f32 %v2697_v20, %v2684_v42  ;;  %v2686_v26 = vadd.f32 %v2685_v61, %v2672_v50  ;;  %v9549_v31 = vor.u32 %v10347_v3, %v9546_v18  ;;  %v8404_v20 = vld [vmem:[%s15491_s7 + $0x4d8] sm:$0xf]  ;;  %v9518_v42 = vld [vmem:[%s15491_s7 + $0xdac] sm:$0xf0]  ;;  %v10232_v50 = vld [vmem:[%s15491_s7 + $0xa30] sm:$0xf0] }
 0x294   :  { %v2713_v8 = vpop.f32.mrf.mxu1  ;;  %v8769_v19 = vor.u32 %v10155_v6, %v8768_v56  ;;  %v9077_v35 = vor.u32 %v10232_v50, %v9076_v27  ;;  %v9490_v61 = vld [vmem:[%s15491_s7 + $0xd74] sm:$0xf0]  ;;  %v10134_v48 = vld [vmem:[%s15491_s7 + $0x720] sm:$0xf0]  ;;  %v7986_v36 = vld [vmem:[%s15491_s7 + $0x1ac] sm:$0xf0] }
 0x295   :  { %5846 = vmatpush.bf16.msra.mxu3 %v8097_v25  ;;  %v2712_v44 = vadd.f32 %v2711_v29, %v2698_v23  ;;  %v10148_v25 = vld [vmem:[%s15491_s7 + $0x790] sm:$0xf0]  ;;  %v8405_v23 = vor.u32 %v10064_v30, %v8404_v20  ;;  %v8992_v56 = vld [vmem:[%s15491_s7 + $0x970] sm:$0xf]  ;;  %v9949_v6 = vld [vmem:[%s15491_s7 + $0x15c] sm:$0xf] }
 0x296   :  { %5832 = vmatpush.bf16.msra.mxu2 %v7873_v7  ;;  %5803 = vmatpush.bf16.msra.mxu0 %v9241_v10  ;;  %v8068_v7 = vld [vmem:[%s15491_s7 + $0x238] sm:$0xf]  ;;  %v9104_v10 = vld [vmem:[%s15491_s7 + $0xa50] sm:$0xf]  ;;  %v10204_v20 = vld [vmem:[%s15491_s7 + $0x950] sm:$0xf0] }
 0x297   :  { %v8069_v37 = vor.u32 %v9980_v52, %v8068_v7  ;;  %v2739_v0 = vmul.f32 0.2, %v2712_v44  ;;  %vm2723_vm10 = vcmp.ge.f32.partialorder %v2712_v44, 0.0  ;;  %v9105_v21 = vor.u32 %v10239_v11, %v9104_v10  ;;  %v10333_v7 = vld [vmem:[%s15491_s7 + $0xd5c] sm:$0xf] }
 0x298   :  { %v8376_v52 = vld [vmem:[%s15491_s7 + $0x4a0] sm:$0xf]  ;;  %v9493_v46 = vor.u32 %v10333_v7, %v9490_v61  ;;  %v10312_v11 = vld [vmem:[%s15491_s7 + $0xcb4] sm:$0xf]  ;;  %v9942_v30 = vld [vmem:[%s15491_s7 + $0x124] sm:$0xf] }
 0x299   :  { %5752 = vmatmul.bf16.vlgmr.msrb.gmra.mxu0 %v12947_v53  ;;  %5847 = vmatpush.bf16.msra.mxu3 %v8069_v37  ;;  %v2755_v9 = vsel %vm2723_vm10, %v2712_v44, %v2739_v0  ;;  %v10141_v37 = vld [vmem:[%s15491_s7 + $0x758] sm:$0xf0]  ;;  %v9378_v27 = vld [vmem:[%s15491_s7 + $0xc94] sm:$0xf0]  ;;  %v8936_v7 = vld [vmem:[%s15491_s7 + $0x900] sm:$0xf] }
 0x29a   :  { %5833 = vmatpush.bf16.msra.mxu2 %v7845_v16  ;;  %5804 = vmatpush.bf16.msra.mxu0 %v9213_v22  ;;  %v8040_v16 = vld [vmem:[%s15491_s7 + $0x200] sm:$0xf]  ;;  %v2699_v43 = vpop.f32.mrf.mxu0  ;;  %v8740_v22 = vld [vmem:[%s15491_s7 + $0x778] sm:$0xf]  ;;  %v10225_v44 = vld [vmem:[%s15491_s7 + $0x9f8] sm:$0xf0] }
 0x29b   :  { %v2700_v60 = vadd.f32 %v2699_v43, %v2686_v26  ;;  %v8041_v24 = vor.u32 %v9973_v47, %v8040_v16  ;;  %v8741_v28 = vor.u32 %v10148_v25, %v8740_v22  ;;  %v8377_v26 = vor.u32 %v10057_v33, %v8376_v52  ;;  %v9462_v47 = vld [vmem:[%s15491_s7 + $0xd3c] sm:$0xf0]  ;;  %v8348_v43 = vld [vmem:[%s15491_s7 + $0x468] sm:$0xf]  ;;  %v10305_v25 = vld [vmem:[%s15491_s7 + $0xc7c] sm:$0xf] }
 0x29c   :  { %v9049_v58 = vor.u32 %v10225_v44, %v9048_v39  ;;  %v10197_v52 = vld [vmem:[%s15491_s7 + $0x918] sm:$0xf0]  ;;  %v9935_v33 = vld [vmem:[%s15491_s7 + $0xec] sm:$0xf]  ;;  %v9381_v61 = vor.u32 %v10305_v25, %v9378_v27  ;;  %v9350_v39 = vld [vmem:[%s15491_s7 + $0xc5c] sm:$0xf0] }
 0x29d   :  { %v2714_v49 = vadd.f32 %v2713_v8, %v2700_v60  ;;  %5848 = vmatpush.bf16.msra.mxu3 %v8041_v24  ;;  %v8684_v60 = vld [vmem:[%s15491_s7 + $0x708] sm:$0xf]  ;;  %v9956_v24 = vld [vmem:[%s15491_s7 + $0x194] sm:$0xf] }
 0x29e   :  { %5834 = vmatpush.bf16.msra.mxu2 %v7817_v59  ;;  %5805 = vmatpush.bf16.msra.mxu0 %v9185_v57  ;;  %v8012_v59 = vld [vmem:[%s15491_s7 + $0x1c8] sm:$0xf]  ;;  %v8712_v57 = vld [vmem:[%s15491_s7 + $0x740] sm:$0xf]  ;;  %v8685_v0 = vor.u32 %v10134_v48, %v8684_v60  ;;  %v7989_v18 = vor.u32 %v9956_v24, %v7986_v36  ;;  %v10295_v60 = vld [vmem:[%s15491_s7 + $0xc28] sm:$0xf0] }
 0x29f   :  { %vm2731_vm11 = vcmp.ge.f32.partialorder %v2714_v49, 0.0  ;;  %v2747_v5 = vmul.f32 0.2, %v2714_v49  ;;  %v8713_v16 = vor.u32 %v10141_v37, %v8712_v57  ;;  %v9020_v8 = vld [vmem:[%s15491_s7 + $0x9a8] sm:$0xf] }
 0x2a0   :  { %v10298_v37 = vld [vmem:[%s15491_s7 + $0xc44] sm:$0xf]  ;;  %v8236_v44 = vld [vmem:[%s15491_s7 + $0x388] sm:$0xf]  ;;  %v9928_v48 = vld [vmem:[%s15491_s7 + $0xb4] sm:$0xf] }
 0x2a1   :  { %v2763_v29 = vsel %vm2731_vm11, %v2714_v49, %v2747_v5  ;;  %v10319_v49 = vld [vmem:[%s15491_s7 + $0xcec] sm:$0xf]  ;;  %v10012_v36 = vld [vmem:[%s15491_s7 + $0x354] sm:$0xf]  ;;  %v8572_v25 = vld [vmem:[%s15491_s7 + $0x628] sm:$0xf] }
 0x2a2   :  { %5835 = vmatpush.bf16.msra.mxu2 %v7789_v12  ;;  %5806 = vmatpush.bf16.msra.mxu0 %v9157_v38  ;;  %v8013_v12 = vor.u32 %v9966_v63, %v8012_v59  ;;  %v13556_v17 = vpack.c.bf16 %v2763_v29, %v2755_v9  ;;  %v10218_v38 = vld [vmem:[%s15491_s7 + $0x9c0] sm:$0xf0]  ;;  %v8349_v59 = vor.u32 %v10050_v55, %v8348_v43  ;;  %v10211_v5 = vld [vmem:[%s15491_s7 + $0x988] sm:$0xf0]  ;;  %v9406_v9 = vld [vmem:[%s15491_s7 + $0xccc] sm:$0xf0] }
 0x2a3   :  { %v9021_v3 = vor.u32 %v10218_v38, %v9020_v8  ;;  %v8993_v29 = vor.u32 %v10211_v5, %v8992_v56  ;;  %v8656_v43 = vld [vmem:[%s15491_s7 + $0x6d0] sm:$0xf]  ;;  %v10127_v55 = vld [vmem:[%s15491_s7 + $0x6e8] sm:$0xf0]  ;;  %v9353_v38 = vor.u32 %v10298_v37, %v9350_v39  ;;  %v10288_v56 = vld [vmem:[%s15491_s7 + $0xbf0] sm:$0xf0] }
 0x2a4   :  { %5849 = vmatpush.bf16.msra.mxu3 %v8013_v12  ;;  %5710 = vmatmul.bf16.vlgmr.msra.gmra.mxu1 %v13556_v17  ;;  %v7874_v8 = vld [vmem:[%s15491_s7 + $0xcc] sm:$0xf0]  ;;  %v9921_v5 = vld [vmem:[%s15491_s7 + $0x7c] sm:$0xf] }
 0x2a5   :  { %5836 = vmatmul.bf16.vlgmr.msra.gmra.mxu2 %v12844_v54  ;;  %5814 = vmatpush.bf16.msra.mxu1 %v9549_v31  ;;  %v8292_v31 = vld [vmem:[%s15491_s7 + $0x3f8] sm:$0xf]  ;;  %v8882_v37 = vld [vmem:[%s15491_s7 + $0x8ac] sm:$0xf0] }
 0x2a6   :  { %5884 = vmatpush.bf16.msrb.mxu2 %v8881_v4  ;;  %v8433_v4 = vor.u32 %v10071_v62, %v8432_v34  ;;  %5807 = vmatpush.bf16.msra.mxu0 %v9129_v15  ;;  %v8320_v34 = vld [vmem:[%s15491_s7 + $0x430] sm:$0xf]  ;;  %v10043_v62 = vld [vmem:[%s15491_s7 + $0x448] sm:$0xf0]  ;;  %v7958_v15 = vld [vmem:[%s15491_s7 + $0x174] sm:$0xf0] }
 0x2a7   :  { %5850 = vmatmul.bf16.vlgmr.msra.gmra.mxu3 %v12802_v13  ;;  %v8321_v10 = vor.u32 %v10043_v62, %v8320_v34  ;;  %v9300_v34 = vld [vmem:[%s15491_s7 + $0xbd8] sm:$0xf] }
 0x2a8   :  { %5898 = vmatpush.bf16.msrb.mxu3 %v9105_v21  ;;  %v7930_v21 = vld [vmem:[%s15491_s7 + $0x13c] sm:$0xf0] }
 0x2a9   :  { %5808 = vmatmul.bf16.vlgmr.msra.gmra.mxu0 %v13408_v41 }
 0x2aa   :  { %5885 = vmatpush.bf16.msrb.mxu2 %v8853_v40  ;;  %5856 = vmatpush.bf16.msrb.mxu0 %v8433_v4  ;;  %v9521_v40 = vor.u32 %v10340_v51, %v9518_v42  ;;  %v7961_v4 = vor.u32 %v9949_v6, %v7958_v15  ;;  %v8964_v51 = vld [vmem:[%s15491_s7 + $0x938] sm:$0xf]  ;;  %v9409_v42 = vor.u32 %v10312_v11, %v9406_v9  ;;  %v10005_v15 = vld [vmem:[%s15491_s7 + $0x31c] sm:$0xf] }
 0x2ab   :  { %v8965_v50 = vor.u32 %v10204_v20, %v8964_v51  ;;  %v7846_v6 = vld [vmem:[%s15491_s7 + $0x94] sm:$0xf0]  ;;  %v9301_v11 = vor.u32 %v10288_v56, %v9300_v34  ;;  %v10281_v51 = vld [vmem:[%s15491_s7 + $0xbb8] sm:$0xf0]  ;;  %v9914_v20 = vld [vmem:[%s15491_s7 + $0x44] sm:$0xf] }
 0x2ac   :  { %5815 = vmatpush.bf16.msra.mxu1 %v9521_v40  ;;  %5899 = vmatpush.bf16.msrb.mxu3 %v9077_v35  ;;  %v8264_v40 = vld [vmem:[%s15491_s7 + $0x3c0] sm:$0xf]  ;;  %v7902_v35 = vld [vmem:[%s15491_s7 + $0x104] sm:$0xf0]  ;;  %v7849_v9 = vor.u32 %v9921_v5, %v7846_v6  ;;  %v10166_v34 = vld [vmem:[%s15491_s7 + $0x824] sm:$0xf] }
 0x2ad   :  { %v8488_v6 = vld [vmem:[%s15491_s7 + $0x580] sm:$0xf] }
 0x2ae   :  { %5886 = vmatpush.bf16.msrb.mxu2 %v8825_v45  ;;  %5857 = vmatpush.bf16.msrb.mxu0 %v8405_v23  ;;  %v10326_v45 = vld [vmem:[%s15491_s7 + $0xd24] sm:$0xf]  ;;  %v7933_v23 = vor.u32 %v9942_v30, %v7930_v21  ;;  %v7818_v30 = vld [vmem:[%s15491_s7 + $0x5c] sm:$0xf0] }
 0x2af   :  { %v9465_v63 = vor.u32 %v10326_v45, %v9462_v47  ;;  %v7905_v45 = vor.u32 %v9935_v33, %v7902_v35  ;;  %v10190_v47 = vld [vmem:[%s15491_s7 + $0x8e0] sm:$0xf0]  ;;  %v7790_v33 = vld [vmem:[%s15491_s7 + $0x24] sm:$0xf0]  ;;  %v9991_v35 = vld [vmem:[%s15491_s7 + $0x2ac] sm:$0xf] }
 0x2b0   :  { %5816 = vmatpush.bf16.msra.mxu1 %v9493_v46  ;;  %5900 = vmatpush.bf16.msrb.mxu3 %v9049_v58  ;;  %v10022_v46 = vld [vmem:[%s15491_s7 + $0x3a0] sm:$0xf0]  ;;  %v9328_v58 = vld [vmem:[%s15491_s7 + $0xc10] sm:$0xf] }
 0x2b1   :  { %v8237_v24 = vor.u32 %v10022_v46, %v8236_v44  ;;  %v9998_v21 = vld [vmem:[%s15491_s7 + $0x2e4] sm:$0xf]  ;;  %v10099_v46 = vld [vmem:[%s15491_s7 + $0x608] sm:$0xf0] }
 0x2b2   :  { %5887 = vmatpush.bf16.msrb.mxu2 %v8797_v2  ;;  %5858 = vmatpush.bf16.msrb.mxu0 %v8377_v26  ;;  %v9434_v2 = vld [vmem:[%s15491_s7 + $0xd04] sm:$0xf0]  ;;  %v8937_v26 = vor.u32 %v10197_v52, %v8936_v7  ;;  %v9907_v52 = vld [vmem:[%s15491_s7 + $0xc] sm:$0xf] }
 0x2b3   :  { %v9437_v12 = vor.u32 %v10319_v49, %v9434_v2  ;;  %v9329_v49 = vor.u32 %v10295_v60, %v9328_v58  ;;  %v7877_v2 = vor.u32 %v9928_v48, %v7874_v8  ;;  %v9984_v58 = vld [vmem:[%s15491_s7 + $0x274] sm:$0xf]  ;;  %v8098_v60 = vld [vmem:[%s15491_s7 + $0x28c] sm:$0xf0]  ;;  %v10173_v48 = vld [vmem:[%s15491_s7 + $0x85c] sm:$0xf] }
 0x2b4   :  { %5817 = vmatpush.bf16.msra.mxu1 %v9465_v63  ;;  %5901 = vmatpush.bf16.msrb.mxu3 %v9021_v3  ;;  %v8628_v3 = vld [vmem:[%s15491_s7 + $0x698] sm:$0xf] }
 0x2b5   :  { %5766 = vmatmul.bf16.vlgmr.msrb.gmra.mxu1 %v12919_v32  ;;  %v8854_v8 = vld [vmem:[%s15491_s7 + $0x874] sm:$0xf0] }
 0x2b6   :  { %5888 = vmatpush.bf16.msrb.mxu2 %v8769_v19  ;;  %5859 = vmatpush.bf16.msrb.mxu0 %v8349_v59  ;;  %v10036_v19 = vld [vmem:[%s15491_s7 + $0x410] sm:$0xf0]  ;;  %v8210_v59 = vld [vmem:[%s15491_s7 + $0x36c] sm:$0xf0] }
 0x2b7   :  { %v8293_v22 = vor.u32 %v10036_v19, %v8292_v31  ;;  %v8213_v62 = vor.u32 %v10012_v36, %v8210_v59  ;;  %v9272_v31 = vld [vmem:[%s15491_s7 + $0xba0] sm:$0xf]  ;;  %v8516_v36 = vld [vmem:[%s15491_s7 + $0x5b8] sm:$0xf]  ;;  %v10092_v59 = vld [vmem:[%s15491_s7 + $0x5d0] sm:$0xf0] }
 0x2b8   :  { %5818 = vmatpush.bf16.msra.mxu1 %v9437_v12  ;;  %5902 = vmatpush.bf16.msrb.mxu3 %v8993_v29  ;;  %v8182_v12 = vld [vmem:[%s15491_s7 + $0x334] sm:$0xf0]  ;;  %v8600_v29 = vld [vmem:[%s15491_s7 + $0x660] sm:$0xf]  ;;  %v9273_v27 = vor.u32 %v10281_v51, %v9272_v31  ;;  %v8517_v56 = vor.u32 %v10092_v59, %v8516_v36  ;;  %v10159_v31 = vld [vmem:[%s15491_s7 + $0x7ec] sm:$0xf] }
 0x2b9   :  { %v8185_v19 = vor.u32 %v10005_v15, %v8182_v12  ;;  %v10085_v15 = vld [vmem:[%s15491_s7 + $0x598] sm:$0xf0]  ;;  %v9496_v59 = vld [vmem:[%s15491_s7 + $0xd60] sm:$0xf] }
 0x2ba   :  { %5889 = vmatpush.bf16.msrb.mxu2 %v8741_v28  ;;  %5860 = vmatpush.bf16.msrb.mxu0 %v8321_v10  ;;  %v10029_v28 = vld [vmem:[%s15491_s7 + $0x3d8] sm:$0xf0]  ;;  %v8489_v51 = vor.u32 %v10085_v15, %v8488_v6  ;;  %v9468_v15 = vld [vmem:[%s15491_s7 + $0xd28] sm:$0xf] }
 0x2bb   :  { %v8265_v57 = vor.u32 %v10029_v28, %v8264_v40  ;;  %v9244_v40 = vld [vmem:[%s15491_s7 + $0xb68] sm:$0xf]  ;;  %v10274_v28 = vld [vmem:[%s15491_s7 + $0xb80] sm:$0xf0] }
 0x2bc   :  { %5819 = vmatpush.bf16.msra.mxu1 %v9409_v42  ;;  %5903 = vmatpush.bf16.msrb.mxu3 %v8965_v50  ;;  %v8154_v42 = vld [vmem:[%s15491_s7 + $0x2fc] sm:$0xf0]  ;;  %v7821_v50 = vor.u32 %v9914_v20, %v7818_v30  ;;  %v9245_v44 = vor.u32 %v10274_v28, %v9244_v40  ;;  %v8460_v20 = vld [vmem:[%s15491_s7 + $0x548] sm:$0xf]  ;;  %v10078_v30 = vld [vmem:[%s15491_s7 + $0x560] sm:$0xf0] }
 0x2bd   :  { %v8157_v7 = vor.u32 %v9998_v21, %v8154_v42  ;;  %v9132_v42 = vld [vmem:[%s15491_s7 + $0xa88] sm:$0xf]  ;;  %v9552_v40 = vld [vmem:[%s15491_s7 + $0xdd0] sm:$0xf]  ;;  %v10351_v28 = vld [vmem:[%s15491_s7 + $0xde8] sm:$0xf0] }
 0x2be   :  { %5890 = vmatpush.bf16.msrb.mxu2 %v8713_v16  ;;  %5861 = vmatpush.bf16.msrb.mxu0 %v8293_v22  ;;  %v8908_v16 = vld [vmem:[%s15491_s7 + $0x8c8] sm:$0xf] }
 0x2bf   :  { %v8909_v63 = vor.u32 %v10190_v47, %v8908_v16 }
 0x2c0   :  { %5820 = vmatpush.bf16.msra.mxu1 %v9381_v61  ;;  %5904 = vmatpush.bf16.msrb.mxu3 %v8937_v26  ;;  %v8126_v61 = vld [vmem:[%s15491_s7 + $0x2c4] sm:$0xf0]  ;;  %v7793_v26 = vor.u32 %v9907_v52, %v7790_v33  ;;  %v8434_v52 = vld [vmem:[%s15491_s7 + $0x52c] sm:$0xf0]  ;;  %v10152_v33 = vld [vmem:[%s15491_s7 + $0x7b4] sm:$0xf] }
 0x2c1   :  { %v8129_v16 = vor.u32 %v9991_v35, %v8126_v61  ;;  %v8461_v35 = vor.u32 %v10078_v30, %v8460_v20  ;;  %v8770_v61 = vld [vmem:[%s15491_s7 + $0x7cc] sm:$0xf0]  ;;  %v7992_v30 = vld [vmem:[%s15491_s7 + $0x198] sm:$0xf] }
 0x2c2   :  { %5891 = vmatpush.bf16.msrb.mxu2 %v8685_v0  ;;  %5862 = vmatpush.bf16.msrb.mxu0 %v8265_v57  ;;  %v8657_v0 = vor.u32 %v10127_v55, %v8656_v43  ;;  %v10180_v57 = vld [vmem:[%s15491_s7 + $0x894] sm:$0xf]  ;;  %v9216_v43 = vld [vmem:[%s15491_s7 + $0xb30] sm:$0xf]  ;;  %v10267_v55 = vld [vmem:[%s15491_s7 + $0xb48] sm:$0xf0] }
 0x2c3   :  { %v8885_v47 = vor.u32 %v10180_v57, %v8882_v37  ;;  %v10236_v57 = vld [vmem:[%s15491_s7 + $0xa54] sm:$0xf]  ;;  %v9106_v37 = vld [vmem:[%s15491_s7 + $0xa6c] sm:$0xf0] }
 0x2c4   :  { %5821 = vmatpush.bf16.msra.mxu1 %v9353_v38  ;;  %5905 = vmatpush.bf16.msrb.mxu3 %v8909_v63  ;;  %v8101_v63 = vor.u32 %v9984_v58, %v8098_v60  ;;  %v8406_v58 = vld [vmem:[%s15491_s7 + $0x4f4] sm:$0xf0]  ;;  %v10145_v60 = vld [vmem:[%s15491_s7 + $0x77c] sm:$0xf] }
 0x2c5   :  { %5892 = vmatmul.bf16.vlgmr.msrb.gmra.mxu2 %v13077_v14 }
 0x2c6   :  { %5940 = vmatpush.bf16.msra.mxu2 %v7989_v18  ;;  %v10120_v18 = vld [vmem:[%s15491_s7 + $0x6b0] sm:$0xf0]  ;;  %5863 = vmatpush.bf16.msrb.mxu0 %v8237_v24  ;;  %v9217_v24 = vor.u32 %v10267_v55, %v9216_v43  ;;  %v9109_v43 = vor.u32 %v10236_v57, %v9106_v37  ;;  %v10061_v55 = vld [vmem:[%s15491_s7 + $0x4dc] sm:$0xf]  ;;  %v9412_v37 = vld [vmem:[%s15491_s7 + $0xcb8] sm:$0xf] }
 0x2c7   :  { %v8629_v10 = vor.u32 %v10120_v18, %v8628_v3  ;;  %5906 = vmatmul.bf16.vlgmr.msrb.gmra.mxu3 %v13247_v1  ;;  %5822 = vmatmul.bf16.vlgmr.msra.gmra.mxu1 %v13556_v17  ;;  %v9977_v3 = vld [vmem:[%s15491_s7 + $0x23c] sm:$0xf]  ;;  %v8070_v18 = vld [vmem:[%s15491_s7 + $0x254] sm:$0xf0]  ;;  %v8409_v36 = vor.u32 %v10061_v55, %v8406_v58  ;;  %v7936_v55 = vld [vmem:[%s15491_s7 + $0x128] sm:$0xf] }
 0x2c8   :  { %5870 = vmatpush.bf16.msrb.mxu1 %v8657_v0  ;;  %5954 = vmatpush.bf16.msra.mxu3 %v8213_v62  ;;  %v8857_v0 = vor.u32 %v10173_v48, %v8854_v8  ;;  %v8826_v62 = vld [vmem:[%s15491_s7 + $0x83c] sm:$0xf0]  ;;  %v8073_v12 = vor.u32 %v9977_v3, %v8070_v18  ;;  %v8742_v48 = vld [vmem:[%s15491_s7 + $0x794] sm:$0xf0]  ;;  %v10229_v8 = vld [vmem:[%s15491_s7 + $0xa1c] sm:$0xf] }
 0x2c9   :  { %5864 = vmatmul.bf16.vlgmr.msrb.gmra.mxu0 %v12947_v53  ;;  %v8378_v3 = vld [vmem:[%s15491_s7 + $0x4bc] sm:$0xf0]  ;;  %v10138_v18 = vld [vmem:[%s15491_s7 + $0x744] sm:$0xf] }
 0x2ca   :  { %5941 = vmatpush.bf16.msra.mxu2 %v7961_v4  ;;  %5912 = vmatpush.bf16.msra.mxu0 %v9329_v49  ;;  %v10113_v4 = vld [vmem:[%s15491_s7 + $0x678] sm:$0xf0]  ;;  %v9188_v49 = vld [vmem:[%s15491_s7 + $0xaf8] sm:$0xf]  ;;  %v9946_v58 = vld [vmem:[%s15491_s7 + $0x140] sm:$0xf0] }
 0x2cb   :  { %v8601_v22 = vor.u32 %v10113_v4, %v8600_v29  ;;  %v9970_v29 = vld [vmem:[%s15491_s7 + $0x204] sm:$0xf]  ;;  %v8042_v4 = vld [vmem:[%s15491_s7 + $0x21c] sm:$0xf0] }
 0x2cc   :  { %5871 = vmatpush.bf16.msrb.mxu1 %v8629_v10  ;;  %5955 = vmatpush.bf16.msra.mxu3 %v8185_v19  ;;  %v8829_v10 = vor.u32 %v10166_v34, %v8826_v62  ;;  %v8798_v19 = vld [vmem:[%s15491_s7 + $0x804] sm:$0xf0]  ;;  %v8714_v34 = vld [vmem:[%s15491_s7 + $0x75c] sm:$0xf0]  ;;  %v10222_v62 = vld [vmem:[%s15491_s7 + $0x9e4] sm:$0xf] }
 0x2ce   :  { %5942 = vmatpush.bf16.msra.mxu2 %v7933_v23  ;;  %5913 = vmatpush.bf16.msra.mxu0 %v9301_v11  ;;  %v10106_v23 = vld [vmem:[%s15491_s7 + $0x640] sm:$0xf0]  ;;  %v9160_v11 = vld [vmem:[%s15491_s7 + $0xac0] sm:$0xf] }
 0x2cf   :  { %v8573_v39 = vor.u32 %v10106_v23, %v8572_v25  ;;  %v9963_v25 = vld [vmem:[%s15491_s7 + $0x1cc] sm:$0xf]  ;;  %v8014_v23 = vld [vmem:[%s15491_s7 + $0x1e4] sm:$0xf0] }
 0x2d0   :  { %5872 = vmatpush.bf16.msrb.mxu1 %v8601_v22  ;;  %5956 = vmatpush.bf16.msra.mxu3 %v8157_v7  ;;  %v10246_v22 = vld [vmem:[%s15491_s7 + $0xaa0] sm:$0xf0]  ;;  %v10068_v7 = vld [vmem:[%s15491_s7 + $0x514] sm:$0xf] }
 0x2d2   :  { %5943 = vmatpush.bf16.msra.mxu2 %v7905_v45  ;;  %5914 = vmatpush.bf16.msra.mxu0 %v9273_v27  ;;  %v8544_v45 = vld [vmem:[%s15491_s7 + $0x5f0] sm:$0xf]  ;;  %v8045_v27 = vor.u32 %v9970_v29, %v8042_v4  ;;  %v8350_v29 = vld [vmem:[%s15491_s7 + $0x484] sm:$0xf0]  ;;  %v10131_v4 = vld [vmem:[%s15491_s7 + $0x70c] sm:$0xf] }
 0x2d3   :  { %v8545_v38 = vor.u32 %v10099_v46, %v8544_v45  ;;  %v8437_v45 = vor.u32 %v10068_v7, %v8434_v52  ;;  %v9524_v46 = vld [vmem:[%s15491_s7 + $0xd98] sm:$0xf]  ;;  %v10208_v7 = vld [vmem:[%s15491_s7 + $0x974] sm:$0xf]  ;;  %v8994_v52 = vld [vmem:[%s15491_s7 + $0x98c] sm:$0xf0] }
 0x2d4   :  { %5873 = vmatpush.bf16.msrb.mxu1 %v8573_v39  ;;  %5957 = vmatpush.bf16.msra.mxu3 %v8129_v16  ;;  %v9133_v39 = vor.u32 %v10246_v22, %v9132_v42  ;;  %v10344_v16 = vld [vmem:[%s15491_s7 + $0xdb0] sm:$0xf0]  ;;  %v9440_v22 = vld [vmem:[%s15491_s7 + $0xcf0] sm:$0xf] }
 0x2d6   :  { %5944 = vmatpush.bf16.msra.mxu2 %v7877_v2  ;;  %5915 = vmatpush.bf16.msra.mxu0 %v9245_v44  ;;  %v10260_v2 = vld [vmem:[%s15491_s7 + $0xb10] sm:$0xf0]  ;;  %v9553_v44 = vor.u32 %v10351_v28, %v9552_v40  ;;  %v8322_v40 = vld [vmem:[%s15491_s7 + $0x44c] sm:$0xf0] }
 0x2d7   :  { %v9189_v5 = vor.u32 %v10260_v2, %v9188_v49  ;;  %v10054_v2 = vld [vmem:[%s15491_s7 + $0x4a4] sm:$0xf] }
 0x2d8   :  { %5874 = vmatpush.bf16.msrb.mxu1 %v8545_v38  ;;  %5958 = vmatpush.bf16.msra.mxu3 %v8101_v63  ;;  %v9078_v38 = vld [vmem:[%s15491_s7 + $0xa34] sm:$0xf0]  ;;  %v10337_v63 = vld [vmem:[%s15491_s7 + $0xd78] sm:$0xf0]  ;;  %v8381_v6 = vor.u32 %v10054_v2, %v8378_v3  ;;  %v9939_v3 = vld [vmem:[%s15491_s7 + $0x108] sm:$0xf0] }
 0x2d9   :  { %v9081_v49 = vor.u32 %v10229_v8, %v9078_v38  ;;  %v10309_v8 = vld [vmem:[%s15491_s7 + $0xc98] sm:$0xf0] }
 0x2da   :  { %5945 = vmatpush.bf16.msra.mxu2 %v7849_v9  ;;  %5916 = vmatpush.bf16.msra.mxu0 %v9217_v24  ;;  %v10253_v9 = vld [vmem:[%s15491_s7 + $0xad8] sm:$0xf0]  ;;  %v9525_v24 = vor.u32 %v10344_v16, %v9524_v46 }
 0x2db   :  { %v9161_v21 = vor.u32 %v10253_v9, %v9160_v11  ;;  %v10047_v9 = vld [vmem:[%s15491_s7 + $0x46c] sm:$0xf]  ;;  %v10201_v16 = vld [vmem:[%s15491_s7 + $0x93c] sm:$0xf] }
 0x2dc   :  { %5875 = vmatpush.bf16.msrb.mxu1 %v8517_v56  ;;  %5959 = vmatpush.bf16.msra.mxu3 %v8073_v12  ;;  %v9050_v56 = vld [vmem:[%s15491_s7 + $0x9fc] sm:$0xf0]  ;;  %v10330_v12 = vld [vmem:[%s15491_s7 + $0xd40] sm:$0xf0]  ;;  %v8353_v42 = vor.u32 %v10047_v9, %v8350_v29  ;;  %v10292_v29 = vld [vmem:[%s15491_s7 + $0xc14] sm:$0xf] }
 0x2dd   :  { %v9053_v11 = vor.u32 %v10222_v62, %v9050_v56  ;;  %v9469_v20 = vor.u32 %v10330_v12, %v9468_v15  ;;  %v10019_v56 = vld [vmem:[%s15491_s7 + $0x38c] sm:$0xf]  ;;  %v8910_v12 = vld [vmem:[%s15491_s7 + $0x8e4] sm:$0xf0] }
 0x2de   :  { %5946 = vmatpush.bf16.msra.mxu2 %v7821_v50  ;;  %5917 = vmatpush.bf16.msra.mxu0 %v9189_v5  ;;  %v8801_v50 = vor.u32 %v10159_v31, %v8798_v19  ;;  %v9497_v5 = vor.u32 %v10337_v63, %v9496_v59  ;;  %v8686_v31 = vld [vmem:[%s15491_s7 + $0x724] sm:$0xf0]  ;;  %v10215_v19 = vld [vmem:[%s15491_s7 + $0x9ac] sm:$0xf]  ;;  %v7937_v59 = vor.u32 %v9946_v58, %v7936_v55  ;;  %v10194_v63 = vld [vmem:[%s15491_s7 + $0x904] sm:$0xf] }
 0x2df   :  { %v9918_v55 = vld [vmem:[%s15491_s7 + $0x60] sm:$0xf0]  ;;  %v8160_v58 = vld [vmem:[%s15491_s7 + $0x2e8] sm:$0xf] }
 0x2e0   :  { %5876 = vmatpush.bf16.msrb.mxu1 %v8489_v51  ;;  %5960 = vmatpush.bf16.msra.mxu3 %v8045_v27  ;;  %v9022_v51 = vld [vmem:[%s15491_s7 + $0x9c4] sm:$0xf0]  ;;  %v8689_v27 = vor.u32 %v10131_v4, %v8686_v31  ;;  %v9330_v4 = vld [vmem:[%s15491_s7 + $0xc2c] sm:$0xf0]  ;;  %v7880_v31 = vld [vmem:[%s15491_s7 + $0xb8] sm:$0xf] }
 0x2e2   :  { %5947 = vmatpush.bf16.msra.mxu2 %v7793_v26  ;;  %5918 = vmatpush.bf16.msra.mxu0 %v9161_v21  ;;  %v8017_v26 = vor.u32 %v9963_v25, %v8014_v23  ;;  %v9960_v21 = vld [vmem:[%s15491_s7 + $0x1b0] sm:$0xf0]  ;;  %v10323_v25 = vld [vmem:[%s15491_s7 + $0xd08] sm:$0xf0] }
 0x2e3   :  { %v10040_v23 = vld [vmem:[%s15491_s7 + $0x434] sm:$0xf]  ;;  %v7993_v28 = vor.u32 %v9960_v21, %v7992_v30 }
 0x2e4   :  { %5877 = vmatpush.bf16.msrb.mxu1 %v8461_v35  ;;  %5961 = vmatpush.bf16.msra.mxu3 %v8017_v26  ;;  %v7964_v35 = vld [vmem:[%s15491_s7 + $0x160] sm:$0xf]  ;;  %v8325_v57 = vor.u32 %v10040_v23, %v8322_v40  ;;  %v10033_v26 = vld [vmem:[%s15491_s7 + $0x3fc] sm:$0xf]  ;;  %v10016_v30 = vld [vmem:[%s15491_s7 + $0x370] sm:$0xf0] }
 0x2e5   :  { %5948 = vmatmul.bf16.vlgmr.msra.gmra.mxu2 %v12844_v54 }
 0x2e6   :  { %5996 = vmatpush.bf16.msrb.mxu2 %v8885_v47  ;;  %v8773_v47 = vor.u32 %v10152_v33, %v8770_v61  ;;  %5919 = vmatpush.bf16.msra.mxu0 %v9133_v39  ;;  %v9441_v33 = vor.u32 %v10323_v25, %v9440_v22  ;;  %v9953_v61 = vld [vmem:[%s15491_s7 + $0x178] sm:$0xf0]  ;;  %v10316_v39 = vld [vmem:[%s15491_s7 + $0xcd0] sm:$0xf0]  ;;  %v9333_v25 = vor.u32 %v10292_v29, %v9330_v4  ;;  %v9218_v4 = vld [vmem:[%s15491_s7 + $0xb4c] sm:$0xf0] }
 0x2e7   :  { %5878 = vmatmul.bf16.vlgmr.msrb.gmra.mxu1 %v12919_v32  ;;  %5962 = vmatmul.bf16.vlgmr.msra.gmra.mxu3 %v12802_v13  ;;  %v7965_v46 = vor.u32 %v9953_v61, %v7964_v35  ;;  %v8188_v35 = vld [vmem:[%s15491_s7 + $0x320] sm:$0xf]  ;;  %v10009_v61 = vld [vmem:[%s15491_s7 + $0x338] sm:$0xf0]  ;;  %v10264_v29 = vld [vmem:[%s15491_s7 + $0xb34] sm:$0xf] }
 0x2e8   :  { %5926 = vmatpush.bf16.msra.mxu1 %v9553_v44  ;;  %6010 = vmatpush.bf16.msrb.mxu3 %v9109_v43  ;;  %v8997_v44 = vor.u32 %v10208_v7, %v8994_v52  ;;  %v9413_v43 = vor.u32 %v10316_v39, %v9412_v37  ;;  %v9302_v7 = vld [vmem:[%s15491_s7 + $0xbf4] sm:$0xf0]  ;;  %v7852_v52 = vld [vmem:[%s15491_s7 + $0x80] sm:$0xf]  ;;  %v10110_v39 = vld [vmem:[%s15491_s7 + $0x664] sm:$0xf] }
 0x2e9   :  { %5920 = vmatmul.bf16.vlgmr.msra.gmra.mxu0 %v13408_v41 }
 0x2ea   :  { %5997 = vmatpush.bf16.msrb.mxu2 %v8857_v0  ;;  %5968 = vmatpush.bf16.msrb.mxu0 %v8437_v45  ;;  %v8745_v0 = vor.u32 %v10145_v60, %v8742_v48  ;;  %v8294_v45 = vld [vmem:[%s15491_s7 + $0x414] sm:$0xf0]  ;;  %v9384_v48 = vld [vmem:[%s15491_s7 + $0xc80] sm:$0xf] }
 0x2eb   :  { %v8297_v60 = vor.u32 %v10033_v26, %v8294_v45  ;;  %v9385_v2 = vor.u32 %v10309_v8, %v9384_v48  ;;  %v14177_v26 = vpop.f32.mrf.mxu2  ;;  %v14199_v48 = vpop.f32.mrf.mxu3 }
 0x2ec   :  { %5927 = vmatpush.bf16.msra.mxu1 %v9525_v24  ;;  %6011 = vmatpush.bf16.msrb.mxu3 %v9081_v49  ;;  %v10026_v24 = vld [vmem:[%s15491_s7 + $0x3c4] sm:$0xf]  ;;  %v7908_v49 = vld [vmem:[%s15491_s7 + $0xf0] sm:$0xf] }
 0x2ed   :  { %v7909_v9 = vor.u32 %v9939_v3, %v7908_v49  ;;  %v9246_v49 = vld [vmem:[%s15491_s7 + $0xb84] sm:$0xf0]  ;;  %v9911_v3 = vld [vmem:[%s15491_s7 + $0x28] sm:$0xf0] }
 0x2ee   :  { %5998 = vmatpush.bf16.msrb.mxu2 %v8829_v10  ;;  %5969 = vmatpush.bf16.msrb.mxu0 %v8409_v36  ;;  %v8717_v10 = vor.u32 %v10138_v18, %v8714_v34  ;;  %v8266_v36 = vld [vmem:[%s15491_s7 + $0x3dc] sm:$0xf0]  ;;  %v9356_v18 = vld [vmem:[%s15491_s7 + $0xc48] sm:$0xf]  ;;  %v10302_v34 = vld [vmem:[%s15491_s7 + $0xc60] sm:$0xf0] }
 0x2ef   :  { %v8269_v62 = vor.u32 %v10026_v24, %v8266_v36  ;;  %v10103_v24 = vld [vmem:[%s15491_s7 + $0x62c] sm:$0xf]  ;;  %v8574_v36 = vld [vmem:[%s15491_s7 + $0x644] sm:$0xf0] }
 0x2f0   :  { %5928 = vmatpush.bf16.msra.mxu1 %v9497_v5  ;;  %6012 = vmatpush.bf16.msrb.mxu3 %v9053_v11  ;;  %v8238_v5 = vld [vmem:[%s15491_s7 + $0x3a4] sm:$0xf0]  ;;  %v8658_v11 = vld [vmem:[%s15491_s7 + $0x6ec] sm:$0xf0] }
 0x2f1   :  { %v8241_v21 = vor.u32 %v10019_v56, %v8238_v5  ;;  %v8577_v56 = vor.u32 %v10103_v24, %v8574_v36  ;;  %v8888_v5 = vld [vmem:[%s15491_s7 + $0x898] sm:$0xf]  ;;  %v8804_v24 = vld [vmem:[%s15491_s7 + $0x7f0] sm:$0xf] }
 0x2f2   :  { %5999 = vmatpush.bf16.msrb.mxu2 %v8801_v50  ;;  %5970 = vmatpush.bf16.msrb.mxu0 %v8381_v6  ;;  %v9025_v50 = vor.u32 %v10215_v19, %v9022_v51  ;;  %v10187_v6 = vld [vmem:[%s15491_s7 + $0x8cc] sm:$0xf]  ;;  %v9357_v19 = vor.u32 %v10302_v34, %v9356_v18  ;;  %v9932_v51 = vld [vmem:[%s15491_s7 + $0xd0] sm:$0xf0]  ;;  %v8132_v18 = vld [vmem:[%s15491_s7 + $0x2b0] sm:$0xf] }
 0x2f3   :  { %v8913_v22 = vor.u32 %v10187_v6, %v8910_v12  ;;  %v7881_v23 = vor.u32 %v9932_v51, %v7880_v31  ;;  %v9995_v34 = vld [vmem:[%s15491_s7 + $0x2c8] sm:$0xf0]  ;;  %v10184_v6 = vld [vmem:[%s15491_s7 + $0x8b0] sm:$0xf0] }
 0x2f4   :  { %5929 = vmatpush.bf16.msra.mxu1 %v9469_v20  ;;  %6013 = vmatpush.bf16.msrb.mxu3 %v9025_v50  ;;  %v8216_v20 = vld [vmem:[%s15491_s7 + $0x358] sm:$0xf]  ;;  %v10096_v12 = vld [vmem:[%s15491_s7 + $0x5f4] sm:$0xf]  ;;  %v8889_v31 = vor.u32 %v10184_v6, %v8888_v5  ;;  %v9967_v6 = vld [vmem:[%s15491_s7 + $0x1e8] sm:$0xf0] }
 0x2f5   :  { %v8630_v50 = vld [vmem:[%s15491_s7 + $0x6b4] sm:$0xf0]  ;;  %v8217_v40 = vor.u32 %v10016_v30, %v8216_v20  ;;  %v9988_v51 = vld [vmem:[%s15491_s7 + $0x290] sm:$0xf0]  ;;  %v14252_v20 = vpop.f32.mrf.mxu2 }
 0x2f6   :  { %6000 = vmatpush.bf16.msrb.mxu2 %v8773_v47  ;;  %5971 = vmatpush.bf16.msrb.mxu0 %v8353_v42  ;;  %v8966_v47 = vld [vmem:[%s15491_s7 + $0x954] sm:$0xf0] }
 0x2f7   :  { %v8969_v38 = vor.u32 %v10201_v16, %v8966_v47  ;;  %v10278_v16 = vld [vmem:[%s15491_s7 + $0xba4] sm:$0xf]  ;;  %v9274_v47 = vld [vmem:[%s15491_s7 + $0xbbc] sm:$0xf0] }
 0x2f8   :  { %5930 = vmatpush.bf16.msra.mxu1 %v9441_v33  ;;  %6014 = vmatpush.bf16.msrb.mxu3 %v8997_v44  ;;  %v9925_v33 = vld [vmem:[%s15491_s7 + $0x98] sm:$0xf0]  ;;  %v8602_v44 = vld [vmem:[%s15491_s7 + $0x67c] sm:$0xf0] }
 0x2f9   :  { %v7853_v45 = vor.u32 %v9925_v33, %v7852_v52  ;;  %v8605_v8 = vor.u32 %v10110_v39, %v8602_v44  ;;  %v8076_v33 = vld [vmem:[%s15491_s7 + $0x240] sm:$0xf]  ;;  %v10170_v39 = vld [vmem:[%s15491_s7 + $0x840] sm:$0xf0] }
 0x2fa   :  { %6001 = vmatpush.bf16.msrb.mxu2 %v8745_v0  ;;  %5972 = vmatpush.bf16.msrb.mxu0 %v8325_v57  ;;  %v8938_v0 = vld [vmem:[%s15491_s7 + $0x91c] sm:$0xf0] }
 0x2fb   :  { %v8941_v15 = vor.u32 %v10194_v63, %v8938_v0  ;;  %v10271_v0 = vld [vmem:[%s15491_s7 + $0xb6c] sm:$0xf] }
 0x2fc   :  { %5931 = vmatpush.bf16.msra.mxu1 %v9413_v43  ;;  %6015 = vmatpush.bf16.msrb.mxu3 %v8969_v38  ;;  %v7824_v43 = vld [vmem:[%s15491_s7 + $0x48] sm:$0xf]  ;;  %v9277_v38 = vor.u32 %v10278_v16, %v9274_v47 }
 0x2fe   :  { %6002 = vmatpush.bf16.msrb.mxu2 %v8717_v10  ;;  %5973 = vmatpush.bf16.msrb.mxu0 %v8297_v60  ;;  %v10124_v10 = vld [vmem:[%s15491_s7 + $0x6d4] sm:$0xf]  ;;  %v10002_v60 = vld [vmem:[%s15491_s7 + $0x300] sm:$0xf0] }
 0x2ff   :  { %v8661_v42 = vor.u32 %v10124_v10, %v8658_v11  ;;  %v8161_v63 = vor.u32 %v10002_v60, %v8160_v58  ;;  %v8546_v10 = vld [vmem:[%s15491_s7 + $0x60c] sm:$0xf0]  ;;  %v5655_v58 = vpop.f32.mrf.mxu1 }
 0x300   :  { %5932 = vmatpush.bf16.msra.mxu1 %v9385_v2  ;;  %6016 = vmatpush.bf16.msrb.mxu3 %v8941_v15  ;;  %v7796_v2 = vld [vmem:[%s15491_s7 + $0x10] sm:$0xf]  ;;  %v9249_v15 = vor.u32 %v10271_v0, %v9246_v49  ;;  %v8549_v30 = vor.u32 %v10096_v12, %v8546_v10  ;;  %v10163_v0 = vld [vmem:[%s15491_s7 + $0x808] sm:$0xf0] }
 0x301   :  { %v7797_v11 = vor.u32 %v9911_v3, %v7796_v2  ;;  %v10075_v49 = vld [vmem:[%s15491_s7 + $0x54c] sm:$0xf]  ;;  %v8462_v2 = vld [vmem:[%s15491_s7 + $0x564] sm:$0xf0]  ;;  %v9554_v12 = vld [vmem:[%s15491_s7 + $0xdec] sm:$0xf0]  ;;  %v8805_v10 = vor.u32 %v10163_v0, %v8804_v24 }
 0x302   :  { %6003 = vmatpush.bf16.msrb.mxu2 %v8689_v27  ;;  %5974 = vmatpush.bf16.msrb.mxu0 %v8269_v62  ;;  %v10117_v27 = vld [vmem:[%s15491_s7 + $0x69c] sm:$0xf]  ;;  %v14226_v62 = vpop.f32.mrf.mxu0  ;;  %v8720_v24 = vld [vmem:[%s15491_s7 + $0x748] sm:$0xf] }
 0x303   :  { %v8633_v57 = vor.u32 %v10117_v27, %v8630_v50  ;;  %v10089_v27 = vld [vmem:[%s15491_s7 + $0x5bc] sm:$0xf]  ;;  %v8518_v50 = vld [vmem:[%s15491_s7 + $0x5d4] sm:$0xf0] }
 0x304   :  { %5933 = vmatpush.bf16.msra.mxu1 %v9357_v19  ;;  %6017 = vmatpush.bf16.msrb.mxu3 %v8913_v22  ;;  %v8104_v19 = vld [vmem:[%s15491_s7 + $0x278] sm:$0xf]  ;;  %v14263_v22 = vld [vmem:[%s15492_s8] sm:$0xff] }
 0x305   :  { %6004 = vmatmul.bf16.vlgmr.msrb.gmra.mxu2 %v13077_v14 }
 0x306   :  { %6052 = vmatpush.bf16.msra.mxu2 %v7993_v28  ;;  %v10285_v28 = vld [vmem:[%s15491_s7 + $0xbdc] sm:$0xf]  ;;  %5975 = vmatpush.bf16.msrb.mxu0 %v8241_v21  ;;  %v8860_v21 = vld [vmem:[%s15491_s7 + $0x860] sm:$0xf] }
 0x307   :  { %v9305_v37 = vor.u32 %v10285_v28, %v9302_v7  ;;  %5934 = vmatmul.bf16.vlgmr.msra.gmra.mxu1 %v13556_v17  ;;  %6018 = vmatmul.bf16.vlgmr.msrb.gmra.mxu3 %v13247_v1  ;;  %v10257_v28 = vld [vmem:[%s15491_s7 + $0xafc] sm:$0xf]  ;;  %v9190_v7 = vld [vmem:[%s15491_s7 + $0xb14] sm:$0xf0] }
 0x308   :  { %5982 = vmatpush.bf16.msrb.mxu1 %v8661_v42  ;;  %6066 = vmatpush.bf16.msra.mxu3 %v8217_v40  ;;  %v10177_v42 = vld [vmem:[%s15491_s7 + $0x878] sm:$0xf0]  ;;  %v8105_v40 = vor.u32 %v9988_v51, %v8104_v19  ;;  %v9193_v44 = vor.u32 %v10257_v28, %v9190_v7  ;;  %v10156_v19 = vld [vmem:[%s15491_s7 + $0x7d0] sm:$0xf0]  ;;  %v9112_v51 = vld [vmem:[%s15491_s7 + $0xa58] sm:$0xf] }
 0x309   :  { %5976 = vmatmul.bf16.vlgmr.msrb.gmra.mxu0 %v12947_v53  ;;  %v8861_v52 = vor.u32 %v10177_v42, %v8860_v21  ;;  %v9526_v28 = vld [vmem:[%s15491_s7 + $0xdb4] sm:$0xf0] }
 0x30a   :  { %6053 = vmatpush.bf16.msra.mxu2 %v7965_v46  ;;  %6024 = vmatpush.bf16.msra.mxu0 %v9333_v25  ;;  %v8189_v46 = vor.u32 %v10009_v61, %v8188_v35  ;;  %v9221_v25 = vor.u32 %v10264_v29, %v9218_v4  ;;  %v9981_v35 = vld [vmem:[%s15491_s7 + $0x258] sm:$0xf0]  ;;  %v3286_v61 = vperm.slane %v14263_v22, 0  ;;  %v14299_v16 = vpop.f32.mrf.mxu0  ;;  %v8776_v29 = vld [vmem:[%s15491_s7 + $0x7b8] sm:$0xf] }
 0x30b   :  { %v8077_v47 = vor.u32 %v9981_v35, %v8076_v33  ;;  %v8777_v7 = vor.u32 %v10156_v19, %v8776_v29  ;;  %v8412_v33 = vld [vmem:[%s15491_s7 + $0x4e0] sm:$0xf]  ;;  %v9028_v29 = vld [vmem:[%s15491_s7 + $0x9b0] sm:$0xf] }
 0x30c   :  { %5983 = vmatpush.bf16.msrb.mxu1 %v8633_v57  ;;  %6067 = vmatpush.bf16.msra.mxu3 %v8189_v46  ;;  %v8521_v57 = vor.u32 %v10089_v27, %v8518_v50  ;;  %v8490_v46 = vld [vmem:[%s15491_s7 + $0x59c] sm:$0xf0]  ;;  %v5614_v36 = vadd.f32 %v14177_v26, %v3286_v61  ;;  %v10243_v26 = vld [vmem:[%s15491_s7 + $0xa8c] sm:$0xf] }
 0x30d   :  { %v8748_v35 = vld [vmem:[%s15491_s7 + $0x780] sm:$0xf] }
 0x30e   :  { %6054 = vmatpush.bf16.msra.mxu2 %v7937_v59  ;;  %6025 = vmatpush.bf16.msra.mxu0 %v9305_v37  ;;  %v7825_v59 = vor.u32 %v9918_v55, %v7824_v43  ;;  %v8832_v37 = vld [vmem:[%s15491_s7 + $0x828] sm:$0xf]  ;;  %v10250_v43 = vld [vmem:[%s15491_s7 + $0xac4] sm:$0xf]  ;;  %v9162_v55 = vld [vmem:[%s15491_s7 + $0xadc] sm:$0xf0]  ;;  %v5628_v4 = vadd.f32 %v14199_v48, %v5614_v36 }
 0x30f   :  { %v8833_v60 = vor.u32 %v10170_v39, %v8832_v37  ;;  %v9165_v3 = vor.u32 %v10250_v43, %v9162_v55  ;;  %v10149_v37 = vld [vmem:[%s15491_s7 + $0x798] sm:$0xf0]  ;;  %v9084_v39 = vld [vmem:[%s15491_s7 + $0xa20] sm:$0xf] }
 0x310   :  { %5984 = vmatpush.bf16.msrb.mxu1 %v8605_v8  ;;  %6068 = vmatpush.bf16.msra.mxu3 %v8161_v63  ;;  %v8048_v8 = vld [vmem:[%s15491_s7 + $0x208] sm:$0xf]  ;;  %v9498_v55 = vld [vmem:[%s15491_s7 + $0xd7c] sm:$0xf0] }
 0x312   :  { %6055 = vmatpush.bf16.msra.mxu2 %v7909_v9  ;;  %6026 = vmatpush.bf16.msra.mxu0 %v9277_v38  ;;  %v8133_v9 = vor.u32 %v9995_v34, %v8132_v18  ;;  %v9974_v38 = vld [vmem:[%s15491_s7 + $0x220] sm:$0xf0]  ;;  %v9134_v18 = vld [vmem:[%s15491_s7 + $0xaa4] sm:$0xf0]  ;;  %v8020_v34 = vld [vmem:[%s15491_s7 + $0x1d0] sm:$0xf]  ;;  %v5697_v48 = vpop.f32.mrf.mxu0 }
 0x313   :  { %v8049_v5 = vor.u32 %v9974_v38, %v8048_v8  ;;  %v9137_v21 = vor.u32 %v10243_v26, %v9134_v18  ;;  %v8021_v27 = vor.u32 %v9967_v6, %v8020_v34  ;;  %v10058_v38 = vld [vmem:[%s15491_s7 + $0x4c0] sm:$0xf0]  ;;  %v10327_v34 = vld [vmem:[%s15491_s7 + $0xd2c] sm:$0xf] }
 0x314   :  { %5985 = vmatpush.bf16.msrb.mxu1 %v8577_v56  ;;  %6069 = vmatpush.bf16.msra.mxu3 %v8133_v9  ;;  %v10072_v9 = vld [vmem:[%s15491_s7 + $0x530] sm:$0xf0] }
 0x316   :  { %6056 = vmatpush.bf16.msra.mxu2 %v7881_v23  ;;  %6027 = vmatpush.bf16.msra.mxu0 %v9249_v15  ;;  %v14271_v23 = vpop.f32.mrf.mxu3  ;;  %v10348_v15 = vld [vmem:[%s15491_s7 + $0xdd4] sm:$0xf] }
 0x317   :  { %v9557_v42 = vor.u32 %v10348_v15, %v9554_v12  ;;  %v8692_v12 = vld [vmem:[%s15491_s7 + $0x710] sm:$0xf] }
 0x318   :  { %5986 = vmatpush.bf16.msrb.mxu1 %v8549_v30  ;;  %6070 = vmatpush.bf16.msra.mxu3 %v8105_v40  ;;  %v10240_v30 = vld [vmem:[%s15491_s7 + $0xa70] sm:$0xf0]  ;;  %v10341_v40 = vld [vmem:[%s15491_s7 + $0xd9c] sm:$0xf] }
 0x31a   :  { %6057 = vmatpush.bf16.msra.mxu2 %v7853_v45  ;;  %6028 = vmatpush.bf16.msra.mxu0 %v9221_v25  ;;  %v10082_v45 = vld [vmem:[%s15491_s7 + $0x584] sm:$0xf]  ;;  %v5642_v25 = vadd.f32 %v14226_v62, %v5628_v4  ;;  %v10065_v62 = vld [vmem:[%s15491_s7 + $0x4f8] sm:$0xf0]  ;;  %v10219_v4 = vld [vmem:[%s15491_s7 + $0x9c8] sm:$0xf0] }
 0x31b   :  { %v8493_v63 = vor.u32 %v10082_v45, %v8490_v46  ;;  %v5657_v45 = vpop.f32.mrf.mxu1  ;;  %v9529_v46 = vor.u32 %v10341_v40, %v9526_v28  ;;  %v9029_v40 = vor.u32 %v10219_v4, %v9028_v29  ;;  %v8328_v28 = vld [vmem:[%s15491_s7 + $0x438] sm:$0xf]  ;;  %v10299_v29 = vld [vmem:[%s15491_s7 + $0xc4c] sm:$0xf]  ;;  %v9358_v4 = vld [vmem:[%s15491_s7 + $0xc64] sm:$0xf0] }
 0x31c   :  { %5987 = vmatpush.bf16.msrb.mxu1 %v8521_v57  ;;  %6071 = vmatpush.bf16.msra.mxu3 %v8077_v47  ;;  %v5616_v57 = vadd.f32 %v14252_v20, %v3286_v61  ;;  %v5656_v47 = vadd.f32 %v5655_v58, %v5642_v25  ;;  %v8413_v20 = vor.u32 %v10065_v62, %v8412_v33  ;;  %v10334_v61 = vld [vmem:[%s15491_s7 + $0xd64] sm:$0xf]  ;;  %v8384_v58 = vld [vmem:[%s15491_s7 + $0x4a8] sm:$0xf] }
 0x31d   :  { %v8385_v18 = vor.u32 %v10058_v38, %v8384_v58  ;;  %v8972_v38 = vld [vmem:[%s15491_s7 + $0x940] sm:$0xf] }
 0x31e   :  { %6058 = vmatpush.bf16.msra.mxu2 %v7825_v59  ;;  %v14319_v59 = vpop.f32.mrf.mxu2  ;;  %6029 = vmatpush.bf16.msra.mxu0 %v9193_v44  ;;  %v14339_v56 = vpop.f32.mrf.mxu3  ;;  %v10233_v44 = vld [vmem:[%s15491_s7 + $0xa38] sm:$0xf0]  ;;  %v5630_v36 = vadd.f32 %v14271_v23, %v5616_v57  ;;  %v9501_v23 = vor.u32 %v10334_v61, %v9498_v55  ;;  %v10212_v57 = vld [vmem:[%s15491_s7 + $0x990] sm:$0xf0]  ;;  %v8300_v55 = vld [vmem:[%s15491_s7 + $0x400] sm:$0xf] }
 0x31f   :  { %v9085_v8 = vor.u32 %v10233_v44, %v9084_v39  ;;  %v9950_v39 = vld [vmem:[%s15491_s7 + $0x164] sm:$0xf]  ;;  %v7966_v44 = vld [vmem:[%s15491_s7 + $0x17c] sm:$0xf0] }
 0x320   :  { %5988 = vmatpush.bf16.msrb.mxu1 %v8493_v63  ;;  %6072 = vmatpush.bf16.msra.mxu3 %v8049_v5  ;;  %v5670_v63 = vadd.f32 %v14319_v59, %v5656_v47  ;;  %v5644_v59 = vadd.f32 %v14299_v16, %v5630_v36  ;;  %v9470_v5 = vld [vmem:[%s15491_s7 + $0xd44] sm:$0xf0]  ;;  %v8356_v16 = vld [vmem:[%s15491_s7 + $0x470] sm:$0xf]  ;;  %v7969_v58 = vor.u32 %v9950_v39, %v7966_v44  ;;  %v10013_v39 = vld [vmem:[%s15491_s7 + $0x35c] sm:$0xf] }
 0x321   :  { %v9473_v19 = vor.u32 %v10327_v34, %v9470_v5  ;;  %v3287_v34 = vperm.slane %v14263_v22, 1  ;;  %v8218_v44 = vld [vmem:[%s15491_s7 + $0x374] sm:$0xf0] }
 0x322   :  { %6059 = vmatpush.bf16.msra.mxu2 %v7797_v11  ;;  %v8440_v11 = vld [vmem:[%s15491_s7 + $0x518] sm:$0xf]  ;;  %6030 = vmatpush.bf16.msra.mxu0 %v9165_v3  ;;  %v10226_v3 = vld [vmem:[%s15491_s7 + $0xa00] sm:$0xf0]  ;;  %v5684_v26 = vadd.f32 %v14339_v56, %v5670_v63  ;;  %v10051_v56 = vld [vmem:[%s15491_s7 + $0x488] sm:$0xf0] }
 0x323   :  { %v8441_v50 = vor.u32 %v10072_v9, %v8440_v11  ;;  %v5699_v11 = vpop.f32.mrf.mxu0  ;;  %v10135_v9 = vld [vmem:[%s15491_s7 + $0x728] sm:$0xf0]  ;;  %v8357_v25 = vor.u32 %v10051_v56, %v8356_v16  ;;  %v8944_v56 = vld [vmem:[%s15491_s7 + $0x908] sm:$0xf] }
 0x324   :  { %6073 = vmatpush.bf16.msra.mxu3 %v8021_v27  ;;  %v9442_v27 = vld [vmem:[%s15491_s7 + $0xd0c] sm:$0xf0] }
 0x325   :  { %6060 = vmatmul.bf16.vlgmr.msra.gmra.mxu2 %v12844_v54 }
 0x326   :  { %6108 = vmatpush.bf16.msrb.mxu2 %v8889_v31  ;;  %v8465_v31 = vor.u32 %v10075_v49, %v8462_v2  ;;  %6031 = vmatpush.bf16.msra.mxu0 %v9137_v21  ;;  %v5671_v43 = vpop.f32.mrf.mxu2  ;;  %v5685_v0 = vpop.f32.mrf.mxu3  ;;  %v10142_v49 = vld [vmem:[%s15491_s7 + $0x760] sm:$0xf0]  ;;  %v9056_v2 = vld [vmem:[%s15491_s7 + $0x9e8] sm:$0xf]  ;;  %v5658_v21 = vadd.f32 %v5657_v45, %v5644_v59 }
 0x327   :  { %6074 = vmatmul.bf16.vlgmr.msra.gmra.mxu3 %v12802_v13  ;;  %v8721_v6 = vor.u32 %v10142_v49, %v8720_v24  ;;  %v9057_v15 = vor.u32 %v10226_v3, %v9056_v2  ;;  %v10205_v24 = vld [vmem:[%s15491_s7 + $0x958] sm:$0xf0]  ;;  %v7938_v49 = vld [vmem:[%s15491_s7 + $0x144] sm:$0xf0] }
 0x328   :  { %5989 = vmatpush.bf16.msrb.mxu1 %v8465_v31  ;;  %v5711_v31 = vpop.f32.mrf.mxu1  ;;  %v8973_v5 = vor.u32 %v10205_v24, %v8972_v38  ;;  %v8221_v38 = vor.u32 %v10013_v39, %v8218_v44  ;;  %v9308_v24 = vld [vmem:[%s15491_s7 + $0xbe0] sm:$0xf]  ;;  %v10181_v39 = vld [vmem:[%s15491_s7 + $0x89c] sm:$0xf]  ;;  %v8890_v44 = vld [vmem:[%s15491_s7 + $0x8b4] sm:$0xf0] }
 0x329   :  { %6032 = vmatmul.bf16.vlgmr.msra.gmra.mxu0 %v13408_v41 }
 0x32a   :  { %6109 = vmatpush.bf16.msrb.mxu2 %v8861_v52  ;;  %v9113_v52 = vor.u32 %v10240_v30, %v9112_v51  ;;  %6080 = vmatpush.bf16.msrb.mxu0 %v8441_v50  ;;  %v9957_v51 = vld [vmem:[%s15491_s7 + $0x19c] sm:$0xf]  ;;  %v7994_v30 = vld [vmem:[%s15491_s7 + $0x1b4] sm:$0xf0]  ;;  %v8693_v50 = vor.u32 %v10135_v9, %v8692_v12  ;;  %v10198_v12 = vld [vmem:[%s15491_s7 + $0x920] sm:$0xf0] }
 0x32b   :  { %5990 = vmatmul.bf16.vlgmr.msrb.gmra.mxu1 %v12919_v32  ;;  %v7997_v62 = vor.u32 %v9957_v51, %v7994_v30  ;;  %v5753_v3 = vpop.f32.mrf.mxu0  ;;  %v7910_v9 = vld [vmem:[%s15491_s7 + $0x10c] sm:$0xf0]  ;;  %v10023_v30 = vld [vmem:[%s15491_s7 + $0x3a8] sm:$0xf0] }
 0x32c   :  { %6038 = vmatpush.bf16.msra.mxu1 %v9557_v42  ;;  %6122 = vmatpush.bf16.msrb.mxu3 %v9113_v52  ;;  %v5672_v52 = vadd.f32 %v5671_v43, %v5658_v21  ;;  %v10313_v43 = vld [vmem:[%s15491_s7 + $0xcbc] sm:$0xf]  ;;  %v8244_v51 = vld [vmem:[%s15491_s7 + $0x390] sm:$0xf] }
 0x32d   :  { %v8916_v21 = vld [vmem:[%s15491_s7 + $0x8d0] sm:$0xf] }
 0x32e   :  { %6110 = vmatpush.bf16.msrb.mxu2 %v8833_v60  ;;  %v8749_v60 = vor.u32 %v10149_v37, %v8748_v35  ;;  %6081 = vmatpush.bf16.msrb.mxu0 %v8413_v20  ;;  %v5725_v33 = vpop.f32.mrf.mxu2  ;;  %v9000_v35 = vld [vmem:[%s15491_s7 + $0x978] sm:$0xf]  ;;  %v5686_v45 = vadd.f32 %v5685_v0, %v5672_v52  ;;  %v9943_v0 = vld [vmem:[%s15491_s7 + $0x12c] sm:$0xf]  ;;  %v10296_v52 = vld [vmem:[%s15491_s7 + $0xc30] sm:$0xf0] }
 0x32f   :  { %v9414_v20 = vld [vmem:[%s15491_s7 + $0xcd4] sm:$0xf0]  ;;  %v9001_v61 = vor.u32 %v10212_v57, %v9000_v35  ;;  %v7941_v16 = vor.u32 %v9943_v0, %v7938_v49  ;;  %v9361_v57 = vor.u32 %v10299_v29, %v9358_v4  ;;  %v7854_v49 = vld [vmem:[%s15491_s7 + $0x9c] sm:$0xf0]  ;;  %v7826_v29 = vld [vmem:[%s15491_s7 + $0x64] sm:$0xf0] }
 0x330   :  { %6039 = vmatpush.bf16.msra.mxu1 %v9529_v46  ;;  %6123 = vmatpush.bf16.msrb.mxu3 %v9085_v8  ;;  %v14482_v46 = vpop.f32.mrf.mxu3  ;;  %v5700_v8 = vadd.f32 %v5699_v11, %v5686_v45  ;;  %v5713_v36 = vpop.f32.mrf.mxu1  ;;  %v9417_v63 = vor.u32 %v10313_v43, %v9414_v20  ;;  %v9999_v4 = vld [vmem:[%s15491_s7 + $0x2ec] sm:$0xf] }
 0x332   :  { %6111 = vmatpush.bf16.msrb.mxu2 %v8805_v10  ;;  %v5698_v10 = vadd.f32 %v5697_v48, %v5684_v26  ;;  %6082 = vmatpush.bf16.msrb.mxu0 %v8385_v18  ;;  %v10320_v48 = vld [vmem:[%s15491_s7 + $0xcf4] sm:$0xf]  ;;  %v10306_v26 = vld [vmem:[%s15491_s7 + $0xc84] sm:$0xf]  ;;  %v9386_v18 = vld [vmem:[%s15491_s7 + $0xc9c] sm:$0xf0] }
 0x333   :  { %v9445_v37 = vor.u32 %v10320_v48, %v9442_v27  ;;  %v9389_v11 = vor.u32 %v10306_v26, %v9386_v18  ;;  %v10191_v48 = vld [vmem:[%s15491_s7 + $0x8e8] sm:$0xf0]  ;;  %v8664_v27 = vld [vmem:[%s15491_s7 + $0x6d8] sm:$0xf] }
 0x334   :  { %6040 = vmatpush.bf16.msra.mxu1 %v9501_v23  ;;  %v5712_v42 = vadd.f32 %v5711_v31, %v5698_v10  ;;  %6124 = vmatpush.bf16.msrb.mxu3 %v9057_v15  ;;  %v5714_v23 = vadd.f32 %v5713_v36, %v5700_v8  ;;  %v10030_v15 = vld [vmem:[%s15491_s7 + $0x3e0] sm:$0xf0]  ;;  %v9936_v10 = vld [vmem:[%s15491_s7 + $0xf4] sm:$0xf]  ;;  %v8917_v20 = vor.u32 %v10191_v48, %v8916_v21  ;;  %v5755_v8 = vpop.f32.mrf.mxu0  ;;  %v10289_v36 = vld [vmem:[%s15491_s7 + $0xbf8] sm:$0xf0] }
 0x335   :  { %v9309_v18 = vor.u32 %v10289_v36, %v9308_v24  ;;  %v9985_v24 = vld [vmem:[%s15491_s7 + $0x27c] sm:$0xf]  ;;  %v8106_v36 = vld [vmem:[%s15491_s7 + $0x294] sm:$0xf0] }
 0x336   :  { %6112 = vmatpush.bf16.msrb.mxu2 %v8777_v7  ;;  %v10044_v7 = vld [vmem:[%s15491_s7 + $0x450] sm:$0xf0]  ;;  %10357 = vtanh.f32 %v5712_v42  ;;  %6083 = vmatpush.bf16.msrb.mxu0 %v8357_v25  ;;  %v5727_v31 = vpop.f32.mrf.mxu2  ;;  %v5726_v42 = vadd.f32 %v5725_v33, %v3287_v34  ;;  %v8945_v25 = vor.u32 %v10198_v12, %v8944_v56  ;;  %v9929_v33 = vld [vmem:[%s15491_s7 + $0xbc] sm:$0xf]  ;;  %v9280_v56 = vld [vmem:[%s15491_s7 + $0xba8] sm:$0xf] }
 0x337   :  { %v8329_v47 = vor.u32 %v10044_v7, %v8328_v28  ;;  %10359 = vtanh.f32 %v5714_v23  ;;  %v7913_v28 = vor.u32 %v9936_v10, %v7910_v9  ;;  %v9336_v7 = vld [vmem:[%s15491_s7 + $0xc18] sm:$0xf]  ;;  %v5728_v26 = vadd.f32 %v5727_v31, %v3287_v34  ;;  %v10282_v34 = vld [vmem:[%s15491_s7 + $0xbc0] sm:$0xf0]  ;;  %v9915_v12 = vld [vmem:[%s15491_s7 + $0x4c] sm:$0xf] }
 0x338   :  { %6041 = vmatpush.bf16.msra.mxu1 %v9473_v19  ;;  %6125 = vmatpush.bf16.msrb.mxu3 %v9029_v40  ;;  %v5741_v40 = vpop.f32.mrf.mxu3  ;;  %v5767_v35 = vpop.f32.mrf.mxu1  ;;  %v8162_v31 = vld [vmem:[%s15491_s7 + $0x304] sm:$0xf0]  ;;  %v9281_v21 = vor.u32 %v10282_v34, %v9280_v56  ;;  %v7829_v48 = vor.u32 %v9915_v12, %v7826_v29  ;;  %v9978_v34 = vld [vmem:[%s15491_s7 + $0x244] sm:$0xf]  ;;  %v8078_v12 = vld [vmem:[%s15491_s7 + $0x25c] sm:$0xf0] }
 0x339   :  { %v5742_v10 = vadd.f32 %v5741_v40, %v5728_v26  ;;  %v10275_v40 = vld [vmem:[%s15491_s7 + $0xb88] sm:$0xf0]  ;;  %v10093_v26 = vld [vmem:[%s15491_s7 + $0x5d8] sm:$0xf0] }
 0x33a   :  { %6113 = vmatpush.bf16.msrb.mxu2 %v8749_v60  ;;  %v10037_v60 = vld [vmem:[%s15491_s7 + $0x418] sm:$0xf0]  ;;  %6084 = vmatpush.bf16.msrb.mxu0 %v8329_v47  ;;  %v8245_v47 = vor.u32 %v10023_v30, %v8244_v51 }
 0x33b   :  { %v8301_v59 = vor.u32 %v10037_v60, %v8300_v55  ;;  %v8636_v55 = vld [vmem:[%s15491_s7 + $0x6a0] sm:$0xf]  ;;  %v10121_v60 = vld [vmem:[%s15491_s7 + $0x6b8] sm:$0xf0]  ;;  %v5756_v30 = vadd.f32 %v5755_v8, %v5742_v10 }
 0x33c   :  { %6042 = vmatpush.bf16.msra.mxu1 %v9445_v37  ;;  %v10358_v2 = vpop.eup %10357  ;;  %6126 = vmatpush.bf16.msrb.mxu3 %v9001_v61  ;;  %v7882_v37 = vld [vmem:[%s15491_s7 + $0xd4] sm:$0xf0]  ;;  %v9337_v61 = vor.u32 %v10296_v52, %v9336_v7 }
 0x33d   :  { %6402 = vst [vmem:[#allocation2] sm:$0xff] %v10358_v2  ;;  %v10360_v45 = vpop.eup %10359  ;;  %v10006_v2 = vld [vmem:[%s15491_s7 + $0x324] sm:$0xf] }
 0x33e   :  { %6114 = vmatpush.bf16.msrb.mxu2 %v8721_v6  ;;  %v8272_v6 = vld [vmem:[%s15491_s7 + $0x3c8] sm:$0xf]  ;;  %6085 = vmatpush.bf16.msrb.mxu0 %v8301_v59  ;;  %6409 = vst [vmem:[#allocation2 + $0x38] sm:$0xff] %v10360_v45  ;;  %v5781_v23 = vpop.f32.mrf.mxu2  ;;  %v8637_v59 = vor.u32 %v10121_v60, %v8636_v55  ;;  %v9224_v55 = vld [vmem:[%s15491_s7 + $0xb38] sm:$0xf] }
 0x33f   :  { %v8273_v19 = vor.u32 %v10030_v15, %v8272_v6  ;;  %v10114_v6 = vld [vmem:[%s15491_s7 + $0x680] sm:$0xf0]  ;;  %v10268_v60 = vld [vmem:[%s15491_s7 + $0xb50] sm:$0xf0] }
 0x340   :  { %6043 = vmatpush.bf16.msra.mxu1 %v9417_v63  ;;  %6127 = vmatpush.bf16.msrb.mxu3 %v8973_v5  ;;  %v9922_v63 = vld [vmem:[%s15491_s7 + $0x84] sm:$0xf]  ;;  %v8608_v5 = vld [vmem:[%s15491_s7 + $0x668] sm:$0xf]  ;;  %v5769_v9 = vpop.f32.mrf.mxu1 }
 0x341   :  { %v7857_v15 = vor.u32 %v9922_v63, %v7854_v49  ;;  %v8609_v51 = vor.u32 %v10114_v6, %v8608_v5  ;;  %v5770_v7 = vadd.f32 %v5769_v9, %v5756_v30  ;;  %v10174_v49 = vld [vmem:[%s15491_s7 + $0x864] sm:$0xf]  ;;  %v8109_v5 = vor.u32 %v9985_v24, %v8106_v36  ;;  %v9196_v6 = vld [vmem:[%s15491_s7 + $0xb00] sm:$0xf]  ;;  %v8834_v9 = vld [vmem:[%s15491_s7 + $0x844] sm:$0xf0] }
 0x342   :  { %6115 = vmatpush.bf16.msrb.mxu2 %v8693_v50  ;;  %v10128_v50 = vld [vmem:[%s15491_s7 + $0x6f0] sm:$0xf0]  ;;  %6086 = vmatpush.bf16.msrb.mxu0 %v8273_v19  ;;  %v5795_v19 = vpop.f32.mrf.mxu3  ;;  %v9168_v30 = vld [vmem:[%s15491_s7 + $0xac8] sm:$0xf]  ;;  %v9114_v24 = vld [vmem:[%s15491_s7 + $0xa74] sm:$0xf0] }
 0x343   :  { %v8665_v43 = vor.u32 %v10128_v50, %v8664_v27  ;;  %v8165_v27 = vor.u32 %v9999_v4, %v8162_v31  ;;  %v9252_v50 = vld [vmem:[%s15491_s7 + $0xb70] sm:$0xf]  ;;  %v8496_v4 = vld [vmem:[%s15491_s7 + $0x588] sm:$0xf]  ;;  %v10086_v31 = vld [vmem:[%s15491_s7 + $0x5a0] sm:$0xf0] }
 0x344   :  { %6044 = vmatpush.bf16.msra.mxu1 %v9389_v11  ;;  %6128 = vmatpush.bf16.msrb.mxu3 %v8945_v25  ;;  %v10107_v25 = vld [vmem:[%s15491_s7 + $0x648] sm:$0xf0]  ;;  %v9253_v45 = vor.u32 %v10275_v40, %v9252_v50  ;;  %v10160_v50 = vld [vmem:[%s15491_s7 + $0x7f4] sm:$0xf]  ;;  %v8806_v40 = vld [vmem:[%s15491_s7 + $0x80c] sm:$0xf0] }
 0x345   :  { %6116 = vmatmul.bf16.vlgmr.msrb.gmra.mxu2 %v13077_v14 }
 0x346   :  { %6164 = vmatpush.bf16.msra.mxu2 %v7997_v62  ;;  %v5740_v62 = vadd.f32 %v14482_v46, %v5726_v42  ;;  %6087 = vmatpush.bf16.msrb.mxu0 %v8245_v47  ;;  %v8580_v42 = vld [vmem:[%s15491_s7 + $0x630] sm:$0xf]  ;;  %v8552_v47 = vld [vmem:[%s15491_s7 + $0x5f8] sm:$0xf] }
 0x348   :  { %v5754_v46 = vadd.f32 %v5753_v3, %v5740_v62  ;;  %6045 = vmatpush.bf16.msra.mxu1 %v9361_v57  ;;  %v8190_v3 = vld [vmem:[%s15491_s7 + $0x33c] sm:$0xf0]  ;;  %6129 = vmatpush.bf16.msrb.mxu3 %v8917_v20  ;;  %v9992_v62 = vld [vmem:[%s15491_s7 + $0x2b4] sm:$0xf]  ;;  %v5809_v57 = vpop.f32.mrf.mxu0  ;;  %v5823_v63 = vpop.f32.mrf.mxu1 }
 0x349   :  { %6088 = vmatmul.bf16.vlgmr.msrb.gmra.mxu0 %v12947_v53 }
 0x34a   :  { %6165 = vmatpush.bf16.msra.mxu2 %v7969_v58  ;;  %v7885_v58 = vor.u32 %v9929_v33, %v7882_v37  ;;  %v5768_v0 = vadd.f32 %v5767_v35, %v5754_v46  ;;  %6136 = vmatpush.bf16.msra.mxu0 %v9337_v61  ;;  %v7798_v33 = vld [vmem:[%s15491_s7 + $0x2c] sm:$0xf0]  ;;  %v8581_v37 = vor.u32 %v10107_v25, %v8580_v42  ;;  %v5783_v46 = vpop.f32.mrf.mxu2  ;;  %v9971_v42 = vld [vmem:[%s15491_s7 + $0x20c] sm:$0xf] }
 0x34b   :  { %6046 = vmatmul.bf16.vlgmr.msra.gmra.mxu1 %v13556_v17  ;;  %6130 = vmatmul.bf16.vlgmr.msrb.gmra.mxu3 %v13247_v1  ;;  %v8134_v35 = vld [vmem:[%s15491_s7 + $0x2cc] sm:$0xf0]  ;;  %v5784_v8 = vadd.f32 %v5783_v46, %v5770_v7  ;;  %v8497_v7 = vor.u32 %v10086_v31, %v8496_v4  ;;  %v10352_v46 = vld [vmem:[%s15491_s7 + $0xdf0] sm:$0xf0]  ;;  %v10055_v4 = vld [vmem:[%s15491_s7 + $0x4ac] sm:$0xf] }
 0x34c   :  { %6094 = vmatpush.bf16.msrb.mxu1 %v8665_v43  ;;  %6178 = vmatpush.bf16.msra.mxu3 %v8221_v38  ;;  %v5782_v11 = vadd.f32 %v5781_v23, %v5768_v0  ;;  %v10100_v43 = vld [vmem:[%s15491_s7 + $0x610] sm:$0xf0]  ;;  %v8137_v61 = vor.u32 %v9992_v62, %v8134_v35  ;;  %v8893_v38 = vor.u32 %v10181_v39, %v8890_v44  ;;  %v9140_v62 = vld [vmem:[%s15491_s7 + $0xa90] sm:$0xf]  ;;  %v10247_v39 = vld [vmem:[%s15491_s7 + $0xaa8] sm:$0xf0] }
 0x34d   :  { %v8553_v0 = vor.u32 %v10100_v43, %v8552_v47  ;;  %v9225_v23 = vor.u32 %v10268_v60, %v9224_v55  ;;  %v9964_v44 = vld [vmem:[%s15491_s7 + $0x1d4] sm:$0xf]  ;;  %v9560_v43 = vld [vmem:[%s15491_s7 + $0xdd8] sm:$0xf]  ;;  %v10153_v60 = vld [vmem:[%s15491_s7 + $0x7bc] sm:$0xf]  ;;  %v9141_v36 = vor.u32 %v10247_v39, %v9140_v62 }
 0x34e   :  { %6166 = vmatpush.bf16.msra.mxu2 %v7941_v16  ;;  %v8193_v16 = vor.u32 %v10006_v2, %v8190_v3  ;;  %6137 = vmatpush.bf16.msra.mxu0 %v9309_v18  ;;  %v5796_v52 = vadd.f32 %v5795_v19, %v5782_v11  ;;  %v8862_v2 = vld [vmem:[%s15491_s7 + $0x87c] sm:$0xf0]  ;;  %v5797_v18 = vpop.f32.mrf.mxu3  ;;  %v10167_v11 = vld [vmem:[%s15491_s7 + $0x82c] sm:$0xf]  ;;  %v8442_v55 = vld [vmem:[%s15491_s7 + $0x534] sm:$0xf0] }
 0x34f   :  { %v5798_v56 = vadd.f32 %v5797_v18, %v5784_v8  ;;  %v8414_v18 = vld [vmem:[%s15491_s7 + $0x4fc] sm:$0xf0]  ;;  %v8386_v31 = vld [vmem:[%s15491_s7 + $0x4c4] sm:$0xf0]  ;;  %v10216_v62 = vld [vmem:[%s15491_s7 + $0x9b4] sm:$0xf] }
 0x350   :  { %6095 = vmatpush.bf16.msrb.mxu1 %v8637_v59  ;;  %6179 = vmatpush.bf16.msra.mxu3 %v8193_v16  ;;  %v8524_v59 = vld [vmem:[%s15491_s7 + $0x5c0] sm:$0xf]  ;;  %v8865_v16 = vor.u32 %v10174_v49, %v8862_v2  ;;  %v5811_v19 = vpop.f32.mrf.mxu0  ;;  %v9961_v39 = vld [vmem:[%s15491_s7 + $0x1b8] sm:$0xf0] }
 0x351   :  { %v8525_v10 = vor.u32 %v10093_v26, %v8524_v59  ;;  %v5812_v25 = vadd.f32 %v5811_v19, %v5798_v56  ;;  %v9532_v2 = vld [vmem:[%s15491_s7 + $0xda0] sm:$0xf]  ;;  %v10062_v26 = vld [vmem:[%s15491_s7 + $0x4e4] sm:$0xf]  ;;  %v10139_v19 = vld [vmem:[%s15491_s7 + $0x74c] sm:$0xf] }
 0x352   :  { %6167 = vmatpush.bf16.msra.mxu2 %v7913_v28  ;;  %v9908_v28 = vld [vmem:[%s15491_s7 + $0x14] sm:$0xf]  ;;  %6138 = vmatpush.bf16.msra.mxu0 %v9281_v21  ;;  %v10254_v21 = vld [vmem:[%s15491_s7 + $0xae0] sm:$0xf0] }
 0x353   :  { %v7801_v20 = vor.u32 %v9908_v28, %v7798_v33  ;;  %v5825_v28 = vpop.f32.mrf.mxu1  ;;  %v10079_v33 = vld [vmem:[%s15491_s7 + $0x568] sm:$0xf0] }
 0x354   :  { %6096 = vmatpush.bf16.msrb.mxu1 %v8609_v51  ;;  %6180 = vmatpush.bf16.msra.mxu3 %v8165_v27  ;;  %v8081_v51 = vor.u32 %v9978_v34, %v8078_v12  ;;  %v8050_v27 = vld [vmem:[%s15491_s7 + $0x224] sm:$0xf0]  ;;  %v8417_v12 = vor.u32 %v10062_v26, %v8414_v18  ;;  %v10202_v18 = vld [vmem:[%s15491_s7 + $0x944] sm:$0xf] }
 0x355   :  { %v8053_v47 = vor.u32 %v9971_v42, %v8050_v27  ;;  %v10331_v27 = vld [vmem:[%s15491_s7 + $0xd48] sm:$0xf0] }
 0x356   :  { %6168 = vmatpush.bf16.msra.mxu2 %v7885_v58  ;;  %v5810_v58 = vadd.f32 %v5809_v57, %v5796_v52  ;;  %6139 = vmatpush.bf16.msra.mxu0 %v9253_v45  ;;  %v8468_v52 = vld [vmem:[%s15491_s7 + $0x550] sm:$0xf]  ;;  %v5826_v57 = vadd.f32 %v5825_v28, %v5812_v25  ;;  %v8389_v25 = vor.u32 %v10055_v4, %v8386_v31  ;;  %v10048_v28 = vld [vmem:[%s15491_s7 + $0x474] sm:$0xf] }
 0x357   :  { %v8022_v45 = vld [vmem:[%s15491_s7 + $0x1ec] sm:$0xf0]  ;;  %v8469_v8 = vor.u32 %v10079_v33, %v8468_v52  ;;  %v10132_v52 = vld [vmem:[%s15491_s7 + $0x714] sm:$0xf] }
 0x358   :  { %6097 = vmatpush.bf16.msrb.mxu1 %v8581_v37  ;;  %v5824_v3 = vadd.f32 %v5823_v63, %v5810_v58  ;;  %6181 = vmatpush.bf16.msra.mxu3 %v8137_v61  ;;  %v9169_v37 = vor.u32 %v10254_v21, %v9168_v30  ;;  %v10069_v61 = vld [vmem:[%s15491_s7 + $0x51c] sm:$0xf]  ;;  %v8778_v58 = vld [vmem:[%s15491_s7 + $0x7d4] sm:$0xf0]  ;;  %v9561_v63 = vor.u32 %v10352_v46, %v9560_v43  ;;  %v10223_v30 = vld [vmem:[%s15491_s7 + $0x9ec] sm:$0xf]  ;;  %v5865_v4 = vpop.f32.mrf.mxu0 }
 0x359   :  { %v8445_v49 = vor.u32 %v10069_v61, %v8442_v55  ;;  %v9058_v21 = vld [vmem:[%s15491_s7 + $0xa04] sm:$0xf0]  ;;  %v8694_v33 = vld [vmem:[%s15491_s7 + $0x72c] sm:$0xf0]  ;;  %v8330_v61 = vld [vmem:[%s15491_s7 + $0x454] sm:$0xf0]  ;;  %v5837_v55 = vpop.f32.mrf.mxu2 }
 0x35a   :  { %6169 = vmatpush.bf16.msra.mxu2 %v7857_v15  ;;  %v10261_v15 = vld [vmem:[%s15491_s7 + $0xb18] sm:$0xf0]  ;;  %10361 = vtanh.f32 %v5824_v3  ;;  %6140 = vmatpush.bf16.msra.mxu0 %v9225_v23  ;;  %v8781_v23 = vor.u32 %v10153_v60, %v8778_v58  ;;  %v8697_v43 = vor.u32 %v10132_v52, %v8694_v33  ;;  %v9002_v58 = vld [vmem:[%s15491_s7 + $0x994] sm:$0xf0] }
 0x35b   :  { %v9197_v29 = vor.u32 %v10261_v15, %v9196_v6  ;;  %10363 = vtanh.f32 %v5826_v57  ;;  %v10345_v3 = vld [vmem:[%s15491_s7 + $0xdb8] sm:$0xf0]  ;;  %v8750_v6 = vld [vmem:[%s15491_s7 + $0x79c] sm:$0xf0]  ;;  %v10230_v15 = vld [vmem:[%s15491_s7 + $0xa24] sm:$0xf] }
 0x35c   :  { %6098 = vmatpush.bf16.msrb.mxu1 %v8553_v0  ;;  %6182 = vmatpush.bf16.msra.mxu3 %v8109_v5  ;;  %v8025_v0 = vor.u32 %v9964_v44, %v8022_v45  ;;  %v10146_v5 = vld [vmem:[%s15491_s7 + $0x784] sm:$0xf]  ;;  %v9533_v34 = vor.u32 %v10345_v3, %v9532_v2  ;;  %v9448_v45 = vld [vmem:[%s15491_s7 + $0xcf8] sm:$0xf] }
 0x35d   :  { %v10034_v3 = vld [vmem:[%s15491_s7 + $0x404] sm:$0xf] }
 0x35e   :  { %6170 = vmatpush.bf16.msra.mxu2 %v7829_v48  ;;  %v8837_v48 = vor.u32 %v10167_v11, %v8834_v9  ;;  %6141 = vmatpush.bf16.msra.mxu0 %v9197_v29  ;;  %v10338_v11 = vld [vmem:[%s15491_s7 + $0xd80] sm:$0xf0]  ;;  %v8753_v9 = vor.u32 %v10146_v5, %v8750_v6  ;;  %v8974_v5 = vld [vmem:[%s15491_s7 + $0x95c] sm:$0xf0] }
 0x360   :  { %6099 = vmatpush.bf16.msrb.mxu1 %v8525_v10  ;;  %v10362_v35 = vpop.eup %10361  ;;  %6183 = vmatpush.bf16.msra.mxu3 %v8081_v51  ;;  %v9504_v10 = vld [vmem:[%s15491_s7 + $0xd68] sm:$0xf] }
 0x361   :  { %6403 = vst [vmem:[#allocation2 + $0x8] sm:$0xff] %v10362_v35  ;;  %v10364_v56 = vpop.eup %10363  ;;  %v8722_v51 = vld [vmem:[%s15491_s7 + $0x764] sm:$0xf0]  ;;  %v9505_v42 = vor.u32 %v10338_v11, %v9504_v10  ;;  %v9030_v35 = vld [vmem:[%s15491_s7 + $0x9cc] sm:$0xf0]  ;;  %v3288_v10 = vperm.slane %v14263_v22, 2  ;;  %v8977_v11 = vor.u32 %v10202_v18, %v8974_v5 }
 0x362   :  { %6171 = vmatpush.bf16.msra.mxu2 %v7801_v20  ;;  %v8809_v20 = vor.u32 %v10160_v50, %v8806_v40  ;;  %6142 = vmatpush.bf16.msra.mxu0 %v9169_v37  ;;  %6410 = vst [vmem:[#allocation2 + $0x40] sm:$0xff] %v10364_v56  ;;  %v8725_v50 = vor.u32 %v10139_v19, %v8722_v51  ;;  %v8000_v37 = vld [vmem:[%s15491_s7 + $0x1a0] sm:$0xf]  ;;  %v10195_v19 = vld [vmem:[%s15491_s7 + $0x90c] sm:$0xf] }
 0x363   :  { %v9061_v40 = vor.u32 %v10223_v30, %v9058_v21  ;;  %v9033_v46 = vor.u32 %v10216_v62, %v9030_v35  ;;  %v8001_v60 = vor.u32 %v9961_v39, %v8000_v37  ;;  %v8946_v51 = vld [vmem:[%s15491_s7 + $0x924] sm:$0xf0]  ;;  %v7916_v30 = vld [vmem:[%s15491_s7 + $0xf8] sm:$0xf]  ;;  %v5838_v52 = vadd.f32 %v5837_v55, %v3288_v10  ;;  %v8918_v62 = vld [vmem:[%s15491_s7 + $0x8ec] sm:$0xf0] }
 0x364   :  { %6100 = vmatpush.bf16.msrb.mxu1 %v8497_v7  ;;  %6184 = vmatpush.bf16.msra.mxu3 %v8053_v47  ;;  %v8358_v7 = vld [vmem:[%s15491_s7 + $0x48c] sm:$0xf0]  ;;  %v10324_v47 = vld [vmem:[%s15491_s7 + $0xd10] sm:$0xf0]  ;;  %v8949_v33 = vor.u32 %v10195_v19, %v8946_v51  ;;  %v10125_v35 = vld [vmem:[%s15491_s7 + $0x6dc] sm:$0xf]  ;;  %v5879_v37 = vpop.f32.mrf.mxu1 }
 0x365   :  { %6172 = vmatmul.bf16.vlgmr.msra.gmra.mxu2 %v12844_v54  ;;  %v8361_v44 = vor.u32 %v10048_v28, %v8358_v7  ;;  %v8246_v28 = vld [vmem:[%s15491_s7 + $0x3ac] sm:$0xf0]  ;;  %v10188_v7 = vld [vmem:[%s15491_s7 + $0x8d4] sm:$0xf]  ;;  %v10017_v55 = vld [vmem:[%s15491_s7 + $0x378] sm:$0xf0] }
 0x366   :  { %6220 = vmatpush.bf16.msrb.mxu2 %v8893_v38  ;;  %v10237_v38 = vld [vmem:[%s15491_s7 + $0xa5c] sm:$0xf]  ;;  %6143 = vmatpush.bf16.msra.mxu0 %v9141_v36  ;;  %v9954_v36 = vld [vmem:[%s15491_s7 + $0x180] sm:$0xf0]  ;;  %v8196_v5 = vld [vmem:[%s15491_s7 + $0x328] sm:$0xf] }
 0x367   :  { %v9117_v59 = vor.u32 %v10237_v38, %v9114_v24  ;;  %v9449_v38 = vor.u32 %v10324_v47, %v9448_v45  ;;  %v7972_v24 = vld [vmem:[%s15491_s7 + $0x168] sm:$0xf]  ;;  %v9338_v45 = vld [vmem:[%s15491_s7 + $0xc34] sm:$0xf0]  ;;  %v7888_v47 = vld [vmem:[%s15491_s7 + $0xc0] sm:$0xf] }
 0x368   :  { %6101 = vmatpush.bf16.msrb.mxu1 %v8469_v8  ;;  %6185 = vmatpush.bf16.msra.mxu3 %v8025_v0  ;;  %v10209_v8 = vld [vmem:[%s15491_s7 + $0x97c] sm:$0xf]  ;;  %v9420_v0 = vld [vmem:[%s15491_s7 + $0xcc0] sm:$0xf]  ;;  %v7973_v26 = vor.u32 %v9954_v36, %v7972_v24  ;;  %v8921_v24 = vor.u32 %v10188_v7, %v8918_v62  ;;  %v9926_v18 = vld [vmem:[%s15491_s7 + $0xa0] sm:$0xf0] }
 0x369   :  { %6144 = vmatmul.bf16.vlgmr.msra.gmra.mxu0 %v13408_v41  ;;  %v9005_v2 = vor.u32 %v10209_v8, %v9002_v58  ;;  %v10279_v22 = vld [vmem:[%s15491_s7 + $0xbac] sm:$0xf]  ;;  %v8582_v7 = vld [vmem:[%s15491_s7 + $0x64c] sm:$0xf0]  ;;  %v10272_v62 = vld [vmem:[%s15491_s7 + $0xb74] sm:$0xf] }
 0x36a   :  { %6221 = vmatpush.bf16.msrb.mxu2 %v8865_v16  ;;  %v9086_v16 = vld [vmem:[%s15491_s7 + $0xa3c] sm:$0xf0]  ;;  %6192 = vmatpush.bf16.msrb.mxu0 %v8445_v49  ;;  %v10317_v49 = vld [vmem:[%s15491_s7 + $0xcd8] sm:$0xf0] }
 0x36b   :  { %v9089_v29 = vor.u32 %v10230_v15, %v9086_v16  ;;  %6102 = vmatmul.bf16.vlgmr.msrb.gmra.mxu1 %v12919_v32  ;;  %6186 = vmatmul.bf16.vlgmr.msra.gmra.mxu3 %v12802_v13  ;;  %v9421_v6 = vor.u32 %v10317_v49, %v9420_v0  ;;  %v7944_v15 = vld [vmem:[%s15491_s7 + $0x130] sm:$0xf]  ;;  %v9947_v16 = vld [vmem:[%s15491_s7 + $0x148] sm:$0xf0]  ;;  %v8638_v0 = vld [vmem:[%s15491_s7 + $0x6bc] sm:$0xf0] }
 0x36c   :  { %6150 = vmatpush.bf16.msra.mxu1 %v9561_v63  ;;  %6234 = vmatpush.bf16.msrb.mxu3 %v9117_v59  ;;  %v5851_v59 = vpop.f32.mrf.mxu3  ;;  %v7945_v31 = vor.u32 %v9947_v16, %v7944_v15  ;;  %v5867_v16 = vpop.f32.mrf.mxu0 }
 0x36e   :  { %6222 = vmatpush.bf16.msrb.mxu2 %v8837_v48  ;;  %6193 = vmatpush.bf16.msrb.mxu0 %v8417_v12  ;;  %v9476_v48 = vld [vmem:[%s15491_s7 + $0xd30] sm:$0xf]  ;;  %v10310_v12 = vld [vmem:[%s15491_s7 + $0xca0] sm:$0xf0] }
 0x36f   :  { %v9477_v57 = vor.u32 %v10331_v27, %v9476_v48  ;;  %v10303_v48 = vld [vmem:[%s15491_s7 + $0xc68] sm:$0xf0]  ;;  %v5839_v27 = vpop.f32.mrf.mxu2 }
 0x370   :  { %6151 = vmatpush.bf16.msra.mxu1 %v9533_v34  ;;  %6235 = vmatpush.bf16.msrb.mxu3 %v9089_v29  ;;  %v9392_v34 = vld [vmem:[%s15491_s7 + $0xc88] sm:$0xf] }
 0x371   :  { %v8274_v29 = vld [vmem:[%s15491_s7 + $0x3e4] sm:$0xf0]  ;;  %v9393_v21 = vor.u32 %v10310_v12, %v9392_v34  ;;  %v5840_v34 = vadd.f32 %v5839_v27, %v3288_v10 }
 0x372   :  { %6223 = vmatpush.bf16.msrb.mxu2 %v8809_v20  ;;  %6194 = vmatpush.bf16.msrb.mxu0 %v8389_v25  ;;  %v10041_v20 = vld [vmem:[%s15491_s7 + $0x43c] sm:$0xf]  ;;  %v9364_v25 = vld [vmem:[%s15491_s7 + $0xc50] sm:$0xf]  ;;  %v9282_v10 = vld [vmem:[%s15491_s7 + $0xbc4] sm:$0xf0] }
 0x373   :  { %v8333_v63 = vor.u32 %v10041_v20, %v8330_v61  ;;  %v9933_v20 = vld [vmem:[%s15491_s7 + $0xd8] sm:$0xf0]  ;;  %v8224_v61 = vld [vmem:[%s15491_s7 + $0x360] sm:$0xf] }
 0x374   :  { %6152 = vmatpush.bf16.msra.mxu1 %v9505_v42  ;;  %6236 = vmatpush.bf16.msrb.mxu3 %v9061_v40  ;;  %v9940_v42 = vld [vmem:[%s15491_s7 + $0x110] sm:$0xf0]  ;;  %v7889_v49 = vor.u32 %v9933_v20, %v7888_v47  ;;  %v8896_v20 = vld [vmem:[%s15491_s7 + $0x8a0] sm:$0xf] }
 0x375   :  { %v10020_v40 = vld [vmem:[%s15491_s7 + $0x394] sm:$0xf]  ;;  %v7917_v39 = vor.u32 %v9940_v42, %v7916_v30  ;;  %v9919_v30 = vld [vmem:[%s15491_s7 + $0x68] sm:$0xf0] }
 0x376   :  { %6224 = vmatpush.bf16.msrb.mxu2 %v8781_v23  ;;  %6195 = vmatpush.bf16.msrb.mxu0 %v8361_v44  ;;  %v8302_v23 = vld [vmem:[%s15491_s7 + $0x41c] sm:$0xf0]  ;;  %v10293_v44 = vld [vmem:[%s15491_s7 + $0xc1c] sm:$0xf]  ;;  %v8249_v8 = vor.u32 %v10020_v40, %v8246_v28  ;;  %v10003_v42 = vld [vmem:[%s15491_s7 + $0x308] sm:$0xf0]  ;;  %v9285_v40 = vor.u32 %v10279_v22, %v9282_v10 }
 0x377   :  { %v8305_v56 = vor.u32 %v10034_v3, %v8302_v23  ;;  %v9341_v36 = vor.u32 %v10293_v44, %v9338_v45  ;;  %v10286_v3 = vld [vmem:[%s15491_s7 + $0xbe4] sm:$0xf]  ;;  %v9310_v23 = vld [vmem:[%s15491_s7 + $0xbfc] sm:$0xf0]  ;;  %v5893_v15 = vpop.f32.mrf.mxu2  ;;  %v10104_v28 = vld [vmem:[%s15491_s7 + $0x634] sm:$0xf] }
 0x378   :  { %6153 = vmatpush.bf16.msra.mxu1 %v9477_v57  ;;  %6237 = vmatpush.bf16.msrb.mxu3 %v9033_v46  ;;  %v8666_v57 = vld [vmem:[%s15491_s7 + $0x6f4] sm:$0xf0]  ;;  %v9365_v46 = vor.u32 %v10303_v48, %v9364_v25  ;;  %v9313_v12 = vor.u32 %v10286_v3, %v9310_v23  ;;  %v5881_v48 = vpop.f32.mrf.mxu1  ;;  %v9912_v44 = vld [vmem:[%s15491_s7 + $0x30] sm:$0xf0]  ;;  %v8112_v3 = vld [vmem:[%s15491_s7 + $0x280] sm:$0xf] }
 0x379   :  { %v8669_v58 = vor.u32 %v10125_v35, %v8666_v57  ;;  %v9254_v35 = vld [vmem:[%s15491_s7 + $0xb8c] sm:$0xf0]  ;;  %v7804_v57 = vld [vmem:[%s15491_s7 + $0x18] sm:$0xf]  ;;  %v9996_v47 = vld [vmem:[%s15491_s7 + $0x2d0] sm:$0xf0] }
 0x37a   :  { %6225 = vmatpush.bf16.msrb.mxu2 %v8753_v9  ;;  %6196 = vmatpush.bf16.msrb.mxu0 %v8333_v63  ;;  %v10027_v9 = vld [vmem:[%s15491_s7 + $0x3cc] sm:$0xf]  ;;  %v10118_v63 = vld [vmem:[%s15491_s7 + $0x6a4] sm:$0xf]  ;;  %v8140_v45 = vld [vmem:[%s15491_s7 + $0x2b8] sm:$0xf] }
 0x37b   :  { %v9989_v23 = vld [vmem:[%s15491_s7 + $0x298] sm:$0xf0]  ;;  %v8084_v22 = vld [vmem:[%s15491_s7 + $0x248] sm:$0xf]  ;;  %v9982_v10 = vld [vmem:[%s15491_s7 + $0x260] sm:$0xf0] }
 0x37c   :  { %6154 = vmatpush.bf16.msra.mxu1 %v9449_v38  ;;  %6238 = vmatpush.bf16.msrb.mxu3 %v9005_v2  ;;  %v8225_v2 = vor.u32 %v10017_v55, %v8224_v61  ;;  %v10185_v61 = vld [vmem:[%s15491_s7 + $0x8b8] sm:$0xf0]  ;;  %v9257_v55 = vor.u32 %v10272_v62, %v9254_v35 }
 0x37e   :  { %6226 = vmatpush.bf16.msrb.mxu2 %v8725_v50  ;;  %6197 = vmatpush.bf16.msrb.mxu0 %v8305_v56  ;;  %v8277_v50 = vor.u32 %v10027_v9, %v8274_v29  ;;  %v8641_v56 = vor.u32 %v10118_v63, %v8638_v0  ;;  %v8610_v9 = vld [vmem:[%s15491_s7 + $0x684] sm:$0xf0]  ;;  %v9226_v63 = vld [vmem:[%s15491_s7 + $0xb54] sm:$0xf0] }
 0x380   :  { %6155 = vmatpush.bf16.msra.mxu1 %v9421_v6  ;;  %6239 = vmatpush.bf16.msrb.mxu3 %v8977_v11  ;;  %v10010_v6 = vld [vmem:[%s15491_s7 + $0x340] sm:$0xf0]  ;;  %v10111_v11 = vld [vmem:[%s15491_s7 + $0x66c] sm:$0xf] }
 0x381   :  { %v8613_v27 = vor.u32 %v10111_v11, %v8610_v9  ;;  %v10258_v11 = vld [vmem:[%s15491_s7 + $0xb04] sm:$0xf]  ;;  %v9198_v9 = vld [vmem:[%s15491_s7 + $0xb1c] sm:$0xf0] }
 0x382   :  { %6227 = vmatpush.bf16.msrb.mxu2 %v8697_v43  ;;  %v5852_v43 = vadd.f32 %v5851_v59, %v5838_v52  ;;  %6198 = vmatpush.bf16.msrb.mxu0 %v8277_v50  ;;  %v7860_v59 = vld [vmem:[%s15491_s7 + $0x88] sm:$0xf] }
 0x383   :  { %v7861_v29 = vor.u32 %v9926_v18, %v7860_v59  ;;  %v8868_v18 = vld [vmem:[%s15491_s7 + $0x868] sm:$0xf] }
 0x384   :  { %6156 = vmatpush.bf16.msra.mxu1 %v9393_v21  ;;  %v5866_v38 = vadd.f32 %v5865_v4, %v5852_v43  ;;  %6240 = vmatpush.bf16.msrb.mxu3 %v8949_v33  ;;  %v8197_v4 = vor.u32 %v10010_v6, %v8196_v5  ;;  %v8168_v21 = vld [vmem:[%s15491_s7 + $0x2f0] sm:$0xf]  ;;  %v5921_v43 = vpop.f32.mrf.mxu0  ;;  %v5935_v59 = vpop.f32.mrf.mxu1  ;;  %v10178_v5 = vld [vmem:[%s15491_s7 + $0x880] sm:$0xf0] }
 0x385   :  { %6228 = vmatmul.bf16.vlgmr.msrb.gmra.mxu2 %v13077_v14  ;;  %v8169_v33 = vor.u32 %v10003_v42, %v8168_v21  ;;  %v10083_v21 = vld [vmem:[%s15491_s7 + $0x58c] sm:$0xf]  ;;  %v8498_v42 = vld [vmem:[%s15491_s7 + $0x5a4] sm:$0xf0] }
 0x386   :  { %6276 = vmatpush.bf16.msra.mxu2 %v8001_v60  ;;  %v5853_v60 = vpop.f32.mrf.mxu3  ;;  %6199 = vmatpush.bf16.msrb.mxu0 %v8249_v8  ;;  %v8554_v8 = vld [vmem:[%s15491_s7 + $0x614] sm:$0xf0]  ;;  %v8501_v35 = vor.u32 %v10083_v21, %v8498_v42  ;;  %v8728_v21 = vld [vmem:[%s15491_s7 + $0x750] sm:$0xf]  ;;  %v10143_v42 = vld [vmem:[%s15491_s7 + $0x768] sm:$0xf0] }
 0x387   :  { %v5854_v19 = vadd.f32 %v5853_v60, %v5840_v34  ;;  %v10097_v60 = vld [vmem:[%s15491_s7 + $0x5fc] sm:$0xf] }
 0x388   :  { %6157 = vmatpush.bf16.msra.mxu1 %v9365_v46  ;;  %6241 = vmatpush.bf16.msrb.mxu3 %v8921_v24  ;;  %v8585_v46 = vor.u32 %v10104_v28, %v8582_v7  ;;  %v8141_v24 = vor.u32 %v9996_v47, %v8140_v45  ;;  %v9975_v7 = vld [vmem:[%s15491_s7 + $0x228] sm:$0xf0] }
 0x389   :  { %6200 = vmatmul.bf16.vlgmr.msrb.gmra.mxu0 %v12947_v53  ;;  %v5868_v50 = vadd.f32 %v5867_v16, %v5854_v19  ;;  %v10090_v16 = vld [vmem:[%s15491_s7 + $0x5c4] sm:$0xf]  ;;  %v8840_v19 = vld [vmem:[%s15491_s7 + $0x830] sm:$0xf] }
 0x38a   :  { %6277 = vmatpush.bf16.msra.mxu2 %v7973_v26  ;;  %v5880_v26 = vadd.f32 %v5879_v37, %v5866_v38  ;;  %6248 = vmatpush.bf16.msra.mxu0 %v9341_v36  ;;  %v7805_v38 = vor.u32 %v9912_v44, %v7804_v57  ;;  %v10265_v36 = vld [vmem:[%s15491_s7 + $0xb3c] sm:$0xf]  ;;  %v10076_v57 = vld [vmem:[%s15491_s7 + $0x554] sm:$0xf] }
 0x38b   :  { %6158 = vmatmul.bf16.vlgmr.msra.gmra.mxu1 %v13556_v17  ;;  %6242 = vmatmul.bf16.vlgmr.msrb.gmra.mxu3 %v13247_v1 }
 0x38c   :  { %6206 = vmatpush.bf16.msrb.mxu1 %v8669_v58  ;;  %6290 = vmatpush.bf16.msra.mxu3 %v8225_v2  ;;  %v5894_v51 = vadd.f32 %v5893_v15, %v5880_v26  ;;  %v5895_v58 = vpop.f32.mrf.mxu2  ;;  %v8897_v2 = vor.u32 %v10185_v61, %v8896_v20  ;;  %v8557_v26 = vor.u32 %v10097_v60, %v8554_v8  ;;  %v5937_v62 = vpop.f32.mrf.mxu1  ;;  %v9968_v20 = vld [vmem:[%s15491_s7 + $0x1f0] sm:$0xf0]  ;;  %v9562_v60 = vld [vmem:[%s15491_s7 + $0xdf4] sm:$0xf0] }
 0x38d   :  { %v9229_v15 = vor.u32 %v10265_v36, %v9226_v63  ;;  %v10157_v63 = vld [vmem:[%s15491_s7 + $0x7d8] sm:$0xf0] }
 0x38e   :  { %6278 = vmatpush.bf16.msra.mxu2 %v7945_v31  ;;  %v7832_v31 = vld [vmem:[%s15491_s7 + $0x50] sm:$0xf]  ;;  %v5907_v25 = vpop.f32.mrf.mxu3  ;;  %6249 = vmatpush.bf16.msra.mxu0 %v9313_v12  ;;  %v8113_v12 = vor.u32 %v9989_v23, %v8112_v3 }
 0x38f   :  { %v7833_v52 = vor.u32 %v9919_v30, %v7832_v31  ;;  %v5908_v37 = vadd.f32 %v5907_v25, %v5894_v51  ;;  %v10171_v51 = vld [vmem:[%s15491_s7 + $0x848] sm:$0xf0]  ;;  %v9201_v30 = vor.u32 %v10258_v11, %v9198_v9  ;;  %v5923_v25 = vpop.f32.mrf.mxu0  ;;  %v10234_v11 = vld [vmem:[%s15491_s7 + $0xa40] sm:$0xf0] }
 0x390   :  { %6207 = vmatpush.bf16.msrb.mxu1 %v8641_v56  ;;  %6291 = vmatpush.bf16.msra.mxu3 %v8197_v4  ;;  %v8526_v56 = vld [vmem:[%s15491_s7 + $0x5dc] sm:$0xf0]  ;;  %v8869_v4 = vor.u32 %v10178_v5, %v8868_v18  ;;  %v8841_v28 = vor.u32 %v10171_v51, %v8840_v19  ;;  %v8392_v51 = vld [vmem:[%s15491_s7 + $0x4b0] sm:$0xf] }
 0x391   :  { %v5922_v0 = vadd.f32 %v5921_v43, %v5908_v37  ;;  %v8529_v31 = vor.u32 %v10090_v16, %v8526_v56  ;;  %v8470_v37 = vld [vmem:[%s15491_s7 + $0x56c] sm:$0xf0]  ;;  %v9534_v18 = vld [vmem:[%s15491_s7 + $0xdbc] sm:$0xf0]  ;;  %v10066_v16 = vld [vmem:[%s15491_s7 + $0x500] sm:$0xf0] }
 0x392   :  { %6279 = vmatpush.bf16.msra.mxu2 %v7917_v39  ;;  %v5882_v39 = vadd.f32 %v5881_v48, %v5868_v50  ;;  %6250 = vmatpush.bf16.msra.mxu0 %v9285_v40  ;;  %v8085_v48 = vor.u32 %v9982_v10, %v8084_v22  ;;  %v8056_v50 = vld [vmem:[%s15491_s7 + $0x210] sm:$0xf]  ;;  %v8473_v36 = vor.u32 %v10076_v57, %v8470_v37  ;;  %v8756_v56 = vld [vmem:[%s15491_s7 + $0x788] sm:$0xf]  ;;  %v10335_v22 = vld [vmem:[%s15491_s7 + $0xd6c] sm:$0xf] }
 0x393   :  { %v5936_v6 = vadd.f32 %v5935_v59, %v5922_v0  ;;  %v9142_v43 = vld [vmem:[%s15491_s7 + $0xaac] sm:$0xf0]  ;;  %v8057_v61 = vor.u32 %v9975_v7, %v8056_v50  ;;  %v9120_v0 = vld [vmem:[%s15491_s7 + $0xa60] sm:$0xf]  ;;  %v9506_v10 = vld [vmem:[%s15491_s7 + $0xd84] sm:$0xf0] }
 0x394   :  { %6208 = vmatpush.bf16.msrb.mxu1 %v8613_v27  ;;  %6292 = vmatpush.bf16.msra.mxu3 %v8169_v33  ;;  %v10251_v27 = vld [vmem:[%s15491_s7 + $0xacc] sm:$0xf]  ;;  %v10164_v33 = vld [vmem:[%s15491_s7 + $0x810] sm:$0xf0] }
 0x395   :  { %10365 = vtanh.f32 %v5936_v6  ;;  %v10328_v50 = vld [vmem:[%s15491_s7 + $0xd34] sm:$0xf] }
 0x396   :  { %6280 = vmatpush.bf16.msra.mxu2 %v7889_v49  ;;  %v5896_v49 = vadd.f32 %v5895_v58, %v5882_v39  ;;  %6251 = vmatpush.bf16.msra.mxu0 %v9257_v55  ;;  %v5909_v34 = vpop.f32.mrf.mxu3  ;;  %v10244_v39 = vld [vmem:[%s15491_s7 + $0xa94] sm:$0xf]  ;;  %v10349_v55 = vld [vmem:[%s15491_s7 + $0xddc] sm:$0xf]  ;;  %v8448_v58 = vld [vmem:[%s15491_s7 + $0x520] sm:$0xf] }
 0x397   :  { %v9565_v3 = vor.u32 %v10349_v55, %v9562_v60  ;;  %v10220_v57 = vld [vmem:[%s15491_s7 + $0x9d0] sm:$0xf0]  ;;  %v9008_v55 = vld [vmem:[%s15491_s7 + $0x980] sm:$0xf]  ;;  %v10213_v60 = vld [vmem:[%s15491_s7 + $0x998] sm:$0xf0] }
 0x398   :  { %6209 = vmatpush.bf16.msrb.mxu1 %v8585_v46  ;;  %6293 = vmatpush.bf16.msra.mxu3 %v8141_v24  ;;  %v8028_v46 = vld [vmem:[%s15491_s7 + $0x1d8] sm:$0xf]  ;;  %v8784_v24 = vld [vmem:[%s15491_s7 + $0x7c0] sm:$0xf] }
 0x399   :  { %v8029_v23 = vor.u32 %v9968_v20, %v8028_v46  ;;  %v8785_v5 = vor.u32 %v10157_v63, %v8784_v24  ;;  %v8336_v46 = vld [vmem:[%s15491_s7 + $0x440] sm:$0xf]  ;;  %v10045_v20 = vld [vmem:[%s15491_s7 + $0x458] sm:$0xf0]  ;;  %v8308_v63 = vld [vmem:[%s15491_s7 + $0x408] sm:$0xf] }
 0x39a   :  { %6281 = vmatpush.bf16.msra.mxu2 %v7861_v29  ;;  %v5910_v29 = vadd.f32 %v5909_v34, %v5896_v49  ;;  %6252 = vmatpush.bf16.msra.mxu0 %v9229_v15  ;;  %v10241_v49 = vld [vmem:[%s15491_s7 + $0xa78] sm:$0xf0]  ;;  %v8420_v15 = vld [vmem:[%s15491_s7 + $0x4e8] sm:$0xf]  ;;  %v10150_v34 = vld [vmem:[%s15491_s7 + $0x7a0] sm:$0xf0] }
 0x39b   :  { %v10366_v44 = vpop.eup %10365  ;;  %v9121_v6 = vor.u32 %v10241_v49, %v9120_v0  ;;  %v9422_v24 = vld [vmem:[%s15491_s7 + $0xcdc] sm:$0xf0]  ;;  %v10038_v0 = vld [vmem:[%s15491_s7 + $0x420] sm:$0xf0] }
 0x39c   :  { %6210 = vmatpush.bf16.msrb.mxu1 %v8557_v26  ;;  %6294 = vmatpush.bf16.msra.mxu3 %v8113_v12  ;;  %v5924_v40 = vadd.f32 %v5923_v25, %v5910_v29  ;;  %6404 = vst [vmem:[#allocation2 + $0x10] sm:$0xff] %v10366_v44  ;;  %v10342_v26 = vld [vmem:[%s15491_s7 + $0xda4] sm:$0xf]  ;;  %v9092_v12 = vld [vmem:[%s15491_s7 + $0xa28] sm:$0xf] }
 0x39d   :  { %v9537_v29 = vor.u32 %v10342_v26, %v9534_v18  ;;  %v9093_v19 = vor.u32 %v10234_v11, %v9092_v12  ;;  %v9064_v25 = vld [vmem:[%s15491_s7 + $0x9f0] sm:$0xf]  ;;  %v10321_v44 = vld [vmem:[%s15491_s7 + $0xcfc] sm:$0xf]  ;;  %v10307_v26 = vld [vmem:[%s15491_s7 + $0xc8c] sm:$0xf] }
 0x39e   :  { %6282 = vmatpush.bf16.msra.mxu2 %v7833_v52  ;;  %v8812_v52 = vld [vmem:[%s15491_s7 + $0x7f8] sm:$0xf]  ;;  %v5938_v45 = vadd.f32 %v5937_v62, %v5924_v40  ;;  %6253 = vmatpush.bf16.msra.mxu0 %v9201_v30  ;;  %v10059_v30 = vld [vmem:[%s15491_s7 + $0x4c8] sm:$0xf0]  ;;  %v9478_v40 = vld [vmem:[%s15491_s7 + $0xd4c] sm:$0xf0]  ;;  %v5963_v49 = vpop.f32.mrf.mxu3 }
 0x39f   :  { %v8813_v8 = vor.u32 %v10164_v33, %v8812_v52  ;;  %v10052_v52 = vld [vmem:[%s15491_s7 + $0x490] sm:$0xf0]  ;;  %v8700_v33 = vld [vmem:[%s15491_s7 + $0x718] sm:$0xf]  ;;  %v9481_v37 = vor.u32 %v10328_v50, %v9478_v40  ;;  %v9394_v18 = vld [vmem:[%s15491_s7 + $0xca4] sm:$0xf0] }
 0x3a0   :  { %6211 = vmatpush.bf16.msrb.mxu1 %v8529_v31  ;;  %6295 = vmatpush.bf16.msra.mxu3 %v8085_v48  ;;  %10367 = vtanh.f32 %v5938_v45  ;;  %v8757_v31 = vor.u32 %v10150_v34, %v8756_v56  ;;  %v10227_v48 = vld [vmem:[%s15491_s7 + $0xa08] sm:$0xf0]  ;;  %v10136_v62 = vld [vmem:[%s15491_s7 + $0x730] sm:$0xf0]  ;;  %v9450_v45 = vld [vmem:[%s15491_s7 + $0xd14] sm:$0xf0]  ;;  %v5977_v56 = vpop.f32.mrf.mxu0  ;;  %v9397_v11 = vor.u32 %v10307_v26, %v9394_v18 }
 0x3a1   :  { %v9065_v7 = vor.u32 %v10227_v48, %v9064_v25  ;;  %v8952_v34 = vld [vmem:[%s15491_s7 + $0x910] sm:$0xf]  ;;  %v10199_v12 = vld [vmem:[%s15491_s7 + $0x928] sm:$0xf0]  ;;  %v10192_v48 = vld [vmem:[%s15491_s7 + $0x8f0] sm:$0xf0] }
 0x3a2   :  { %6283 = vmatpush.bf16.msra.mxu2 %v7805_v38  ;;  %v10073_v38 = vld [vmem:[%s15491_s7 + $0x538] sm:$0xf0] }
 0x3a3   :  { %v8449_v59 = vor.u32 %v10073_v38, %v8448_v58  ;;  %v8337_v58 = vor.u32 %v10045_v20, %v8336_v46  ;;  %v10314_v38 = vld [vmem:[%s15491_s7 + $0xcc4] sm:$0xf] }
 0x3a4   :  { %6212 = vmatpush.bf16.msrb.mxu1 %v8501_v35  ;;  %6296 = vmatpush.bf16.msra.mxu3 %v8057_v61  ;;  %v9036_v35 = vld [vmem:[%s15491_s7 + $0x9b8] sm:$0xf]  ;;  %v5949_v61 = vpop.f32.mrf.mxu2 }
 0x3a5   :  { %6284 = vmatmul.bf16.vlgmr.msra.gmra.mxu2 %v12844_v54  ;;  %v9170_v54 = vld [vmem:[%s15491_s7 + $0xae4] sm:$0xf0] }
 0x3a6   :  { %6332 = vmatpush.bf16.msrb.mxu2 %v8897_v2  ;;  %v9173_v47 = vor.u32 %v10251_v27, %v9170_v54  ;;  %v9145_v2 = vor.u32 %v10244_v39, %v9142_v43  ;;  %v10368_v9 = vpop.eup %10367  ;;  %v9509_v27 = vor.u32 %v10335_v22, %v9506_v10  ;;  %v8393_v54 = vor.u32 %v10059_v30, %v8392_v51  ;;  %v9366_v22 = vld [vmem:[%s15491_s7 + $0xc6c] sm:$0xf0]  ;;  %v8252_v10 = vld [vmem:[%s15491_s7 + $0x398] sm:$0xf] }
 0x3a7   :  { %6411 = vst [vmem:[#allocation2 + $0x48] sm:$0xff] %v10368_v9  ;;  %v9037_v43 = vor.u32 %v10220_v57, %v9036_v35  ;;  %v10300_v9 = vld [vmem:[%s15491_s7 + $0xc54] sm:$0xf]  ;;  %v8953_v51 = vor.u32 %v10199_v12, %v8952_v34  ;;  %v8924_v30 = vld [vmem:[%s15491_s7 + $0x8d8] sm:$0xf] }
 0x3a8   :  { %6254 = vmatpush.bf16.msra.mxu0 %v9173_v47  ;;  %6213 = vmatpush.bf16.msrb.mxu1 %v8473_v36  ;;  %v8701_v47 = vor.u32 %v10136_v62, %v8700_v33  ;;  %v9009_v36 = vor.u32 %v10213_v60, %v9008_v55  ;;  %v5991_v25 = vpop.f32.mrf.mxu1  ;;  %v9369_v40 = vor.u32 %v10300_v9, %v9366_v22  ;;  %v8644_v35 = vld [vmem:[%s15491_s7 + $0x6a8] sm:$0xf]  ;;  %v10122_v57 = vld [vmem:[%s15491_s7 + $0x6c0] sm:$0xf0]  ;;  %v10115_v55 = vld [vmem:[%s15491_s7 + $0x688] sm:$0xf0] }
 0x3a9   :  { %6297 = vmatpush.bf16.msra.mxu3 %v8029_v23  ;;  %v9425_v23 = vor.u32 %v10314_v38, %v9422_v24  ;;  %v8925_v33 = vor.u32 %v10192_v48, %v8924_v30  ;;  %v9288_v60 = vld [vmem:[%s15491_s7 + $0xbb0] sm:$0xf]  ;;  %v10269_v34 = vld [vmem:[%s15491_s7 + $0xb58] sm:$0xf0]  ;;  %v10262_v30 = vld [vmem:[%s15491_s7 + $0xb20] sm:$0xf0] }
 0x3aa   :  { %6333 = vmatpush.bf16.msrb.mxu2 %v8869_v4  ;;  %v8421_v4 = vor.u32 %v10066_v16, %v8420_v15  ;;  %v10031_v16 = vld [vmem:[%s15491_s7 + $0x3e8] sm:$0xf0]  ;;  %v8504_v48 = vld [vmem:[%s15491_s7 + $0x590] sm:$0xf] }
 0x3ab   :  { %6214 = vmatmul.bf16.vlgmr.msrb.gmra.mxu1 %v12919_v32 }
 0x3ac   :  { %6255 = vmatpush.bf16.msra.mxu0 %v9145_v2  ;;  %6262 = vmatpush.bf16.msra.mxu1 %v9565_v3  ;;  %v8980_v2 = vld [vmem:[%s15491_s7 + $0x948] sm:$0xf]  ;;  %v10206_v3 = vld [vmem:[%s15491_s7 + $0x960] sm:$0xf0] }
 0x3ad   :  { %6346 = vmatpush.bf16.msrb.mxu3 %v9121_v6  ;;  %v8981_v15 = vor.u32 %v10206_v3, %v8980_v2  ;;  %v8588_v2 = vld [vmem:[%s15491_s7 + $0x638] sm:$0xf]  ;;  %v10108_v3 = vld [vmem:[%s15491_s7 + $0x650] sm:$0xf0] }
 0x3ae   :  { %6334 = vmatpush.bf16.msrb.mxu2 %v8841_v28  ;;  %6298 = vmatmul.bf16.vlgmr.msra.gmra.mxu3 %v12802_v13  ;;  %v8729_v28 = vor.u32 %v10143_v42, %v8728_v21  ;;  %v8364_v13 = vld [vmem:[%s15491_s7 + $0x478] sm:$0xf]  ;;  %v8672_v21 = vld [vmem:[%s15491_s7 + $0x6e0] sm:$0xf]  ;;  %v10129_v42 = vld [vmem:[%s15491_s7 + $0x6f8] sm:$0xf0]  ;;  %v8589_v18 = vor.u32 %v10108_v3, %v8588_v2 }
 0x3af   :  { %6256 = vmatmul.bf16.vlgmr.msra.gmra.mxu0 %v13408_v41  ;;  %v8365_v39 = vor.u32 %v10052_v52, %v8364_v13  ;;  %v8673_v13 = vor.u32 %v10129_v42, %v8672_v21  ;;  %v9428_v2 = vld [vmem:[%s15491_s7 + $0xcc8] sm:$0xf]  ;;  %v10318_v3 = vld [vmem:[%s15491_s7 + $0xce0] sm:$0xf0] }
 0x3b0   :  { %6304 = vmatpush.bf16.msrb.mxu0 %v8449_v59  ;;  %6263 = vmatpush.bf16.msra.mxu1 %v9537_v29  ;;  %v8309_v59 = vor.u32 %v10038_v0, %v8308_v63  ;;  %v5951_v29 = vpop.f32.mrf.mxu2 }
 0x3b1   :  { %6347 = vmatpush.bf16.msrb.mxu3 %v9093_v19 }
 0x3b2   :  { %6335 = vmatpush.bf16.msrb.mxu2 %v8813_v8  ;;  %v9453_v8 = vor.u32 %v10321_v44, %v9450_v45 }
 0x3b4   :  { %6305 = vmatpush.bf16.msrb.mxu0 %v8421_v4  ;;  %6264 = vmatpush.bf16.msra.mxu1 %v9509_v27  ;;  %v9344_v27 = vld [vmem:[%s15491_s7 + $0xc20] sm:$0xf] }
 0x3b5   :  { %6348 = vmatpush.bf16.msrb.mxu3 %v9065_v7 }
 0x3b6   :  { %6336 = vmatpush.bf16.msrb.mxu2 %v8785_v5  ;;  %v15295_v5 = vld [vmem:[%s15492_s8] sm:$0xff] }
 0x3b7   :  { %v3289_v6 = vperm.slane %v15295_v5, 3 }
 0x3b8   :  { %6306 = vmatpush.bf16.msrb.mxu0 %v8393_v54  ;;  %6265 = vmatpush.bf16.msra.mxu1 %v9481_v37  ;;  %v10297_v54 = vld [vmem:[%s15491_s7 + $0xc38] sm:$0xf0]  ;;  %v9316_v37 = vld [vmem:[%s15491_s7 + $0xbe8] sm:$0xf]  ;;  %v6005_v45 = vpop.f32.mrf.mxu2 }
 0x3b9   :  { %6349 = vmatpush.bf16.msrb.mxu3 %v9037_v43  ;;  %v5950_v19 = vadd.f32 %v5949_v61, %v3289_v6  ;;  %v9345_v62 = vor.u32 %v10297_v54, %v9344_v27  ;;  %v8645_v43 = vor.u32 %v10122_v57, %v8644_v35  ;;  %v5952_v46 = vadd.f32 %v5951_v29, %v3289_v6  ;;  %v8616_v61 = vld [vmem:[%s15491_s7 + $0x670] sm:$0xf]  ;;  %v10087_v27 = vld [vmem:[%s15491_s7 + $0x5a8] sm:$0xf0]  ;;  %v10080_v57 = vld [vmem:[%s15491_s7 + $0x570] sm:$0xf0] }
 0x3ba   :  { %6337 = vmatpush.bf16.msrb.mxu2 %v8757_v31  ;;  %v10024_v31 = vld [vmem:[%s15491_s7 + $0x3b0] sm:$0xf0]  ;;  %v8617_v63 = vor.u32 %v10115_v55, %v8616_v61  ;;  %v10346_v61 = vld [vmem:[%s15491_s7 + $0xdc0] sm:$0xf0] }
 0x3bb   :  { %v5964_v50 = vadd.f32 %v5963_v49, %v5950_v19  ;;  %v8253_v7 = vor.u32 %v10024_v31, %v8252_v10  ;;  %v8532_v10 = vld [vmem:[%s15491_s7 + $0x5c8] sm:$0xf]  ;;  %v10094_v31 = vld [vmem:[%s15491_s7 + $0x5e0] sm:$0xf0] }
 0x3bc   :  { %6307 = vmatpush.bf16.msrb.mxu0 %v8365_v39  ;;  %6266 = vmatpush.bf16.msra.mxu1 %v9453_v8  ;;  %v10290_v39 = vld [vmem:[%s15491_s7 + $0xc00] sm:$0xf0]  ;;  %v10283_v8 = vld [vmem:[%s15491_s7 + $0xbc8] sm:$0xf0]  ;;  %v8533_v42 = vor.u32 %v10094_v31, %v8532_v10 }
 0x3bd   :  { %6350 = vmatpush.bf16.msrb.mxu3 %v9009_v36  ;;  %v5978_v52 = vadd.f32 %v5977_v56, %v5964_v50  ;;  %v9317_v20 = vor.u32 %v10290_v39, %v9316_v37  ;;  %v5993_v36 = vpop.f32.mrf.mxu1  ;;  %v9289_v49 = vor.u32 %v10283_v8, %v9288_v60  ;;  %v9232_v56 = vld [vmem:[%s15491_s7 + $0xb40] sm:$0xf]  ;;  %v9176_v50 = vld [vmem:[%s15491_s7 + $0xad0] sm:$0xf]  ;;  %v9148_v37 = vld [vmem:[%s15491_s7 + $0xa98] sm:$0xf] }
 0x3be   :  { %6338 = vmatpush.bf16.msrb.mxu2 %v8729_v28  ;;  %v5965_v28 = vpop.f32.mrf.mxu3  ;;  %v9233_v22 = vor.u32 %v10269_v34, %v9232_v56  ;;  %v10248_v39 = vld [vmem:[%s15491_s7 + $0xab0] sm:$0xf0]  ;;  %v9512_v8 = vld [vmem:[%s15491_s7 + $0xd70] sm:$0xf] }
 0x3bf   :  { %v5992_v44 = vadd.f32 %v5991_v25, %v5978_v52  ;;  %v8476_v52 = vld [vmem:[%s15491_s7 + $0x558] sm:$0xf] }
 0x3c0   :  { %6308 = vmatpush.bf16.msrb.mxu0 %v8337_v58  ;;  %6267 = vmatpush.bf16.msra.mxu1 %v9425_v23  ;;  %v5966_v58 = vadd.f32 %v5965_v28, %v5952_v46 }
 0x3c1   :  { %6351 = vmatpush.bf16.msrb.mxu3 %v8981_v15  ;;  %v6006_v38 = vadd.f32 %v6005_v45, %v5992_v44  ;;  %v8560_v15 = vld [vmem:[%s15491_s7 + $0x600] sm:$0xf]  ;;  %v10353_v45 = vld [vmem:[%s15491_s7 + $0xdf8] sm:$0xf0] }
 0x3c2   :  { %6339 = vmatpush.bf16.msrb.mxu2 %v8701_v47  ;;  %v5979_v47 = vpop.f32.mrf.mxu0  ;;  %v9568_v44 = vld [vmem:[%s15491_s7 + $0xde0] sm:$0xf] }
 0x3c3   :  { %v5980_v0 = vadd.f32 %v5979_v47, %v5966_v58  ;;  %v8477_v47 = vor.u32 %v10080_v57, %v8476_v52  ;;  %v9569_v46 = vor.u32 %v10353_v45, %v9568_v44  ;;  %v10339_v58 = vld [vmem:[%s15491_s7 + $0xd88] sm:$0xf0]  ;;  %v3291_v45 = vperm.slane %v15295_v5, 5 }
 0x3c4   :  { %6309 = vmatpush.bf16.msrb.mxu0 %v8309_v59  ;;  %6268 = vmatpush.bf16.msra.mxu1 %v9397_v11 }
 0x3c5   :  { %6340 = vmatmul.bf16.vlgmr.msrb.gmra.mxu2 %v13077_v14  ;;  %v8280_v14 = vld [vmem:[%s15491_s7 + $0x3d0] sm:$0xf]  ;;  %6352 = vmatpush.bf16.msrb.mxu3 %v8953_v51  ;;  %v5994_v59 = vadd.f32 %v5993_v36, %v5980_v0  ;;  %v9204_v51 = vld [vmem:[%s15491_s7 + $0xb08] sm:$0xf]  ;;  %v10332_v36 = vld [vmem:[%s15491_s7 + $0xd50] sm:$0xf0] }
 0x3c6   :  { %v8281_v4 = vor.u32 %v10031_v16, %v8280_v14  ;;  %v6019_v24 = vpop.f32.mrf.mxu3  ;;  %v10101_v14 = vld [vmem:[%s15491_s7 + $0x618] sm:$0xf0]  ;;  %v6007_v16 = vpop.f32.mrf.mxu2  ;;  %v9205_v25 = vor.u32 %v10262_v30, %v9204_v51  ;;  %v9456_v0 = vld [vmem:[%s15491_s7 + $0xd00] sm:$0xf] }
 0x3c7   :  { %v6020_v23 = vadd.f32 %v6019_v24, %v6006_v38  ;;  %v6008_v11 = vadd.f32 %v6007_v16, %v5994_v59  ;;  %v8561_v29 = vor.u32 %v10101_v14, %v8560_v15  ;;  %v9513_v38 = vor.u32 %v10339_v58, %v9512_v8  ;;  %v9484_v24 = vld [vmem:[%s15491_s7 + $0xd38] sm:$0xf]  ;;  %v10311_v59 = vld [vmem:[%s15491_s7 + $0xca8] sm:$0xf0]  ;;  %v10304_v16 = vld [vmem:[%s15491_s7 + $0xc70] sm:$0xf0] }
 0x3c8   :  { %6310 = vmatpush.bf16.msrb.mxu0 %v8281_v4  ;;  %6269 = vmatpush.bf16.msra.mxu1 %v9369_v40  ;;  %v6047_v9 = vpop.f32.mrf.mxu1  ;;  %v10255_v40 = vld [vmem:[%s15491_s7 + $0xae8] sm:$0xf0]  ;;  %v9372_v14 = vld [vmem:[%s15491_s7 + $0xc58] sm:$0xf] }
 0x3c9   :  { %6353 = vmatpush.bf16.msrb.mxu3 %v8925_v33  ;;  %v9177_v35 = vor.u32 %v10255_v40, %v9176_v50 }
 0x3ca   :  { %v6033_v26 = vpop.f32.mrf.mxu0 }
 0x3cb   :  { %6270 = vmatmul.bf16.vlgmr.msra.gmra.mxu1 %v13556_v17  ;;  %v6034_v12 = vadd.f32 %v6033_v26, %v6020_v23  ;;  %v9400_v23 = vld [vmem:[%s15491_s7 + $0xc90] sm:$0xf]  ;;  %v3290_v26 = vperm.slane %v15295_v5, 4 }
 0x3cc   :  { %6311 = vmatpush.bf16.msrb.mxu0 %v8253_v7  ;;  %6318 = vmatpush.bf16.msrb.mxu1 %v8673_v13  ;;  %v8505_v13 = vor.u32 %v10087_v27, %v8504_v48 }
 0x3cd   :  { %6354 = vmatmul.bf16.vlgmr.msrb.gmra.mxu3 %v13247_v1  ;;  %v10276_v1 = vld [vmem:[%s15491_s7 + $0xb90] sm:$0xf0]  ;;  %v6048_v4 = vadd.f32 %v6047_v9, %v6034_v12 }
 0x3ce   :  { %v6021_v19 = vpop.f32.mrf.mxu3 }
 0x3cf   :  { %6312 = vmatmul.bf16.vlgmr.msrb.gmra.mxu0 %v12947_v53  ;;  %v9260_v53 = vld [vmem:[%s15491_s7 + $0xb78] sm:$0xf]  ;;  %v6022_v21 = vadd.f32 %v6021_v19, %v6008_v11  ;;  %10369 = vtanh.f32 %v6048_v4  ;;  %v9373_v11 = vor.u32 %v10304_v16, %v9372_v14 }
 0x3d0   :  { %6360 = vmatpush.bf16.msra.mxu0 %v9345_v62  ;;  %6319 = vmatpush.bf16.msrb.mxu1 %v8645_v43  ;;  %v9261_v6 = vor.u32 %v10276_v1, %v9260_v53  ;;  %v6049_v7 = vpop.f32.mrf.mxu1  ;;  %v9149_v43 = vor.u32 %v10248_v39, %v9148_v37  ;;  %v9429_v1 = vor.u32 %v10318_v3, %v9428_v2 }
 0x3d2   :  { %v6035_v54 = vpop.f32.mrf.mxu0 }
 0x3d3   :  { %v6036_v28 = vadd.f32 %v6035_v54, %v6022_v21 }
 0x3d4   :  { %6361 = vmatpush.bf16.msra.mxu0 %v9317_v20  ;;  %6320 = vmatpush.bf16.msrb.mxu1 %v8617_v63  ;;  %v9540_v20 = vld [vmem:[%s15491_s7 + $0xda8] sm:$0xf]  ;;  %v9485_v63 = vor.u32 %v10332_v36, %v9484_v24 }
 0x3d5   :  { %v10370_v33 = vpop.eup %10369  ;;  %v6050_v62 = vadd.f32 %v6049_v7, %v6036_v28  ;;  %v9541_v60 = vor.u32 %v10346_v61, %v9540_v20 }
 0x3d6   :  { %6405 = vst [vmem:[#allocation2 + $0x18] sm:$0xff] %v10370_v33  ;;  %v6075_v53 = vpop.f32.mrf.mxu3 }
 0x3d7   :  { %10371 = vtanh.f32 %v6050_v62 }
 0x3d8   :  { %6362 = vmatpush.bf16.msra.mxu0 %v9289_v49  ;;  %6321 = vmatpush.bf16.msrb.mxu1 %v8589_v18 }
 0x3da   :  { %v6089_v18 = vpop.f32.mrf.mxu0 }
 0x3dc   :  { %6363 = vmatpush.bf16.msra.mxu0 %v9261_v6  ;;  %6322 = vmatpush.bf16.msrb.mxu1 %v8561_v29  ;;  %v9401_v6 = vor.u32 %v10311_v59, %v9400_v23 }
 0x3dd   :  { %v10372_v55 = vpop.eup %10371 }
 0x3de   :  { %6412 = vst [vmem:[#allocation2 + $0x50] sm:$0xff] %v10372_v55  ;;  %v6077_v9 = vpop.f32.mrf.mxu3 }
 0x3e0   :  { %6364 = vmatpush.bf16.msra.mxu0 %v9233_v22  ;;  %6323 = vmatpush.bf16.msrb.mxu1 %v8533_v42 }
 0x3e2   :  { %v6091_v10 = vpop.f32.mrf.mxu0 }
 0x3e4   :  { %6365 = vmatpush.bf16.msra.mxu0 %v9205_v25  ;;  %6324 = vmatpush.bf16.msrb.mxu1 %v8505_v13 }
 0x3e6   :  { %v6131_v30 = vpop.f32.mrf.mxu3 }
 0x3e8   :  { %6366 = vmatpush.bf16.msra.mxu0 %v9177_v35  ;;  %6325 = vmatpush.bf16.msrb.mxu1 %v8477_v47  ;;  %v6103_v34 = vpop.f32.mrf.mxu1 }
 0x3ea   :  { %v6145_v27 = vpop.f32.mrf.mxu0 }
 0x3eb   :  { %6326 = vmatmul.bf16.vlgmr.msrb.gmra.mxu1 %v12919_v32  ;;  %v10325_v32 = vld [vmem:[%s15491_s7 + $0xd18] sm:$0xf0]  ;;  %s10413_s7 = smov [#allocation2]  }
 0x3ec   :  { %6367 = vmatpush.bf16.msra.mxu0 %v9149_v43  ;;  %6374 = vmatpush.bf16.msra.mxu1 %v9569_v46  ;;  %v9457_v49 = vor.u32 %v10325_v32, %v9456_v0  ;;  %s6420_s12 = sshll.u32 %s10413_s7, 4  ;;  %s6421_s12 = int_to_ptr.vmem [resolvable:$true] %s6420_s12 }
 0x3ee   :  { %v6133_v13 = vpop.f32.mrf.mxu3 }
 0x3ef   :  { %6368 = vmatmul.bf16.vlgmr.msra.gmra.mxu0 %v13408_v41  ;;  %v6061_v41 = vpop.f32.mrf.mxu2 }
 0x3f0   :  { %6375 = vmatpush.bf16.msra.mxu1 %v9541_v60  ;;  %v6062_v56 = vadd.f32 %v6061_v41, %v3290_v26  ;;  %v6105_v21 = vpop.f32.mrf.mxu1 }
 0x3f2   :  { %v6076_v12 = vadd.f32 %v6075_v53, %v6062_v56  ;;  %v6147_v33 = vpop.f32.mrf.mxu0 }
 0x3f4   :  { %6376 = vmatpush.bf16.msra.mxu1 %v9513_v38  ;;  %v6090_v29 = vadd.f32 %v6089_v18, %v6076_v12 }
 0x3f6   :  { %v6104_v4 = vadd.f32 %v6103_v34, %v6090_v29  ;;  %v6187_v44 = vpop.f32.mrf.mxu3  ;;  %v3292_v29 = vperm.slane %v15295_v5, 6 }
 0x3f7   :  { %v6063_v15 = vpop.f32.mrf.mxu2 }
 0x3f8   :  { %6377 = vmatpush.bf16.msra.mxu1 %v9485_v63  ;;  %v6064_v31 = vadd.f32 %v6063_v15, %v3290_v26 }
 0x3fa   :  { %v6078_v19 = vadd.f32 %v6077_v9, %v6064_v31 }
 0x3fc   :  { %6378 = vmatpush.bf16.msra.mxu1 %v9457_v49  ;;  %v6092_v42 = vadd.f32 %v6091_v10, %v6078_v19 }
 0x3fe   :  { %v6106_v48 = vadd.f32 %v6105_v21, %v6092_v42  ;;  %v6189_v55 = vpop.f32.mrf.mxu3 }
 0x3ff   :  { %v6117_v22 = vpop.f32.mrf.mxu2 }
 0x400   :  { %6379 = vmatpush.bf16.msra.mxu1 %v9429_v1  ;;  %v6118_v51 = vadd.f32 %v6117_v22, %v6104_v4 }
 0x402   :  { %v6132_v25 = vadd.f32 %v6131_v30, %v6118_v51 }
 0x404   :  { %6380 = vmatpush.bf16.msra.mxu1 %v9401_v6  ;;  %v6146_v50 = vadd.f32 %v6145_v27, %v6132_v25 }
 0x406   :  { %v6201_v47 = vpop.f32.mrf.mxu0 }
 0x407   :  { %v6119_v54 = vpop.f32.mrf.mxu2 }
 0x408   :  { %6381 = vmatpush.bf16.msra.mxu1 %v9373_v11  ;;  %v6120_v40 = vadd.f32 %v6119_v54, %v6106_v48  ;;  %v6159_v28 = vpop.f32.mrf.mxu1 }
 0x409   :  { %v6160_v7 = vadd.f32 %v6159_v28, %v6146_v50 }
 0x40a   :  { %v6134_v52 = vadd.f32 %v6133_v13, %v6120_v40 }
 0x40b   :  { %6382 = vmatmul.bf16.vlgmr.msra.gmra.mxu1 %v13556_v17  ;;  %10373 = vtanh.f32 %v6160_v7 }
 0x40c   :  { %v6148_v62 = vadd.f32 %v6147_v33, %v6134_v52 }
 0x40e   :  { %v6203_v38 = vpop.f32.mrf.mxu0  ;;  %v6243_v0 = vpop.f32.mrf.mxu3 }
 0x40f   :  { %v6173_v39 = vpop.f32.mrf.mxu2 }
 0x410   :  { %v6161_v35 = vpop.f32.mrf.mxu1  ;;  %v6174_v46 = vadd.f32 %v6173_v39, %v3291_v45 }
 0x411   :  { %v10374_v17 = vpop.eup %10373  ;;  %v6162_v57 = vadd.f32 %v6161_v35, %v6148_v62 }
 0x412   :  { %6406 = vst [vmem:[#allocation2 + $0x20] sm:$0xff] %v10374_v17  ;;  %v6188_v61 = vadd.f32 %v6187_v44, %v6174_v46 }
 0x413   :  { %10375 = vtanh.f32 %v6162_v57 }
 0x414   :  { %v6202_v60 = vadd.f32 %v6201_v47, %v6188_v61 }
 0x416   :  { %v6245_v18 = vpop.f32.mrf.mxu3 }
 0x417   :  { %v6175_v43 = vpop.f32.mrf.mxu2 }
 0x418   :  { %v6176_v24 = vadd.f32 %v6175_v43, %v3291_v45 }
 0x419   :  { %v10376_v37 = vpop.eup %10375 }
 0x41a   :  { %6413 = vst [vmem:[#allocation2 + $0x58] sm:$0xff] %v10376_v37  ;;  %v6190_v36 = vadd.f32 %v6189_v55, %v6176_v24 }
 0x41c   :  { %v6204_v41 = vadd.f32 %v6203_v38, %v6190_v36 }
 0x41f   :  { %v6229_v58 = vpop.f32.mrf.mxu2 }
 0x427   :  { %v6231_v53 = vpop.f32.mrf.mxu2 }
 0x428   :  { %v6215_v20 = vpop.f32.mrf.mxu1 }
 0x429   :  { %v6216_v8 = vadd.f32 %v6215_v20, %v6202_v60 }
 0x42b   :  { %v6230_v63 = vadd.f32 %v6229_v58, %v6216_v8 }
 0x42c   :  { %v6257_v3 = vpop.f32.mrf.mxu0 }
 0x42d   :  { %v6244_v49 = vadd.f32 %v6243_v0, %v6230_v63 }
 0x42f   :  { %v6258_v1 = vadd.f32 %v6257_v3, %v6244_v49  ;;  %v6285_v11 = vpop.f32.mrf.mxu2 }
 0x430   :  { %v6217_v32 = vpop.f32.mrf.mxu1  ;;  %v6286_v10 = vadd.f32 %v6285_v11, %v3292_v29 }
 0x431   :  { %v6218_v2 = vadd.f32 %v6217_v32, %v6204_v41  ;;  %v6299_v9 = vpop.f32.mrf.mxu3 }
 0x432   :  { %v6300_v19 = vadd.f32 %v6299_v9, %v6286_v10 }
 0x433   :  { %v6232_v23 = vadd.f32 %v6231_v53, %v6218_v2 }
 0x434   :  { %v6259_v15 = vpop.f32.mrf.mxu0 }
 0x435   :  { %v6246_v6 = vadd.f32 %v6245_v18, %v6232_v23 }
 0x437   :  { %v6260_v14 = vadd.f32 %v6259_v15, %v6246_v6  ;;  %v6287_v22 = vpop.f32.mrf.mxu2 }
 0x438   :  { %v6288_v48 = vadd.f32 %v6287_v22, %v3292_v29 }
 0x439   :  { %v6301_v51 = vpop.f32.mrf.mxu3 }
 0x43a   :  { %v6302_v27 = vadd.f32 %v6301_v51, %v6288_v48 }
 0x448   :  { %v6271_v59 = vpop.f32.mrf.mxu1  ;;  %v6341_v42 = vpop.f32.mrf.mxu2 }
 0x449   :  { %v6272_v26 = vadd.f32 %v6271_v59, %v6258_v1 }
 0x44b   :  { %10377 = vtanh.f32 %v6272_v26 }
 0x44c   :  { %v6313_v4 = vpop.f32.mrf.mxu0 }
 0x44d   :  { %v6314_v30 = vadd.f32 %v6313_v4, %v6300_v19 }
 0x450   :  { %v6273_v16 = vpop.f32.mrf.mxu1  ;;  %v6355_v50 = vpop.f32.mrf.mxu3 }
 0x451   :  { %v10378_v56 = vpop.eup %10377  ;;  %v6274_v34 = vadd.f32 %v6273_v16, %v6260_v14  ;;  %v6343_v5 = vpop.f32.mrf.mxu2 }
 0x452   :  { %6407 = vst [vmem:[#allocation2 + $0x28] sm:$0xff] %v10378_v56 }
 0x453   :  { %10379 = vtanh.f32 %v6274_v34 }
 0x454   :  { %v6315_v25 = vpop.f32.mrf.mxu0 }
 0x455   :  { %v6316_v28 = vadd.f32 %v6315_v25, %v6302_v27 }
 0x458   :  { %v6357_v57 = vpop.f32.mrf.mxu3 }
 0x459   :  { %v10380_v12 = vpop.eup %10379 }
 0x45a   :  { %6414 = vst [vmem:[#allocation2 + $0x60] sm:$0xff] %v10380_v12 }
 0x468   :  { %v6327_v31 = vpop.f32.mrf.mxu1 }
 0x469   :  { %v6328_v21 = vadd.f32 %v6327_v31, %v6314_v30 }
 0x46b   :  { %v6342_v54 = vadd.f32 %v6341_v42, %v6328_v21 }
 0x46c   :  { %v6369_v52 = vpop.f32.mrf.mxu0 }
 0x46d   :  { %v6356_v7 = vadd.f32 %v6355_v50, %v6342_v54 }
 0x46f   :  { %v6370_v33 = vadd.f32 %v6369_v52, %v6356_v7 }
 0x470   :  { %v6329_v40 = vpop.f32.mrf.mxu1 }
 0x471   :  { %v6330_v13 = vadd.f32 %v6329_v40, %v6316_v28 }
 0x473   :  { %v6344_v62 = vadd.f32 %v6343_v5, %v6330_v13 }
 0x474   :  { %v6371_v39 = vpop.f32.mrf.mxu0 }
 0x475   :  { %v6358_v37 = vadd.f32 %v6357_v57, %v6344_v62 }
 0x477   :  { %v6372_v44 = vadd.f32 %v6371_v39, %v6358_v37 }
 0x488   :  { %v6383_v35 = vpop.f32.mrf.mxu1 }
 0x489   :  { %v6384_v17 = vadd.f32 %v6383_v35, %v6370_v33 }
 0x48b   :  { %10381 = vtanh.f32 %v6384_v17 }
 0x490   :  { %v6385_v45 = vpop.f32.mrf.mxu1 }
 0x491   :  { %v10382_v47 = vpop.eup %10381  ;;  %v6386_v43 = vadd.f32 %v6385_v45, %v6372_v44 }
 0x492   :  { %6408 = vst [vmem:[#allocation2 + $0x30] sm:$0xff] %v10382_v47 }
 0x493   :  { %10383 = vtanh.f32 %v6386_v43 }
 0x499   :  { %v10384_v46 = vpop.eup %10383 }
 0x49a   :  { %6415 = vst [vmem:[#allocation2 + $0x68] sm:$0xff] %v10384_v46 }
 0x49b   :  { %6428 = dma.vmem_to_hbm [thread:$0]  %s6421_s12, 1792, %s6423_s15, [#allocation3], %s10414_s16, %s10414_s16, %s10415_s17  }
 0x49c   :  { %10411 = dma.done.wait [#allocation3], 1792  }
 0x49d   :  { %10412 = vsyncadd [#allocation3], 4294965504 }
 0x49e   :  { %6433 = vsyncpa [#allocation3], 1 }

</bundles_post_ra>
